<compile_context>
chip_gen: v7x
topology: tpu7x:2x2x1
jax: 0.10.0
libtpu: 0.0.40
codegen_flags: <defaults>
</compile_context>

<pallas_src>
import jax
import jax.numpy as jnp
import numpy as np
from jax.experimental import pallas as pl
from jax.experimental.pallas import tpu as pltpu


# ----------------------------------------------------------------------------
# Kernel: semantic attention for one tile of T_N nodes.
# ----------------------------------------------------------------------------
def _semantic_attention_kernel(z_ref, w1_ref, b1_ref, w2_ref, out_ref):
    # z_ref  : (M, T_N, F)  per-metapath node-embedding slabs for this node tile
    # w1_ref : (F, H)       Linear1 weight (torch weight.T)
    # b1_ref : (1, H)       Linear1 bias
    # w2_ref : (1, H)       Linear2 weight row (torch nn.Linear(H, 1).weight)
    # out_ref: (T_N, F)
    m = z_ref.shape[0]

    w1 = w1_ref[...].astype(jnp.bfloat16)          # MXU operand (bf16 native everywhere)
    b1 = b1_ref[...]                               # (1, H) f32
    w2 = w2_ref[...]                               # (1, H) f32

    # Per-metapath attention scores, kept as (T_N, 1) columns: no (T_N*M, ...)
    # reshapes and no lane-sparse (H, 1) matmul.
    scores = []
    for mm in range(m):
        zm = z_ref[mm]                                             # (T_N, F) lane-dense
        proj = jnp.tanh(
            jnp.dot(zm.astype(jnp.bfloat16), w1,
                    preferred_element_type=jnp.float32) + b1)      # (T_N, H) f32
        scores.append(jnp.sum(proj * w2, axis=-1, keepdims=True))  # (T_N, 1), XLU reduce

    # Softmax over the metapath axis, unrolled across the M score columns.
    s_max = scores[0]
    for mm in range(1, m):
        s_max = jnp.maximum(s_max, scores[mm])
    exps = [jnp.exp(s - s_max) for s in scores]
    denom = exps[0]
    for mm in range(1, m):
        denom = denom + exps[mm]
    inv = pl.reciprocal(denom, approx=False)                       # exact; one EUP op

    # out[n, :] = sum_m beta[n, m] * z[m, n, :]  (f32 accumulate)
    acc = (exps[0] * inv) * z_ref[0].astype(jnp.float32)
    for mm in range(1, m):
        acc = acc + (exps[mm] * inv) * z_ref[mm].astype(jnp.float32)
    out_ref[...] = acc.astype(out_ref.dtype)


# ----------------------------------------------------------------------------
# Wrapper
# ----------------------------------------------------------------------------
def semantic_attention(z_mnf, w1, b1, w2_row, *, tile_n=1024):
    """Semantic attention over metapaths.

    z_mnf  : (M, N, F)  per-metapath node embeddings stacked on axis 0
                        (== torch z.transpose(0, 1); stack at the producer,
                        do NOT transpose here).
    w1     : (F, H)     Linear1 weight, transposed torch layout.
    b1     : (1, H)     Linear1 bias.
    w2_row : (1, H)     Linear2 weight (torch nn.Linear(H, 1, bias=False).weight).
    returns: (N, F)

    tile_n: node-tile size; sweep 512-2048.  Keep <= ~1024 on v5e at the
    default scoped-VMEM limit, and <= N/2 on v7x so both TCs get work.
    """
    m, n, f = z_mnf.shape
    h = w1.shape[1]

    t_n = min(tile_n, n)
    t_n = max(8, (t_n // 8) * 8)               # sublane alignment
    n_pad = pl.cdiv(n, t_n) * t_n
    if n_pad != n:
        # Avoid this path when possible (extra HBM round trip of z): pick a
        # tile_n that divides N.  Padded rows get a uniform softmax over zero
        # embeddings -> zero output, and are sliced off below.
        z_in = jnp.pad(z_mnf, ((0, 0), (0, n_pad - n), (0, 0)))
    else:
        z_in = z_mnf

    out = pl.pallas_call(
        _semantic_attention_kernel,
        out_shape=jax.ShapeDtypeStruct((n_pad, f), z_mnf.dtype),
        grid=(n_pad // t_n,),
        in_specs=[
            pl.BlockSpec((m, t_n, f), lambda i: (0, i, 0)),   # z tile (streamed)
            pl.BlockSpec((f, h), lambda i: (0, 0)),           # W1   (resident)
            pl.BlockSpec((1, h), lambda i: (0, 0)),           # b1   (resident)
            pl.BlockSpec((1, h), lambda i: (0, 0)),           # w2   (resident)
        ],
        out_specs=pl.BlockSpec((t_n, f), lambda i: (i, 0)),
        compiler_params=pltpu.CompilerParams(
            dimension_semantics=("parallel",)),
    )(z_in, w1, b1, w2_row)
    return out[:n]


# ----------------------------------------------------------------------------
# Pure-JAX reference (same math as the torch module, no Pallas).
# ----------------------------------------------------------------------------
def semantic_attention_ref(z_mnf, w1, b1, w2_row):
    z = jnp.transpose(z_mnf, (1, 0, 2))                           # (N, M, F)
    w = jnp.tanh(jnp.einsum('nmf,fh->nmh', z, w1) + b1) @ w2_row.T  # (N, M, 1)
    w = w - jnp.max(w, axis=1, keepdims=True)
    p = jnp.exp(w)
    beta = p / jnp.sum(p, axis=1, keepdims=True)
    return jnp.sum(beta * z, axis=1)                              # (N, F)


if __name__ == "__main__":
    # Shapes consistent with SemanticAttention(in_size=64, hidden_size=128)
    # applied to a stack of M=4 per-metapath node embeddings for N=1024 nodes.
    M, N, F, H = 4, 1024, 64, 128
    TILE_N = 256                                   # divides N -> no pad; grid of 4

    key = jax.random.PRNGKey(0)
    k1, k2, k3, k4 = jax.random.split(key, 4)
    z = jax.random.normal(k1, (M, N, F), dtype=jnp.float32)        # (M, N, F) slabs
    w1 = 0.2 * jax.random.normal(k2, (F, H), dtype=jnp.float32)    # Linear1 weight.T
    b1 = 0.1 * jax.random.normal(k3, (1, H), dtype=jnp.float32)    # Linear1 bias
    w2 = 0.2 * jax.random.normal(k4, (1, H), dtype=jnp.float32)    # Linear2 weight row

    out = jax.block_until_ready(semantic_attention(z, w1, b1, w2, tile_n=TILE_N))
    ref = jax.block_until_ready(semantic_attention_ref(z, w1, b1, w2))

    assert out.shape == (N, F), out.shape
    out_np, ref_np = np.asarray(out), np.asarray(ref)
    assert np.all(np.isfinite(out_np))
    err = np.max(np.abs(out_np - ref_np))
    assert np.allclose(out_np, ref_np, atol=3e-2, rtol=3e-2), err

    print("KERNEL_OK")
</pallas_src>

<mosaic_0001>
module attributes {stable_mosaic.version = 11 : i64} {
  func.func @_semantic_attention_kernel(%arg0: i32, %arg1: memref<4x256x64xf32, #tpu.memory_space<vmem>>, %arg2: memref<64x128xf32, #tpu.memory_space<vmem>>, %arg3: memref<1x128xf32, #tpu.memory_space<vmem>>, %arg4: memref<1x128xf32, #tpu.memory_space<vmem>>, %arg5: memref<256x64xf32, #tpu.memory_space<vmem>>) attributes {dimension_semantics = [#tpu.dimension_semantics<parallel>], iteration_bounds = array<i64: 4>, scalar_prefetch = 0 : i64, scratch_operands = 0 : i64, tpu.core_type = #tpu.core_type<tc>, window_params = [{transform_indices = @transform_0, window_bounds = array<i64: 4, 256, 64>}, {pipeline_mode = #tpu.pipeline_mode<synchronous>, transform_indices = @transform_1, window_bounds = array<i64: 64, 128>}, {pipeline_mode = #tpu.pipeline_mode<synchronous>, transform_indices = @transform_2, window_bounds = array<i64: 1, 128>}, {pipeline_mode = #tpu.pipeline_mode<synchronous>, transform_indices = @transform_3, window_bounds = array<i64: 1, 128>}, {transform_indices = @transform_4, window_bounds = array<i64: 256, 64>}]} {
    %c0 = arith.constant 0 : index
    %c0_0 = arith.constant 0 : index
    %0 = vector.load %arg2[%c0, %c0_0] : memref<64x128xf32, #tpu.memory_space<vmem>>, vector<64x128xf32>
    %1 = arith.truncf %0 : vector<64x128xf32> to vector<64x128xbf16>
    %c0_1 = arith.constant 0 : index
    %c0_2 = arith.constant 0 : index
    %2 = vector.load %arg3[%c0_1, %c0_2] : memref<1x128xf32, #tpu.memory_space<vmem>>, vector<1x128xf32>
    %c0_3 = arith.constant 0 : index
    %c0_4 = arith.constant 0 : index
    %3 = vector.load %arg4[%c0_3, %c0_4] : memref<1x128xf32, #tpu.memory_space<vmem>>, vector<1x128xf32>
    %c0_5 = arith.constant 0 : index
    %c0_6 = arith.constant 0 : index
    %c0_7 = arith.constant 0 : index
    %4 = vector.load %arg1[%c0_5, %c0_6, %c0_7] : memref<4x256x64xf32, #tpu.memory_space<vmem>>, vector<1x256x64xf32>
    %5 = vector.shape_cast %4 : vector<1x256x64xf32> to vector<256x64xf32>
    %6 = arith.truncf %5 : vector<256x64xf32> to vector<256x64xbf16>
    %cst = arith.constant dense<0.000000e+00> : vector<256x128xf32>
    %7 = tpu.matmul %6, %1, %cst {dimension_numbers = #tpu.dot_dimension_numbers<[1], [0], [0], [1], [0, 0, 1, 1], [], []>} : vector<256x64xbf16>, vector<64x128xbf16>, vector<256x128xf32> -> vector<256x128xf32>
    %8 = vector.broadcast %2 : vector<1x128xf32> to vector<256x128xf32>
    %9 = arith.addf %7, %8 : vector<256x128xf32>
    %10 = math.tanh %9 : vector<256x128xf32>
    %11 = vector.broadcast %3 : vector<1x128xf32> to vector<256x128xf32>
    %12 = arith.mulf %10, %11 : vector<256x128xf32>
    %cst_8 = arith.constant dense<0.000000e+00> : vector<256xf32>
    %13 = vector.multi_reduction <add>, %12, %cst_8 [1] : vector<256x128xf32> to vector<256xf32>
    %14 = vector.shape_cast %13 : vector<256xf32> to vector<256x1xf32>
    %c1 = arith.constant 1 : index
    %c0_9 = arith.constant 0 : index
    %c0_10 = arith.constant 0 : index
    %15 = vector.load %arg1[%c1, %c0_9, %c0_10] : memref<4x256x64xf32, #tpu.memory_space<vmem>>, vector<1x256x64xf32>
    %16 = vector.shape_cast %15 : vector<1x256x64xf32> to vector<256x64xf32>
    %17 = arith.truncf %16 : vector<256x64xf32> to vector<256x64xbf16>
    %cst_11 = arith.constant dense<0.000000e+00> : vector<256x128xf32>
    %18 = tpu.matmul %17, %1, %cst_11 {dimension_numbers = #tpu.dot_dimension_numbers<[1], [0], [0], [1], [0, 0, 1, 1], [], []>} : vector<256x64xbf16>, vector<64x128xbf16>, vector<256x128xf32> -> vector<256x128xf32>
    %19 = vector.broadcast %2 : vector<1x128xf32> to vector<256x128xf32>
    %20 = arith.addf %18, %19 : vector<256x128xf32>
    %21 = math.tanh %20 : vector<256x128xf32>
    %22 = vector.broadcast %3 : vector<1x128xf32> to vector<256x128xf32>
    %23 = arith.mulf %21, %22 : vector<256x128xf32>
    %cst_12 = arith.constant dense<0.000000e+00> : vector<256xf32>
    %24 = vector.multi_reduction <add>, %23, %cst_12 [1] : vector<256x128xf32> to vector<256xf32>
    %25 = vector.shape_cast %24 : vector<256xf32> to vector<256x1xf32>
    %c2 = arith.constant 2 : index
    %c0_13 = arith.constant 0 : index
    %c0_14 = arith.constant 0 : index
    %26 = vector.load %arg1[%c2, %c0_13, %c0_14] : memref<4x256x64xf32, #tpu.memory_space<vmem>>, vector<1x256x64xf32>
    %27 = vector.shape_cast %26 : vector<1x256x64xf32> to vector<256x64xf32>
    %28 = arith.truncf %27 : vector<256x64xf32> to vector<256x64xbf16>
    %cst_15 = arith.constant dense<0.000000e+00> : vector<256x128xf32>
    %29 = tpu.matmul %28, %1, %cst_15 {dimension_numbers = #tpu.dot_dimension_numbers<[1], [0], [0], [1], [0, 0, 1, 1], [], []>} : vector<256x64xbf16>, vector<64x128xbf16>, vector<256x128xf32> -> vector<256x128xf32>
    %30 = vector.broadcast %2 : vector<1x128xf32> to vector<256x128xf32>
    %31 = arith.addf %29, %30 : vector<256x128xf32>
    %32 = math.tanh %31 : vector<256x128xf32>
    %33 = vector.broadcast %3 : vector<1x128xf32> to vector<256x128xf32>
    %34 = arith.mulf %32, %33 : vector<256x128xf32>
    %cst_16 = arith.constant dense<0.000000e+00> : vector<256xf32>
    %35 = vector.multi_reduction <add>, %34, %cst_16 [1] : vector<256x128xf32> to vector<256xf32>
    %36 = vector.shape_cast %35 : vector<256xf32> to vector<256x1xf32>
    %c3 = arith.constant 3 : index
    %c0_17 = arith.constant 0 : index
    %c0_18 = arith.constant 0 : index
    %37 = vector.load %arg1[%c3, %c0_17, %c0_18] : memref<4x256x64xf32, #tpu.memory_space<vmem>>, vector<1x256x64xf32>
    %38 = vector.shape_cast %37 : vector<1x256x64xf32> to vector<256x64xf32>
    %39 = arith.truncf %38 : vector<256x64xf32> to vector<256x64xbf16>
    %cst_19 = arith.constant dense<0.000000e+00> : vector<256x128xf32>
    %40 = tpu.matmul %39, %1, %cst_19 {dimension_numbers = #tpu.dot_dimension_numbers<[1], [0], [0], [1], [0, 0, 1, 1], [], []>} : vector<256x64xbf16>, vector<64x128xbf16>, vector<256x128xf32> -> vector<256x128xf32>
    %41 = vector.broadcast %2 : vector<1x128xf32> to vector<256x128xf32>
    %42 = arith.addf %40, %41 : vector<256x128xf32>
    %43 = math.tanh %42 : vector<256x128xf32>
    %44 = vector.broadcast %3 : vector<1x128xf32> to vector<256x128xf32>
    %45 = arith.mulf %43, %44 : vector<256x128xf32>
    %cst_20 = arith.constant dense<0.000000e+00> : vector<256xf32>
    %46 = vector.multi_reduction <add>, %45, %cst_20 [1] : vector<256x128xf32> to vector<256xf32>
    %47 = vector.shape_cast %46 : vector<256xf32> to vector<256x1xf32>
    %48 = arith.maximumf %14, %25 : vector<256x1xf32>
    %49 = arith.maximumf %48, %36 : vector<256x1xf32>
    %50 = arith.maximumf %49, %47 : vector<256x1xf32>
    %51 = arith.subf %14, %50 : vector<256x1xf32>
    %52 = math.exp %51 : vector<256x1xf32>
    %53 = arith.subf %25, %50 : vector<256x1xf32>
    %54 = math.exp %53 : vector<256x1xf32>
    %55 = arith.subf %36, %50 : vector<256x1xf32>
    %56 = math.exp %55 : vector<256x1xf32>
    %57 = arith.subf %47, %50 : vector<256x1xf32>
    %58 = math.exp %57 : vector<256x1xf32>
    %59 = arith.addf %52, %54 : vector<256x1xf32>
    %60 = arith.addf %59, %56 : vector<256x1xf32>
    %61 = arith.addf %60, %58 : vector<256x1xf32>
    %62 = tpu.reciprocal %61 : vector<256x1xf32> -> vector<256x1xf32>
    %63 = arith.mulf %52, %62 : vector<256x1xf32>
    %c0_21 = arith.constant 0 : index
    %c0_22 = arith.constant 0 : index
    %c0_23 = arith.constant 0 : index
    %64 = vector.load %arg1[%c0_21, %c0_22, %c0_23] : memref<4x256x64xf32, #tpu.memory_space<vmem>>, vector<1x256x64xf32>
    %65 = vector.shape_cast %64 : vector<1x256x64xf32> to vector<256x64xf32>
    %66 = vector.broadcast %63 : vector<256x1xf32> to vector<256x64xf32>
    %67 = arith.mulf %66, %65 : vector<256x64xf32>
    %68 = arith.mulf %54, %62 : vector<256x1xf32>
    %c1_24 = arith.constant 1 : index
    %c0_25 = arith.constant 0 : index
    %c0_26 = arith.constant 0 : index
    %69 = vector.load %arg1[%c1_24, %c0_25, %c0_26] : memref<4x256x64xf32, #tpu.memory_space<vmem>>, vector<1x256x64xf32>
    %70 = vector.shape_cast %69 : vector<1x256x64xf32> to vector<256x64xf32>
    %71 = vector.broadcast %68 : vector<256x1xf32> to vector<256x64xf32>
    %72 = arith.mulf %71, %70 : vector<256x64xf32>
    %73 = arith.addf %67, %72 : vector<256x64xf32>
    %74 = arith.mulf %56, %62 : vector<256x1xf32>
    %c2_27 = arith.constant 2 : index
    %c0_28 = arith.constant 0 : index
    %c0_29 = arith.constant 0 : index
    %75 = vector.load %arg1[%c2_27, %c0_28, %c0_29] : memref<4x256x64xf32, #tpu.memory_space<vmem>>, vector<1x256x64xf32>
    %76 = vector.shape_cast %75 : vector<1x256x64xf32> to vector<256x64xf32>
    %77 = vector.broadcast %74 : vector<256x1xf32> to vector<256x64xf32>
    %78 = arith.mulf %77, %76 : vector<256x64xf32>
    %79 = arith.addf %73, %78 : vector<256x64xf32>
    %80 = arith.mulf %58, %62 : vector<256x1xf32>
    %c3_30 = arith.constant 3 : index
    %c0_31 = arith.constant 0 : index
    %c0_32 = arith.constant 0 : index
    %81 = vector.load %arg1[%c3_30, %c0_31, %c0_32] : memref<4x256x64xf32, #tpu.memory_space<vmem>>, vector<1x256x64xf32>
    %82 = vector.shape_cast %81 : vector<1x256x64xf32> to vector<256x64xf32>
    %83 = vector.broadcast %80 : vector<256x1xf32> to vector<256x64xf32>
    %84 = arith.mulf %83, %82 : vector<256x64xf32>
    %85 = arith.addf %79, %84 : vector<256x64xf32>
    %c0_33 = arith.constant 0 : index
    %c0_34 = arith.constant 0 : index
    %86 = vector.load %arg5[%c0_33, %c0_34] : memref<256x64xf32, #tpu.memory_space<vmem>>, vector<256x64xf32>
    tpu.vector_store %arg5[%c0_33, %c0_34], %85 {strides = array<i32>} : memref<256x64xf32, #tpu.memory_space<vmem>>, vector<256x64xf32>,
    return
  }
  func.func @transform_0(%arg0: i32) -> (i32, i32, i32) {
    %c0_i32 = arith.constant 0 : i32
    %c0_i32_0 = arith.constant 0 : i32
    %c0_i32_1 = arith.constant 0 : i32
    return %c0_i32, %arg0, %c0_i32_0 : i32, i32, i32
  }
  func.func @transform_1(%arg0: i32) -> (i32, i32) {
    %c0_i32 = arith.constant 0 : i32
    %c0_i32_0 = arith.constant 0 : i32
    %c0_i32_1 = arith.constant 0 : i32
    return %c0_i32, %c0_i32_0 : i32, i32
  }
  func.func @transform_2(%arg0: i32) -> (i32, i32) {
    %c0_i32 = arith.constant 0 : i32
    %c0_i32_0 = arith.constant 0 : i32
    %c0_i32_1 = arith.constant 0 : i32
    return %c0_i32, %c0_i32_0 : i32, i32
  }
  func.func @transform_3(%arg0: i32) -> (i32, i32) {
    %c0_i32 = arith.constant 0 : i32
    %c0_i32_0 = arith.constant 0 : i32
    %c0_i32_1 = arith.constant 0 : i32
    return %c0_i32, %c0_i32_0 : i32, i32
  }
  func.func @transform_4(%arg0: i32) -> (i32, i32) {
    %c0_i32 = arith.constant 0 : i32
    %c0_i32_0 = arith.constant 0 : i32
    return %arg0, %c0_i32 : i32, i32
  }
}

</mosaic_0001>

<bundles_post_ra>
// kernel: tpu_custom_call.1
= control target key start
LH: loop header
LB: loop body
LE: loop exit
PB: predicated region body
PF: predicated region fallthrough
CT: control target
= control target key end

     0   :  { %s4563_s15 = smov 0   ;;  %s4565_s16 = smov 0   ;;  %s7023_s0 = inlined_call_operand.vmem [shape: f32[4,1024,64], index: 0, kind: input, shape index: {}]   ;;  %s7024_s1 = inlined_call_operand.vmem [shape: f32[64,128], index: 1, kind: input, shape index: {}]   ;;  %s7025_s2 = inlined_call_operand.vmem [shape: f32[1,128], index: 2, kind: input, shape index: {}]   ;;  %s7026_s3 = inlined_call_operand.vmem [shape: f32[1,128], index: 3, kind: input, shape index: {}]   ;;  %s7027_s4 = inlined_call_operand.vmem [shape: f32[1024,64], index: 4, kind: output, shape index: {}]  }
   0x1   :  { %s4567_s17 = smov 0  }
   0x2 LB: > { %s3368_s18 = sadd.s32 4294967295, %s4536_s17   ;;  %s4580_s19 = sadd.s32 1, %s4536_s17   ;;  %s4536_s17 = sphi %s4567_s17, %s7212_s17   ;;  %s4532_s16 = sphi %s4565_s16, %s7211_s16   ;;  %s4528_s15 = sphi %s4563_s15, %s7210_s15  }
   0x3   : > { %s18_s20 = ssub.s32 %s4536_s17, %s4580_s19  ;;  %s21_s21 = sadd.s32 1, %s4532_s16 }
   0x4   : > { %p19_p0 = scmp.eq.s32.totalorder %s18_s20, 0  ;;  %p28_p1 = scmp.ne.s32.totalorder %s4532_s16, %s4528_s15 }
   0x5   : > { %p29_p2 = scmp.eq.s32.totalorder %s4536_s17, 0  ;;  %p3371_p4 = scmp.ge.s32.totalorder %s4536_s17, 4 }
   0x6   : > { %s4589_s22 = scalar_select %p19_p0, %s4532_s16, %s21_s21  }
   0x7   : > { %p30_p3 = por %p29_p2, %p28_p1  ;;  %152 = sbr.rel (%p3371_p4) target bundleno = 82 (0x52), region = 28 }
   0xe   : > { %155 = sbr.rel (!%p30_p3) target bundleno = 82 (0x52), region = 32  ;;  %s157_s23 = sand.u32 (%p30_p3), 1, %s4532_s16  }
   0xf   : > { %s3543_s24 = sshll.u32 (%p30_p3), %s4536_s17, 8  ;;  %s3372_s25 = sshll.u32 (%p30_p3), %s157_s23, 10 }
  0x10   : > { %s4597_s28 = scalar_lea.vmem (%p30_p3), %s7023_s0, %s3543_s24  ;;  %s4602_s29 = scalar_lea.vmem (%p30_p3), [#allocation2], %s3372_s25 }
  0x11   : > { %v444_v0 = vld [vmem:[%s4597_s28] sm:$0xff] (%p30_p3)  ;;  %v446_v1 = vld [vmem:[%s4597_s28 + $0x8] sm:$0xff] (%p30_p3)  ;;  %v448_v2 = vld [vmem:[%s4597_s28 + $0x10] sm:$0xff] (%p30_p3) }
  0x12   : > { %445 = vst [vmem:[%s4602_s29] sm:$0xff] (%p30_p3), %v444_v0  ;;  %447 = vst [vmem:[%s4602_s29 + $0x8] sm:$0xff] (%p30_p3), %v446_v1  ;;  %v450_v3 = vld [vmem:[%s4597_s28 + $0x18] sm:$0xff] (%p30_p3)  ;;  %v452_v4 = vld [vmem:[%s4597_s28 + $0x20] sm:$0xff] (%p30_p3) }
  0x13   : > { %449 = vst [vmem:[%s4602_s29 + $0x10] sm:$0xff] (%p30_p3), %v448_v2  ;;  %v454_v5 = vld [vmem:[%s4597_s28 + $0x28] sm:$0xff] (%p30_p3)  ;;  %451 = vst [vmem:[%s4602_s29 + $0x18] sm:$0xff] (%p30_p3), %v450_v3  ;;  %v456_v6 = vld [vmem:[%s4597_s28 + $0x30] sm:$0xff] (%p30_p3) }
  0x14   : > { %453 = vst [vmem:[%s4602_s29 + $0x20] sm:$0xff] (%p30_p3), %v452_v4  ;;  %455 = vst [vmem:[%s4602_s29 + $0x28] sm:$0xff] (%p30_p3), %v454_v5  ;;  %v458_v7 = vld [vmem:[%s4597_s28 + $0x38] sm:$0xff] (%p30_p3)  ;;  %v460_v8 = vld [vmem:[%s4597_s28 + $0x40] sm:$0xff] (%p30_p3) }
  0x15   : > { %457 = vst [vmem:[%s4602_s29 + $0x30] sm:$0xff] %v456_v6  ;;  %459 = vst [vmem:[%s4602_s29 + $0x38] sm:$0xff] %v458_v7  ;;  %v462_v9 = vld [vmem:[%s4597_s28 + $0x48] sm:$0xff]  ;;  %v464_v10 = vld [vmem:[%s4597_s28 + $0x50] sm:$0xff] }
  0x16   : > { %461 = vst [vmem:[%s4602_s29 + $0x40] sm:$0xff] %v460_v8  ;;  %v466_v11 = vld [vmem:[%s4597_s28 + $0x58] sm:$0xff]  ;;  %463 = vst [vmem:[%s4602_s29 + $0x48] sm:$0xff] %v462_v9  ;;  %v468_v12 = vld [vmem:[%s4597_s28 + $0x60] sm:$0xff] }
  0x17   : > { %465 = vst [vmem:[%s4602_s29 + $0x50] sm:$0xff] %v464_v10  ;;  %467 = vst [vmem:[%s4602_s29 + $0x58] sm:$0xff] %v466_v11  ;;  %v470_v13 = vld [vmem:[%s4597_s28 + $0x68] sm:$0xff]  ;;  %v472_v14 = vld [vmem:[%s4597_s28 + $0x70] sm:$0xff] }
  0x18   : > { %469 = vst [vmem:[%s4602_s29 + $0x60] sm:$0xff] %v468_v12  ;;  %471 = vst [vmem:[%s4602_s29 + $0x68] sm:$0xff] %v470_v13  ;;  %v474_v15 = vld [vmem:[%s4597_s28 + $0x78] sm:$0xff]  ;;  %v476_v16 = vld [vmem:[%s4597_s28 + $0x80] sm:$0xff] }
  0x19   : > { %473 = vst [vmem:[%s4602_s29 + $0x70] sm:$0xff] %v472_v14  ;;  %v478_v17 = vld [vmem:[%s4597_s28 + $0x88] sm:$0xff]  ;;  %475 = vst [vmem:[%s4602_s29 + $0x78] sm:$0xff] %v474_v15  ;;  %v480_v18 = vld [vmem:[%s4597_s28 + $0x90] sm:$0xff] }
  0x1a   : > { %477 = vst [vmem:[%s4602_s29 + $0x80] sm:$0xff] %v476_v16  ;;  %479 = vst [vmem:[%s4602_s29 + $0x88] sm:$0xff] %v478_v17  ;;  %v482_v19 = vld [vmem:[%s4597_s28 + $0x98] sm:$0xff]  ;;  %v484_v20 = vld [vmem:[%s4597_s28 + $0xa0] sm:$0xff] }
  0x1b   : > { %481 = vst [vmem:[%s4602_s29 + $0x90] sm:$0xff] %v480_v18  ;;  %483 = vst [vmem:[%s4602_s29 + $0x98] sm:$0xff] %v482_v19  ;;  %v486_v21 = vld [vmem:[%s4597_s28 + $0xa8] sm:$0xff]  ;;  %v488_v22 = vld [vmem:[%s4597_s28 + $0xb0] sm:$0xff] }
  0x1c   : > { %485 = vst [vmem:[%s4602_s29 + $0xa0] sm:$0xff] %v484_v20  ;;  %v490_v23 = vld [vmem:[%s4597_s28 + $0xb8] sm:$0xff]  ;;  %487 = vst [vmem:[%s4602_s29 + $0xa8] sm:$0xff] %v486_v21  ;;  %v492_v24 = vld [vmem:[%s4597_s28 + $0xc0] sm:$0xff] }
  0x1d   : > { %489 = vst [vmem:[%s4602_s29 + $0xb0] sm:$0xff] %v488_v22  ;;  %491 = vst [vmem:[%s4602_s29 + $0xb8] sm:$0xff] %v490_v23  ;;  %v494_v25 = vld [vmem:[%s4597_s28 + $0xc8] sm:$0xff]  ;;  %v496_v26 = vld [vmem:[%s4597_s28 + $0xd0] sm:$0xff] }
  0x1e   : > { %493 = vst [vmem:[%s4602_s29 + $0xc0] sm:$0xff] %v492_v24  ;;  %495 = vst [vmem:[%s4602_s29 + $0xc8] sm:$0xff] %v494_v25  ;;  %v498_v27 = vld [vmem:[%s4597_s28 + $0xd8] sm:$0xff]  ;;  %v500_v28 = vld [vmem:[%s4597_s28 + $0xe0] sm:$0xff] }
  0x1f   : > { %497 = vst [vmem:[%s4602_s29 + $0xd0] sm:$0xff] %v496_v26  ;;  %v502_v29 = vld [vmem:[%s4597_s28 + $0xe8] sm:$0xff]  ;;  %499 = vst [vmem:[%s4602_s29 + $0xd8] sm:$0xff] %v498_v27  ;;  %v504_v30 = vld [vmem:[%s4597_s28 + $0xf0] sm:$0xff] }
  0x20   : > { %501 = vst [vmem:[%s4602_s29 + $0xe0] sm:$0xff] %v500_v28  ;;  %503 = vst [vmem:[%s4602_s29 + $0xe8] sm:$0xff] %v502_v29  ;;  %v506_v31 = vld [vmem:[%s4597_s28 + $0xf8] sm:$0xff]  ;;  %v508_v32 = vld [vmem:[%s4597_s28 + $0x400] sm:$0xff] }
  0x21   : > { %505 = vst [vmem:[%s4602_s29 + $0xf0] sm:$0xff] %v504_v30  ;;  %507 = vst [vmem:[%s4602_s29 + $0xf8] sm:$0xff] %v506_v31  ;;  %v510_v33 = vld [vmem:[%s4597_s28 + $0x408] sm:$0xff]  ;;  %v512_v34 = vld [vmem:[%s4597_s28 + $0x410] sm:$0xff] }
  0x22   : > { %509 = vst [vmem:[%s4602_s29 + $0x100] sm:$0xff] %v508_v32  ;;  %v514_v35 = vld [vmem:[%s4597_s28 + $0x418] sm:$0xff]  ;;  %511 = vst [vmem:[%s4602_s29 + $0x108] sm:$0xff] %v510_v33  ;;  %v516_v36 = vld [vmem:[%s4597_s28 + $0x420] sm:$0xff] }
  0x23   : > { %513 = vst [vmem:[%s4602_s29 + $0x110] sm:$0xff] %v512_v34  ;;  %515 = vst [vmem:[%s4602_s29 + $0x118] sm:$0xff] %v514_v35  ;;  %v518_v37 = vld [vmem:[%s4597_s28 + $0x428] sm:$0xff]  ;;  %v520_v38 = vld [vmem:[%s4597_s28 + $0x430] sm:$0xff] }
  0x24   : > { %517 = vst [vmem:[%s4602_s29 + $0x120] sm:$0xff] %v516_v36  ;;  %519 = vst [vmem:[%s4602_s29 + $0x128] sm:$0xff] %v518_v37  ;;  %v522_v39 = vld [vmem:[%s4597_s28 + $0x438] sm:$0xff]  ;;  %v524_v40 = vld [vmem:[%s4597_s28 + $0x440] sm:$0xff] }
  0x25   : > { %521 = vst [vmem:[%s4602_s29 + $0x130] sm:$0xff] %v520_v38  ;;  %v526_v41 = vld [vmem:[%s4597_s28 + $0x448] sm:$0xff]  ;;  %523 = vst [vmem:[%s4602_s29 + $0x138] sm:$0xff] %v522_v39  ;;  %v528_v42 = vld [vmem:[%s4597_s28 + $0x450] sm:$0xff] }
  0x26   : > { %525 = vst [vmem:[%s4602_s29 + $0x140] sm:$0xff] %v524_v40  ;;  %527 = vst [vmem:[%s4602_s29 + $0x148] sm:$0xff] %v526_v41  ;;  %v530_v43 = vld [vmem:[%s4597_s28 + $0x458] sm:$0xff]  ;;  %v532_v44 = vld [vmem:[%s4597_s28 + $0x460] sm:$0xff] }
  0x27   : > { %529 = vst [vmem:[%s4602_s29 + $0x150] sm:$0xff] %v528_v42  ;;  %531 = vst [vmem:[%s4602_s29 + $0x158] sm:$0xff] %v530_v43  ;;  %v534_v45 = vld [vmem:[%s4597_s28 + $0x468] sm:$0xff]  ;;  %v536_v46 = vld [vmem:[%s4597_s28 + $0x470] sm:$0xff] }
  0x28   : > { %533 = vst [vmem:[%s4602_s29 + $0x160] sm:$0xff] %v532_v44  ;;  %v538_v47 = vld [vmem:[%s4597_s28 + $0x478] sm:$0xff]  ;;  %535 = vst [vmem:[%s4602_s29 + $0x168] sm:$0xff] %v534_v45  ;;  %v540_v48 = vld [vmem:[%s4597_s28 + $0x480] sm:$0xff] }
  0x29   : > { %537 = vst [vmem:[%s4602_s29 + $0x170] sm:$0xff] %v536_v46  ;;  %539 = vst [vmem:[%s4602_s29 + $0x178] sm:$0xff] %v538_v47  ;;  %v542_v49 = vld [vmem:[%s4597_s28 + $0x488] sm:$0xff]  ;;  %v544_v50 = vld [vmem:[%s4597_s28 + $0x490] sm:$0xff] }
  0x2a   : > { %541 = vst [vmem:[%s4602_s29 + $0x180] sm:$0xff] %v540_v48  ;;  %543 = vst [vmem:[%s4602_s29 + $0x188] sm:$0xff] %v542_v49  ;;  %v546_v51 = vld [vmem:[%s4597_s28 + $0x498] sm:$0xff]  ;;  %v548_v52 = vld [vmem:[%s4597_s28 + $0x4a0] sm:$0xff] }
  0x2b   : > { %545 = vst [vmem:[%s4602_s29 + $0x190] sm:$0xff] %v544_v50  ;;  %v550_v53 = vld [vmem:[%s4597_s28 + $0x4a8] sm:$0xff]  ;;  %547 = vst [vmem:[%s4602_s29 + $0x198] sm:$0xff] %v546_v51  ;;  %v552_v54 = vld [vmem:[%s4597_s28 + $0x4b0] sm:$0xff] }
  0x2c   : > { %549 = vst [vmem:[%s4602_s29 + $0x1a0] sm:$0xff] %v548_v52  ;;  %551 = vst [vmem:[%s4602_s29 + $0x1a8] sm:$0xff] %v550_v53  ;;  %v554_v55 = vld [vmem:[%s4597_s28 + $0x4b8] sm:$0xff]  ;;  %v556_v56 = vld [vmem:[%s4597_s28 + $0x4c0] sm:$0xff] }
  0x2d   : > { %553 = vst [vmem:[%s4602_s29 + $0x1b0] sm:$0xff] %v552_v54  ;;  %555 = vst [vmem:[%s4602_s29 + $0x1b8] sm:$0xff] %v554_v55  ;;  %v558_v57 = vld [vmem:[%s4597_s28 + $0x4c8] sm:$0xff]  ;;  %v560_v58 = vld [vmem:[%s4597_s28 + $0x4d0] sm:$0xff] }
  0x2e   : > { %557 = vst [vmem:[%s4602_s29 + $0x1c0] sm:$0xff] %v556_v56  ;;  %v562_v59 = vld [vmem:[%s4597_s28 + $0x4d8] sm:$0xff]  ;;  %559 = vst [vmem:[%s4602_s29 + $0x1c8] sm:$0xff] %v558_v57  ;;  %v564_v60 = vld [vmem:[%s4597_s28 + $0x4e0] sm:$0xff] }
  0x2f   : > { %561 = vst [vmem:[%s4602_s29 + $0x1d0] sm:$0xff] %v560_v58  ;;  %563 = vst [vmem:[%s4602_s29 + $0x1d8] sm:$0xff] %v562_v59  ;;  %v566_v61 = vld [vmem:[%s4597_s28 + $0x4e8] sm:$0xff]  ;;  %v568_v62 = vld [vmem:[%s4597_s28 + $0x4f0] sm:$0xff] }
  0x30   : > { %565 = vst [vmem:[%s4602_s29 + $0x1e0] sm:$0xff] %v564_v60  ;;  %567 = vst [vmem:[%s4602_s29 + $0x1e8] sm:$0xff] %v566_v61  ;;  %v570_v63 = vld [vmem:[%s4597_s28 + $0x4f8] sm:$0xff]  ;;  %v572_v0 = vld [vmem:[%s4597_s28 + $0x800] sm:$0xff] }
  0x31   : > { %569 = vst [vmem:[%s4602_s29 + $0x1f0] sm:$0xff] %v568_v62  ;;  %v574_v1 = vld [vmem:[%s4597_s28 + $0x808] sm:$0xff]  ;;  %571 = vst [vmem:[%s4602_s29 + $0x1f8] sm:$0xff] %v570_v63  ;;  %v576_v2 = vld [vmem:[%s4597_s28 + $0x810] sm:$0xff] }
  0x32   : > { %573 = vst [vmem:[%s4602_s29 + $0x200] sm:$0xff] %v572_v0  ;;  %575 = vst [vmem:[%s4602_s29 + $0x208] sm:$0xff] %v574_v1  ;;  %v578_v3 = vld [vmem:[%s4597_s28 + $0x818] sm:$0xff]  ;;  %v580_v4 = vld [vmem:[%s4597_s28 + $0x820] sm:$0xff] }
  0x33   : > { %577 = vst [vmem:[%s4602_s29 + $0x210] sm:$0xff] %v576_v2  ;;  %579 = vst [vmem:[%s4602_s29 + $0x218] sm:$0xff] %v578_v3  ;;  %v582_v5 = vld [vmem:[%s4597_s28 + $0x828] sm:$0xff]  ;;  %v584_v6 = vld [vmem:[%s4597_s28 + $0x830] sm:$0xff] }
  0x34   : > { %581 = vst [vmem:[%s4602_s29 + $0x220] sm:$0xff] %v580_v4  ;;  %v586_v7 = vld [vmem:[%s4597_s28 + $0x838] sm:$0xff]  ;;  %583 = vst [vmem:[%s4602_s29 + $0x228] sm:$0xff] %v582_v5  ;;  %v588_v8 = vld [vmem:[%s4597_s28 + $0x840] sm:$0xff] }
  0x35   : > { %585 = vst [vmem:[%s4602_s29 + $0x230] sm:$0xff] %v584_v6  ;;  %587 = vst [vmem:[%s4602_s29 + $0x238] sm:$0xff] %v586_v7  ;;  %v590_v9 = vld [vmem:[%s4597_s28 + $0x848] sm:$0xff]  ;;  %v592_v10 = vld [vmem:[%s4597_s28 + $0x850] sm:$0xff] }
  0x36   : > { %589 = vst [vmem:[%s4602_s29 + $0x240] sm:$0xff] %v588_v8  ;;  %591 = vst [vmem:[%s4602_s29 + $0x248] sm:$0xff] %v590_v9  ;;  %v594_v11 = vld [vmem:[%s4597_s28 + $0x858] sm:$0xff]  ;;  %v596_v12 = vld [vmem:[%s4597_s28 + $0x860] sm:$0xff] }
  0x37   : > { %593 = vst [vmem:[%s4602_s29 + $0x250] sm:$0xff] %v592_v10  ;;  %v598_v13 = vld [vmem:[%s4597_s28 + $0x868] sm:$0xff]  ;;  %595 = vst [vmem:[%s4602_s29 + $0x258] sm:$0xff] %v594_v11  ;;  %v600_v14 = vld [vmem:[%s4597_s28 + $0x870] sm:$0xff] }
  0x38   : > { %597 = vst [vmem:[%s4602_s29 + $0x260] sm:$0xff] %v596_v12  ;;  %599 = vst [vmem:[%s4602_s29 + $0x268] sm:$0xff] %v598_v13  ;;  %v602_v15 = vld [vmem:[%s4597_s28 + $0x878] sm:$0xff]  ;;  %v604_v16 = vld [vmem:[%s4597_s28 + $0x880] sm:$0xff] }
  0x39   : > { %601 = vst [vmem:[%s4602_s29 + $0x270] sm:$0xff] %v600_v14  ;;  %603 = vst [vmem:[%s4602_s29 + $0x278] sm:$0xff] %v602_v15  ;;  %v606_v17 = vld [vmem:[%s4597_s28 + $0x888] sm:$0xff]  ;;  %v608_v18 = vld [vmem:[%s4597_s28 + $0x890] sm:$0xff] }
  0x3a   : > { %605 = vst [vmem:[%s4602_s29 + $0x280] sm:$0xff] %v604_v16  ;;  %v610_v19 = vld [vmem:[%s4597_s28 + $0x898] sm:$0xff]  ;;  %607 = vst [vmem:[%s4602_s29 + $0x288] sm:$0xff] %v606_v17  ;;  %v612_v20 = vld [vmem:[%s4597_s28 + $0x8a0] sm:$0xff] }
  0x3b   : > { %609 = vst [vmem:[%s4602_s29 + $0x290] sm:$0xff] %v608_v18  ;;  %611 = vst [vmem:[%s4602_s29 + $0x298] sm:$0xff] %v610_v19  ;;  %v614_v21 = vld [vmem:[%s4597_s28 + $0x8a8] sm:$0xff]  ;;  %v616_v22 = vld [vmem:[%s4597_s28 + $0x8b0] sm:$0xff] }
  0x3c   : > { %613 = vst [vmem:[%s4602_s29 + $0x2a0] sm:$0xff] %v612_v20  ;;  %615 = vst [vmem:[%s4602_s29 + $0x2a8] sm:$0xff] %v614_v21  ;;  %v618_v23 = vld [vmem:[%s4597_s28 + $0x8b8] sm:$0xff]  ;;  %v620_v24 = vld [vmem:[%s4597_s28 + $0x8c0] sm:$0xff] }
  0x3d   : > { %617 = vst [vmem:[%s4602_s29 + $0x2b0] sm:$0xff] %v616_v22  ;;  %v622_v25 = vld [vmem:[%s4597_s28 + $0x8c8] sm:$0xff]  ;;  %619 = vst [vmem:[%s4602_s29 + $0x2b8] sm:$0xff] %v618_v23  ;;  %v624_v26 = vld [vmem:[%s4597_s28 + $0x8d0] sm:$0xff] }
  0x3e   : > { %621 = vst [vmem:[%s4602_s29 + $0x2c0] sm:$0xff] %v620_v24  ;;  %623 = vst [vmem:[%s4602_s29 + $0x2c8] sm:$0xff] %v622_v25  ;;  %v626_v27 = vld [vmem:[%s4597_s28 + $0x8d8] sm:$0xff]  ;;  %v628_v28 = vld [vmem:[%s4597_s28 + $0x8e0] sm:$0xff] }
  0x3f   : > { %625 = vst [vmem:[%s4602_s29 + $0x2d0] sm:$0xff] %v624_v26  ;;  %627 = vst [vmem:[%s4602_s29 + $0x2d8] sm:$0xff] %v626_v27  ;;  %v630_v29 = vld [vmem:[%s4597_s28 + $0x8e8] sm:$0xff]  ;;  %v632_v30 = vld [vmem:[%s4597_s28 + $0x8f0] sm:$0xff] }
  0x40   : > { %629 = vst [vmem:[%s4602_s29 + $0x2e0] sm:$0xff] %v628_v28  ;;  %v634_v31 = vld [vmem:[%s4597_s28 + $0x8f8] sm:$0xff]  ;;  %631 = vst [vmem:[%s4602_s29 + $0x2e8] sm:$0xff] %v630_v29  ;;  %v636_v32 = vld [vmem:[%s4597_s28 + $0xc00] sm:$0xff] }
  0x41   : > { %633 = vst [vmem:[%s4602_s29 + $0x2f0] sm:$0xff] %v632_v30  ;;  %635 = vst [vmem:[%s4602_s29 + $0x2f8] sm:$0xff] %v634_v31  ;;  %v638_v33 = vld [vmem:[%s4597_s28 + $0xc08] sm:$0xff]  ;;  %v640_v34 = vld [vmem:[%s4597_s28 + $0xc10] sm:$0xff] }
  0x42   : > { %637 = vst [vmem:[%s4602_s29 + $0x300] sm:$0xff] %v636_v32  ;;  %639 = vst [vmem:[%s4602_s29 + $0x308] sm:$0xff] %v638_v33  ;;  %v642_v35 = vld [vmem:[%s4597_s28 + $0xc18] sm:$0xff]  ;;  %v644_v36 = vld [vmem:[%s4597_s28 + $0xc20] sm:$0xff] }
  0x43   : > { %641 = vst [vmem:[%s4602_s29 + $0x310] sm:$0xff] %v640_v34  ;;  %v646_v37 = vld [vmem:[%s4597_s28 + $0xc28] sm:$0xff]  ;;  %643 = vst [vmem:[%s4602_s29 + $0x318] sm:$0xff] %v642_v35  ;;  %v648_v38 = vld [vmem:[%s4597_s28 + $0xc30] sm:$0xff] }
  0x44   : > { %645 = vst [vmem:[%s4602_s29 + $0x320] sm:$0xff] %v644_v36  ;;  %647 = vst [vmem:[%s4602_s29 + $0x328] sm:$0xff] %v646_v37  ;;  %v650_v39 = vld [vmem:[%s4597_s28 + $0xc38] sm:$0xff]  ;;  %v652_v40 = vld [vmem:[%s4597_s28 + $0xc40] sm:$0xff] }
  0x45   : > { %649 = vst [vmem:[%s4602_s29 + $0x330] sm:$0xff] %v648_v38  ;;  %651 = vst [vmem:[%s4602_s29 + $0x338] sm:$0xff] %v650_v39  ;;  %v654_v41 = vld [vmem:[%s4597_s28 + $0xc48] sm:$0xff]  ;;  %v656_v42 = vld [vmem:[%s4597_s28 + $0xc50] sm:$0xff] }
  0x46   : > { %653 = vst [vmem:[%s4602_s29 + $0x340] sm:$0xff] %v652_v40  ;;  %v658_v43 = vld [vmem:[%s4597_s28 + $0xc58] sm:$0xff]  ;;  %655 = vst [vmem:[%s4602_s29 + $0x348] sm:$0xff] %v654_v41  ;;  %v660_v44 = vld [vmem:[%s4597_s28 + $0xc60] sm:$0xff] }
  0x47   : > { %657 = vst [vmem:[%s4602_s29 + $0x350] sm:$0xff] %v656_v42  ;;  %659 = vst [vmem:[%s4602_s29 + $0x358] sm:$0xff] %v658_v43  ;;  %v662_v45 = vld [vmem:[%s4597_s28 + $0xc68] sm:$0xff]  ;;  %v664_v46 = vld [vmem:[%s4597_s28 + $0xc70] sm:$0xff] }
  0x48   : > { %661 = vst [vmem:[%s4602_s29 + $0x360] sm:$0xff] %v660_v44  ;;  %663 = vst [vmem:[%s4602_s29 + $0x368] sm:$0xff] %v662_v45  ;;  %v666_v47 = vld [vmem:[%s4597_s28 + $0xc78] sm:$0xff]  ;;  %v668_v48 = vld [vmem:[%s4597_s28 + $0xc80] sm:$0xff] }
  0x49   : > { %665 = vst [vmem:[%s4602_s29 + $0x370] sm:$0xff] %v664_v46  ;;  %v670_v49 = vld [vmem:[%s4597_s28 + $0xc88] sm:$0xff]  ;;  %667 = vst [vmem:[%s4602_s29 + $0x378] sm:$0xff] %v666_v47  ;;  %v672_v50 = vld [vmem:[%s4597_s28 + $0xc90] sm:$0xff] }
  0x4a   : > { %669 = vst [vmem:[%s4602_s29 + $0x380] sm:$0xff] %v668_v48  ;;  %671 = vst [vmem:[%s4602_s29 + $0x388] sm:$0xff] %v670_v49  ;;  %v674_v51 = vld [vmem:[%s4597_s28 + $0xc98] sm:$0xff]  ;;  %v676_v52 = vld [vmem:[%s4597_s28 + $0xca0] sm:$0xff] }
  0x4b   : > { %673 = vst [vmem:[%s4602_s29 + $0x390] sm:$0xff] %v672_v50  ;;  %675 = vst [vmem:[%s4602_s29 + $0x398] sm:$0xff] %v674_v51  ;;  %v678_v53 = vld [vmem:[%s4597_s28 + $0xca8] sm:$0xff]  ;;  %v680_v54 = vld [vmem:[%s4597_s28 + $0xcb0] sm:$0xff] }
  0x4c   : > { %677 = vst [vmem:[%s4602_s29 + $0x3a0] sm:$0xff] %v676_v52  ;;  %v682_v55 = vld [vmem:[%s4597_s28 + $0xcb8] sm:$0xff]  ;;  %679 = vst [vmem:[%s4602_s29 + $0x3a8] sm:$0xff] %v678_v53  ;;  %v684_v56 = vld [vmem:[%s4597_s28 + $0xcc0] sm:$0xff] }
  0x4d   : > { %681 = vst [vmem:[%s4602_s29 + $0x3b0] sm:$0xff] %v680_v54  ;;  %683 = vst [vmem:[%s4602_s29 + $0x3b8] sm:$0xff] %v682_v55  ;;  %v686_v57 = vld [vmem:[%s4597_s28 + $0xcc8] sm:$0xff]  ;;  %v688_v58 = vld [vmem:[%s4597_s28 + $0xcd0] sm:$0xff] }
  0x4e   : > { %685 = vst [vmem:[%s4602_s29 + $0x3c0] sm:$0xff] %v684_v56  ;;  %687 = vst [vmem:[%s4602_s29 + $0x3c8] sm:$0xff] %v686_v57  ;;  %v690_v59 = vld [vmem:[%s4597_s28 + $0xcd8] sm:$0xff]  ;;  %v692_v60 = vld [vmem:[%s4597_s28 + $0xce0] sm:$0xff] }
  0x4f   : > { %689 = vst [vmem:[%s4602_s29 + $0x3d0] sm:$0xff] %v688_v58  ;;  %v694_v61 = vld [vmem:[%s4597_s28 + $0xce8] sm:$0xff]  ;;  %691 = vst [vmem:[%s4602_s29 + $0x3d8] sm:$0xff] %v690_v59  ;;  %v696_v62 = vld [vmem:[%s4597_s28 + $0xcf0] sm:$0xff] }
  0x50   : > { %693 = vst [vmem:[%s4602_s29 + $0x3e0] sm:$0xff] %v692_v60  ;;  %695 = vst [vmem:[%s4602_s29 + $0x3e8] sm:$0xff] %v694_v61  ;;  %v698_v63 = vld [vmem:[%s4597_s28 + $0xcf8] sm:$0xff] }
  0x51   : > { %697 = vst [vmem:[%s4602_s29 + $0x3f0] sm:$0xff] %v696_v62  ;;  %699 = vst [vmem:[%s4602_s29 + $0x3f8] sm:$0xff] %v698_v63 }
  0x52 PF: > { %p3375_p5 = scmp.ge.s32.totalorder %s4536_s17, 1  ;;  %p704_p6 = scmp.lt.s32.totalorder %s4536_s17, 5 }
  0x54   : > { %p705_p7 = pnand %p3375_p5, %p704_p6 }
  0x56   : > { %708 = sbr.rel (%p705_p7) target bundleno = 881 (0x371), region = 70 }
  0x5d   : > { %v744_v0 = vld [vmem:[%s7024_s1] sm:$0xff]  ;;  %v745_v1 = vld [vmem:[%s7024_s1 + $0x8] sm:$0xff]  ;;  %v746_v2 = vld [vmem:[%s7024_s1 + $0x10] sm:$0xff]  ;;  %s711_s10 = sand.u32 1, %s4528_s15   ;;  %vm812_vm0 = vcmask 523264  }
  0x5e   : > { %v752_v3 = vpack.c.bf16 %v745_v1, %v744_v0  ;;  %v747_v4 = vld [vmem:[%s7024_s1 + $0x18] sm:$0xff]  ;;  %s3376_s13 = sshll.u32 %s711_s10, 10  ;;  %v748_v6 = vld [vmem:[%s7024_s1 + $0x20] sm:$0xff]  ;;  %v749_v7 = vld [vmem:[%s7024_s1 + $0x28] sm:$0xff]  ;;  %s5969_s10 = sshll.u32 %s3368_s18, 5 }
  0x5f   : > { %v4872_v5 = vpack.c.bf16 %v747_v4, %v746_v2  ;;  %s4880_s24 = scalar_lea.vmem [#allocation2], %s3376_s13  ;;  %v4888_v13 = vpack.c.bf16 %v749_v7, %v748_v6  ;;  %v750_v15 = vld [vmem:[%s7024_s1 + $0x30] sm:$0xff]  ;;  %v751_v16 = vld [vmem:[%s7024_s1 + $0x38] sm:$0xff]  ;;  %p738_p8 = scmp.lt.s32.totalorder %s5969_s10, 127 }
  0x60   : > { %3624 = vmatprep.subr.bf16.mxu0 %v752_v3  ;;  %3664 = vmatprep.subr.bf16.mxu1 %v752_v3  ;;  %v758_v8 = vld [vmem:[%s4880_s24] sm:$0xff]  ;;  %v759_v9 = vld [vmem:[%s4880_s24 + $0x8] sm:$0xff]  ;;  %v4902_v17 = vpack.c.bf16 %v751_v16, %v750_v15  ;;  %v760_v18 = vld [vmem:[%s4880_s24 + $0x10] sm:$0xff] }
  0x61   : > { %v3397_v10 = vld [vmem:[%s4880_s24 + $0x100] sm:$0xff]  ;;  %3625 = vmatpush3.bf16.msra.mxu0 %v752_v3  ;;  %3665 = vmatpush3.bf16.msra.mxu1 %v752_v3  ;;  %v790_v11 = vpack.c.bf16 %v759_v9, %v758_v8  ;;  %v3398_v12 = vld [vmem:[%s4880_s24 + $0x108] sm:$0xff]  ;;  %v761_v19 = vld [vmem:[%s4880_s24 + $0x18] sm:$0xff]  ;;  %s7214_s10 = smov (!%p738_p8, %s5969_s10), 127 }
  0x62   : > { %3626 = vmatprep.subr.bf16.mxu0 %v4872_v5  ;;  %3666 = vmatprep.subr.bf16.mxu1 %v4872_v5  ;;  %v1189_v14 = vpack.c.bf16 %v3398_v12, %v3397_v10  ;;  %v3399_v20 = vld [vmem:[%s4880_s24 + $0x110] sm:$0xff]  ;;  %v3400_v21 = vld [vmem:[%s4880_s24 + $0x118] sm:$0xff]  ;;  %v762_v22 = vld [vmem:[%s4880_s24 + $0x20] sm:$0xff]  ;;  %v791_v26 = vpack.c.bf16 %v761_v19, %v760_v18  ;;  %s3378_s17 = sshll.u32 %s7214_s10, 3 }
  0x63   : > { %3632 = vmatprep.mubr.msk.bf16.mxu0 %vm812_vm0, %v790_v11  ;;  %v763_v23 = vld [vmem:[%s4880_s24 + $0x28] sm:$0xff]  ;;  %v3401_v24 = vld [vmem:[%s4880_s24 + $0x120] sm:$0xff]  ;;  %v1190_v27 = vpack.c.bf16 %v3400_v21, %v3399_v20  ;;  %v764_v30 = vld [vmem:[%s4880_s24 + $0x30] sm:$0xff]  ;;  %s6069_s12 = scalar_lea.vmem %s7027_s4, %s3378_s17 }
  0x64   : > { %3672 = vmatprep.mubr.msk.bf16.mxu1 %vm812_vm0, %v1189_v14  ;;  %v3402_v25 = vld [vmem:[%s4880_s24 + $0x128] sm:$0xff]  ;;  %v792_v28 = vpack.c.bf16 %v763_v23, %v762_v22  ;;  %v765_v31 = vld [vmem:[%s4880_s24 + $0x38] sm:$0xff]  ;;  %v3403_v32 = vld [vmem:[%s4880_s24 + $0x130] sm:$0xff] }
  0x65   : > { %3627 = vmatpush3.bf16.msra.mxu0 %v4872_v5  ;;  %3667 = vmatpush3.bf16.msra.mxu1 %v4872_v5  ;;  %v1191_v29 = vpack.c.bf16 %v3402_v25, %v3401_v24  ;;  %v3404_v33 = vld [vmem:[%s4880_s24 + $0x138] sm:$0xff]  ;;  %v766_v34 = vld [vmem:[%s4880_s24 + $0x40] sm:$0xff]  ;;  %v767_v35 = vld [vmem:[%s4880_s24 + $0x48] sm:$0xff]  ;;  %v793_v38 = vpack.c.bf16 %v765_v31, %v764_v30 }
  0x66   : > { %3628 = vmatprep.subr.bf16.mxu0 %v4888_v13  ;;  %3668 = vmatprep.subr.bf16.mxu1 %v4888_v13  ;;  %v3405_v36 = vld [vmem:[%s4880_s24 + $0x140] sm:$0xff]  ;;  %v3406_v37 = vld [vmem:[%s4880_s24 + $0x148] sm:$0xff]  ;;  %v1192_v39 = vpack.c.bf16 %v3404_v33, %v3403_v32  ;;  %v794_v40 = vpack.c.bf16 %v767_v35, %v766_v34  ;;  %v768_v42 = vld [vmem:[%s4880_s24 + $0x50] sm:$0xff] }
  0x67   : > { %v1193_v41 = vpack.c.bf16 %v3406_v37, %v3405_v36  ;;  %v769_v43 = vld [vmem:[%s4880_s24 + $0x58] sm:$0xff]  ;;  %v3407_v44 = vld [vmem:[%s4880_s24 + $0x150] sm:$0xff]  ;;  %v770_v46 = vld [vmem:[%s4880_s24 + $0x60] sm:$0xff] }
  0x68   : > { %v3408_v45 = vld [vmem:[%s4880_s24 + $0x158] sm:$0xff]  ;;  %v771_v47 = vld [vmem:[%s4880_s24 + $0x68] sm:$0xff]  ;;  %v3409_v48 = vld [vmem:[%s4880_s24 + $0x160] sm:$0xff]  ;;  %v795_v50 = vpack.c.bf16 %v769_v43, %v768_v42 }
  0x69   : > { %3629 = vmatpush3.bf16.msra.mxu0 %v4888_v13  ;;  %3669 = vmatpush3.bf16.msra.mxu1 %v4888_v13  ;;  %v3410_v49 = vld [vmem:[%s4880_s24 + $0x168] sm:$0xff]  ;;  %v1194_v51 = vpack.c.bf16 %v3408_v45, %v3407_v44  ;;  %v796_v52 = vpack.c.bf16 %v771_v47, %v770_v46  ;;  %v772_v54 = vld [vmem:[%s4880_s24 + $0x70] sm:$0xff]  ;;  %v773_v55 = vld [vmem:[%s4880_s24 + $0x78] sm:$0xff] }
  0x6a   : > { %3630 = vmatprep.subr.bf16.mxu0 %v4902_v17  ;;  %3670 = vmatprep.subr.bf16.mxu1 %v4902_v17  ;;  %v1195_v53 = vpack.c.bf16 %v3410_v49, %v3409_v48  ;;  %v3411_v56 = vld [vmem:[%s4880_s24 + $0x170] sm:$0xff]  ;;  %v3412_v57 = vld [vmem:[%s4880_s24 + $0x178] sm:$0xff]  ;;  %v774_v58 = vld [vmem:[%s4880_s24 + $0x80] sm:$0xff]  ;;  %v797_v62 = vpack.c.bf16 %v773_v55, %v772_v54 }
  0x6b   : > { %v775_v59 = vld [vmem:[%s4880_s24 + $0x88] sm:$0xff]  ;;  %v3413_v60 = vld [vmem:[%s4880_s24 + $0x180] sm:$0xff]  ;;  %v1196_v63 = vpack.c.bf16 %v3412_v57, %v3411_v56  ;;  %v776_v2 = vld [vmem:[%s4880_s24 + $0x90] sm:$0xff] }
  0x6c   : > { %v3414_v61 = vld [vmem:[%s4880_s24 + $0x188] sm:$0xff]  ;;  %v798_v0 = vpack.c.bf16 %v775_v59, %v774_v58  ;;  %v3415_v4 = vld [vmem:[%s4880_s24 + $0x190] sm:$0xff]  ;;  %v778_v6 = vld [vmem:[%s4880_s24 + $0xa0] sm:$0xff] }
  0x6d   : > { %3631 = vmatpush3.bf16.msra.mxu0 %v4902_v17  ;;  %3671 = vmatpush3.bf16.msra.mxu1 %v4902_v17  ;;  %v1197_v1 = vpack.c.bf16 %v3414_v61, %v3413_v60  ;;  %v779_v7 = vld [vmem:[%s4880_s24 + $0xa8] sm:$0xff]  ;;  %v3417_v8 = vld [vmem:[%s4880_s24 + $0x1a0] sm:$0xff]  ;;  %v780_v14 = vld [vmem:[%s4880_s24 + $0xb0] sm:$0xff] }
  0x6e   : > { %3704 = vmatprep.subr.bf16.mxu0 %v752_v3  ;;  %3744 = vmatprep.subr.bf16.mxu1 %v752_v3  ;;  %v3418_v9 = vld [vmem:[%s4880_s24 + $0x1a8] sm:$0xff]  ;;  %v800_v12 = vpack.c.bf16 %v779_v7, %v778_v6  ;;  %v781_v15 = vld [vmem:[%s4880_s24 + $0xb8] sm:$0xff]  ;;  %v3419_v16 = vld [vmem:[%s4880_s24 + $0x1b0] sm:$0xff] }
  0x6f   : > { %v782_v18 = vld [vmem:[%s4880_s24 + $0xc0] sm:$0xff]  ;;  %v783_v19 = vld [vmem:[%s4880_s24 + $0xc8] sm:$0xff]  ;;  %v801_v22 = vpack.c.bf16 %v781_v15, %v780_v14 }
  0x70   : > { %3633 = vmatmul.mubr.msk.bf16.vlgmr.msra.gmra.mrb[0].mxu0 %vm812_vm0, %v791_v26  ;;  %3673 = vmatmul.mubr.msk.bf16.vlgmr.msra.gmra.mrb[0].mxu1 %vm812_vm0, %v1190_v27  ;;  %v3421_v20 = vld [vmem:[%s4880_s24 + $0x1c0] sm:$0xff]  ;;  %v3422_v21 = vld [vmem:[%s4880_s24 + $0x1c8] sm:$0xff]  ;;  %v802_v24 = vpack.c.bf16 %v783_v19, %v782_v18  ;;  %v784_v26 = vld [vmem:[%s4880_s24 + $0xd0] sm:$0xff] }
  0x71   : > { %3636 = vmatprep.mubr.msk.bf16.mxu0 %vm812_vm0, %v792_v28  ;;  %3676 = vmatprep.mubr.msk.bf16.mxu1 %vm812_vm0, %v1191_v29  ;;  %v1201_v25 = vpack.c.bf16 %v3422_v21, %v3421_v20  ;;  %v785_v27 = vld [vmem:[%s4880_s24 + $0xd8] sm:$0xff]  ;;  %v3423_v28 = vld [vmem:[%s4880_s24 + $0x1d0] sm:$0xff]  ;;  %v786_v30 = vld [vmem:[%s4880_s24 + $0xe0] sm:$0xff] }
  0x72   : > { %3705 = vmatpush3.bf16.msra.mxu0 %v752_v3  ;;  %3745 = vmatpush3.bf16.msra.mxu1 %v752_v3  ;;  %v777_v3 = vld [vmem:[%s4880_s24 + $0x98] sm:$0xff]  ;;  %v787_v31 = vld [vmem:[%s4880_s24 + $0xe8] sm:$0xff]  ;;  %v3425_v32 = vld [vmem:[%s4880_s24 + $0x1e0] sm:$0xff]  ;;  %v803_v34 = vpack.c.bf16 %v785_v27, %v784_v26 }
  0x73   : > { %3706 = vmatprep.subr.bf16.mxu0 %v4872_v5  ;;  %3746 = vmatprep.subr.bf16.mxu1 %v4872_v5  ;;  %v799_v10 = vpack.c.bf16 %v777_v3, %v776_v2  ;;  %v3424_v29 = vld [vmem:[%s4880_s24 + $0x1d8] sm:$0xff]  ;;  %v3426_v33 = vld [vmem:[%s4880_s24 + $0x1e8] sm:$0xff]  ;;  %v804_v36 = vpack.c.bf16 %v787_v31, %v786_v30  ;;  %v3445_v42 = vld [vmem:[%s4880_s24 + $0x200] sm:$0xff] }
  0x74   : > { %v1202_v35 = vpack.c.bf16 %v3424_v29, %v3423_v28  ;;  %v1203_v37 = vpack.c.bf16 %v3426_v33, %v3425_v32  ;;  %v3446_v43 = vld [vmem:[%s4880_s24 + $0x208] sm:$0xff]  ;;  %v3493_v44 = vld [vmem:[%s4880_s24 + $0x300] sm:$0xff] }
  0x75   : > { %v3494_v45 = vld [vmem:[%s4880_s24 + $0x308] sm:$0xff]  ;;  %v1575_v48 = vpack.c.bf16 %v3446_v43, %v3445_v42  ;;  %v3449_v54 = vld [vmem:[%s4880_s24 + $0x220] sm:$0xff] }
  0x76   : > { %3707 = vmatpush3.bf16.msra.mxu0 %v4872_v5  ;;  %3747 = vmatpush3.bf16.msra.mxu1 %v4872_v5  ;;  %v3416_v5 = vld [vmem:[%s4880_s24 + $0x198] sm:$0xff]  ;;  %v1961_v49 = vpack.c.bf16 %v3494_v45, %v3493_v44  ;;  %v3450_v55 = vld [vmem:[%s4880_s24 + $0x228] sm:$0xff]  ;;  %v3497_v56 = vld [vmem:[%s4880_s24 + $0x320] sm:$0xff] }
  0x77   : > { %3708 = vmatprep.subr.bf16.mxu0 %v4888_v13  ;;  %3748 = vmatprep.subr.bf16.mxu1 %v4888_v13  ;;  %v1198_v11 = vpack.c.bf16 %v3416_v5, %v3415_v4  ;;  %v3498_v57 = vld [vmem:[%s4880_s24 + $0x328] sm:$0xff]  ;;  %v1577_v60 = vpack.c.bf16 %v3450_v55, %v3449_v54  ;;  %v3453_v2 = vld [vmem:[%s4880_s24 + $0x240] sm:$0xff] }
  0x78   : > { %3637 = vmatmul.mubr.msk.bf16.gmra.mrb[4].mxu0 %vm812_vm0, %v793_v38  ;;  %3677 = vmatmul.mubr.msk.bf16.gmra.mrb[4].mxu1 %vm812_vm0, %v1192_v39  ;;  %v788_v38 = vld [vmem:[%s4880_s24 + $0xf0] sm:$0xff]  ;;  %v789_v39 = vld [vmem:[%s4880_s24 + $0xf8] sm:$0xff]  ;;  %v1963_v61 = vpack.c.bf16 %v3498_v57, %v3497_v56  ;;  %v3454_v3 = vld [vmem:[%s4880_s24 + $0x248] sm:$0xff] }
  0x79   : > { %3640 = vmatprep.mubr.msk.bf16.mxu0 %vm812_vm0, %v794_v40  ;;  %3680 = vmatprep.mubr.msk.bf16.mxu1 %vm812_vm0, %v1193_v41  ;;  %v3427_v40 = vld [vmem:[%s4880_s24 + $0x1f0] sm:$0xff]  ;;  %v3428_v41 = vld [vmem:[%s4880_s24 + $0x1f8] sm:$0xff]  ;;  %v805_v46 = vpack.c.bf16 %v789_v39, %v788_v38  ;;  %v3501_v4 = vld [vmem:[%s4880_s24 + $0x340] sm:$0xff] }
  0x7a   : > { %3709 = vmatpush3.bf16.msra.mxu0 %v4888_v13  ;;  %3749 = vmatpush3.bf16.msra.mxu1 %v4888_v13  ;;  %v1199_v13 = vpack.c.bf16 %v3418_v9, %v3417_v8  ;;  %v1204_v47 = vpack.c.bf16 %v3428_v41, %v3427_v40  ;;  %v3502_v5 = vld [vmem:[%s4880_s24 + $0x348] sm:$0xff]  ;;  %v1579_v8 = vpack.c.bf16 %v3454_v3, %v3453_v2  ;;  %v3457_v14 = vld [vmem:[%s4880_s24 + $0x260] sm:$0xff]  ;;  %v3475_v3 = vld [vmem:[%s4880_s24 + $0x2f0] sm:$0xff] }
  0x7b   : > { %3710 = vmatprep.subr.bf16.mxu0 %v4902_v17  ;;  %3750 = vmatprep.subr.bf16.mxu1 %v4902_v17  ;;  %v1965_v9 = vpack.c.bf16 %v3502_v5, %v3501_v4  ;;  %v3458_v15 = vld [vmem:[%s4880_s24 + $0x268] sm:$0xff]  ;;  %v3461_v26 = vld [vmem:[%s4880_s24 + $0x280] sm:$0xff] }
  0x7c   : > { %v1581_v20 = vpack.c.bf16 %v3458_v15, %v3457_v14  ;;  %v3462_v27 = vld [vmem:[%s4880_s24 + $0x288] sm:$0xff]  ;;  %v3509_v28 = vld [vmem:[%s4880_s24 + $0x380] sm:$0xff] }
  0x7d   : > { %v3510_v29 = vld [vmem:[%s4880_s24 + $0x388] sm:$0xff]  ;;  %v1583_v32 = vpack.c.bf16 %v3462_v27, %v3461_v26  ;;  %v3465_v38 = vld [vmem:[%s4880_s24 + $0x2a0] sm:$0xff] }
  0x7e   : > { %3711 = vmatpush3.bf16.msra.mxu0 %v4902_v17  ;;  %3751 = vmatpush3.bf16.msra.mxu1 %v4902_v17  ;;  %v3420_v17 = vld [vmem:[%s4880_s24 + $0x1b8] sm:$0xff]  ;;  %v1969_v33 = vpack.c.bf16 %v3510_v29, %v3509_v28  ;;  %v3466_v39 = vld [vmem:[%s4880_s24 + $0x2a8] sm:$0xff]  ;;  %v3513_v40 = vld [vmem:[%s4880_s24 + $0x3a0] sm:$0xff] }
  0x7f   : > { %v1200_v23 = vpack.c.bf16 %v3420_v17, %v3419_v16  ;;  %v3505_v16 = vld [vmem:[%s4880_s24 + $0x360] sm:$0xff]  ;;  %v3506_v17 = vld [vmem:[%s4880_s24 + $0x368] sm:$0xff]  ;;  %v1585_v44 = vpack.c.bf16 %v3466_v39, %v3465_v38 }
  0x80   : > { %3641 = vmatmul.mubr.msk.bf16.gmra.mrb[8].mxu0 %vm812_vm0, %v795_v50  ;;  %3681 = vmatmul.mubr.msk.bf16.gmra.mrb[8].mxu1 %vm812_vm0, %v1194_v51  ;;  %v3447_v50 = vld [vmem:[%s4880_s24 + $0x210] sm:$0xff]  ;;  %v3448_v51 = vld [vmem:[%s4880_s24 + $0x218] sm:$0xff]  ;;  %v1967_v21 = vpack.c.bf16 %v3506_v17, %v3505_v16  ;;  %v3514_v41 = vld [vmem:[%s4880_s24 + $0x3a8] sm:$0xff] }
  0x81   : > { %3644 = vmatprep.mubr.msk.bf16.mxu0 %vm812_vm0, %v796_v52  ;;  %3684 = vmatprep.mubr.msk.bf16.mxu1 %vm812_vm0, %v1195_v53  ;;  %v3495_v52 = vld [vmem:[%s4880_s24 + $0x310] sm:$0xff]  ;;  %v3496_v53 = vld [vmem:[%s4880_s24 + $0x318] sm:$0xff]  ;;  %v1576_v58 = vpack.c.bf16 %v3448_v51, %v3447_v50  ;;  %v1971_v45 = vpack.c.bf16 %v3514_v41, %v3513_v40  ;;  %v3469_v50 = vld [vmem:[%s4880_s24 + $0x2c0] sm:$0xff] }
  0x82   : > { %v1962_v59 = vpack.c.bf16 %v3496_v53, %v3495_v52  ;;  %v3470_v51 = vld [vmem:[%s4880_s24 + $0x2c8] sm:$0xff]  ;;  %v3517_v52 = vld [vmem:[%s4880_s24 + $0x3c0] sm:$0xff] }
  0x83   : > { %v3518_v53 = vld [vmem:[%s4880_s24 + $0x3c8] sm:$0xff]  ;;  %v1587_v56 = vpack.c.bf16 %v3470_v51, %v3469_v50  ;;  %v3521_v4 = vld [vmem:[%s4880_s24 + $0x3e0] sm:$0xff] }
  0x84   : > { %v1973_v57 = vpack.c.bf16 %v3518_v53, %v3517_v52  ;;  %v3522_v5 = vld [vmem:[%s4880_s24 + $0x3e8] sm:$0xff] }
  0x88   : > { %3645 = vmatmul.mubr.msk.bf16.gmra.mrb[12].mxu0 %vm812_vm0, %v797_v62  ;;  %3685 = vmatmul.mubr.msk.bf16.gmra.mrb[12].mxu1 %vm812_vm0, %v1196_v63  ;;  %v3451_v62 = vld [vmem:[%s4880_s24 + $0x230] sm:$0xff]  ;;  %v3452_v63 = vld [vmem:[%s4880_s24 + $0x238] sm:$0xff] }
  0x89   : > { %3648 = vmatprep.mubr.msk.bf16.mxu0 %vm812_vm0, %v798_v0  ;;  %3688 = vmatprep.mubr.msk.bf16.mxu1 %vm812_vm0, %v1197_v1  ;;  %v3499_v0 = vld [vmem:[%s4880_s24 + $0x330] sm:$0xff]  ;;  %v3500_v1 = vld [vmem:[%s4880_s24 + $0x338] sm:$0xff]  ;;  %v1578_v6 = vpack.c.bf16 %v3452_v63, %v3451_v62  ;;  %v3473_v62 = vld [vmem:[%s4880_s24 + $0x2e0] sm:$0xff] }
  0x8a   : > { %v1964_v7 = vpack.c.bf16 %v3500_v1, %v3499_v0  ;;  %v3474_v63 = vld [vmem:[%s4880_s24 + $0x2e8] sm:$0xff] }
  0x8b   : > { %v1589_v2 = vpack.c.bf16 %v3474_v63, %v3473_v62 }
  0x90   : > { %3649 = vmatmul.mubr.msk.bf16.gmra.mrb[16].mxu0 %vm812_vm0, %v799_v10  ;;  %3689 = vmatmul.mubr.msk.bf16.gmra.mrb[16].mxu1 %vm812_vm0, %v1198_v11  ;;  %v3455_v10 = vld [vmem:[%s4880_s24 + $0x250] sm:$0xff]  ;;  %v3456_v11 = vld [vmem:[%s4880_s24 + $0x258] sm:$0xff] }
  0x91   : > { %3652 = vmatprep.mubr.msk.bf16.mxu0 %vm812_vm0, %v800_v12  ;;  %3692 = vmatprep.mubr.msk.bf16.mxu1 %vm812_vm0, %v1199_v13  ;;  %v3503_v12 = vld [vmem:[%s4880_s24 + $0x350] sm:$0xff]  ;;  %v3504_v13 = vld [vmem:[%s4880_s24 + $0x358] sm:$0xff]  ;;  %v1580_v18 = vpack.c.bf16 %v3456_v11, %v3455_v10 }
  0x92   : > { %v1966_v19 = vpack.c.bf16 %v3504_v13, %v3503_v12  ;;  %v5111_v12 = vld [vmem:[%s7025_s2] ss:$0 sm:$0xff] }
  0x98   : > { %3653 = vmatmul.mubr.msk.bf16.gmra.mrb[20].mxu0 %vm812_vm0, %v801_v22  ;;  %3693 = vmatmul.mubr.msk.bf16.gmra.mrb[20].mxu1 %vm812_vm0, %v1200_v23  ;;  %v3459_v22 = vld [vmem:[%s4880_s24 + $0x270] sm:$0xff]  ;;  %v3460_v23 = vld [vmem:[%s4880_s24 + $0x278] sm:$0xff] }
  0x99   : > { %3656 = vmatprep.mubr.msk.bf16.mxu0 %vm812_vm0, %v802_v24  ;;  %3696 = vmatprep.mubr.msk.bf16.mxu1 %vm812_vm0, %v1201_v25  ;;  %v3507_v24 = vld [vmem:[%s4880_s24 + $0x370] sm:$0xff]  ;;  %v3508_v25 = vld [vmem:[%s4880_s24 + $0x378] sm:$0xff]  ;;  %v1582_v30 = vpack.c.bf16 %v3460_v23, %v3459_v22 }
  0x9a   : > { %v1968_v31 = vpack.c.bf16 %v3508_v25, %v3507_v24 }
  0xa0   : > { %3657 = vmatmul.mubr.msk.bf16.gmra.mrb[24].mxu0 %vm812_vm0, %v803_v34  ;;  %3697 = vmatmul.mubr.msk.bf16.gmra.mrb[24].mxu1 %vm812_vm0, %v1202_v35  ;;  %v3463_v34 = vld [vmem:[%s4880_s24 + $0x290] sm:$0xff]  ;;  %v3464_v35 = vld [vmem:[%s4880_s24 + $0x298] sm:$0xff] }
  0xa1   : > { %3660 = vmatprep.mubr.msk.bf16.mxu0 %vm812_vm0, %v804_v36  ;;  %3700 = vmatprep.mubr.msk.bf16.mxu1 %vm812_vm0, %v1203_v37  ;;  %v3511_v36 = vld [vmem:[%s4880_s24 + $0x390] sm:$0xff]  ;;  %v3512_v37 = vld [vmem:[%s4880_s24 + $0x398] sm:$0xff]  ;;  %v1584_v42 = vpack.c.bf16 %v3464_v35, %v3463_v34 }
  0xa2   : > { %v1970_v43 = vpack.c.bf16 %v3512_v37, %v3511_v36  ;;  %v5124_v36 = vld [vmem:[%s7026_s3] ss:$0 sm:$0xff] }
  0xa8   : > { %3661 = vmatmul.mubr.msk.bf16.gmra.mrb[28].mxu0 %vm812_vm0, %v805_v46  ;;  %3701 = vmatmul.mubr.msk.bf16.gmra.mrb[28].mxu1 %vm812_vm0, %v1204_v47  ;;  %v3467_v46 = vld [vmem:[%s4880_s24 + $0x2b0] sm:$0xff]  ;;  %v3468_v47 = vld [vmem:[%s4880_s24 + $0x2b8] sm:$0xff] }
  0xa9   : > { %3712 = vmatprep.mubr.msk.bf16.mxu0 %vm812_vm0, %v1575_v48  ;;  %3752 = vmatprep.mubr.msk.bf16.mxu1 %vm812_vm0, %v1961_v49  ;;  %v3515_v48 = vld [vmem:[%s4880_s24 + $0x3b0] sm:$0xff]  ;;  %v3516_v49 = vld [vmem:[%s4880_s24 + $0x3b8] sm:$0xff]  ;;  %v1586_v54 = vpack.c.bf16 %v3468_v47, %v3467_v46 }
  0xaa   : > { %v1972_v55 = vpack.c.bf16 %v3516_v49, %v3515_v48 }
  0xb0   : > { %3713 = vmatmul.mubr.msk.bf16.vlgmr.msra.gmra.mrb[32].mxu0 %vm812_vm0, %v1576_v58  ;;  %3753 = vmatmul.mubr.msk.bf16.vlgmr.msra.gmra.mrb[32].mxu1 %vm812_vm0, %v1962_v59  ;;  %v3471_v58 = vld [vmem:[%s4880_s24 + $0x2d0] sm:$0xff]  ;;  %v3472_v59 = vld [vmem:[%s4880_s24 + $0x2d8] sm:$0xff] }
  0xb1   : > { %3716 = vmatprep.mubr.msk.bf16.mxu0 %vm812_vm0, %v1577_v60  ;;  %3756 = vmatprep.mubr.msk.bf16.mxu1 %vm812_vm0, %v1963_v61  ;;  %v3519_v60 = vld [vmem:[%s4880_s24 + $0x3d0] sm:$0xff]  ;;  %v3520_v61 = vld [vmem:[%s4880_s24 + $0x3d8] sm:$0xff]  ;;  %v1588_v0 = vpack.c.bf16 %v3472_v59, %v3471_v58 }
  0xb2   : > { %v1974_v1 = vpack.c.bf16 %v3520_v61, %v3519_v60 }
  0xb8   : > { %3717 = vmatmul.mubr.msk.bf16.gmra.mrb[36].mxu0 %vm812_vm0, %v1578_v6  ;;  %3757 = vmatmul.mubr.msk.bf16.gmra.mrb[36].mxu1 %vm812_vm0, %v1964_v7  ;;  %v3476_v6 = vld [vmem:[%s4880_s24 + $0x2f8] sm:$0xff]  ;;  %v1975_v7 = vpack.c.bf16 %v3522_v5, %v3521_v4 }
  0xb9   : > { %3720 = vmatprep.mubr.msk.bf16.mxu0 %vm812_vm0, %v1579_v8  ;;  %3760 = vmatprep.mubr.msk.bf16.mxu1 %vm812_vm0, %v1965_v9  ;;  %v3523_v8 = vld [vmem:[%s4880_s24 + $0x3f0] sm:$0xff]  ;;  %v3524_v9 = vld [vmem:[%s4880_s24 + $0x3f8] sm:$0xff]  ;;  %v1590_v10 = vpack.c.bf16 %v3476_v6, %v3475_v3 }
  0xba   : > { %v1976_v11 = vpack.c.bf16 %v3524_v9, %v3523_v8 }
  0xc0   : > { %3721 = vmatmul.mubr.msk.bf16.gmra.mrb[40].mxu0 %vm812_vm0, %v1580_v18  ;;  %3761 = vmatmul.mubr.msk.bf16.gmra.mrb[40].mxu1 %vm812_vm0, %v1966_v19 }
  0xc1   : > { %3724 = vmatprep.mubr.msk.bf16.mxu0 %vm812_vm0, %v1581_v20  ;;  %3764 = vmatprep.mubr.msk.bf16.mxu1 %vm812_vm0, %v1967_v21 }
  0xc8   : > { %3725 = vmatmul.mubr.msk.bf16.gmra.mrb[44].mxu0 %vm812_vm0, %v1582_v30  ;;  %3765 = vmatmul.mubr.msk.bf16.gmra.mrb[44].mxu1 %vm812_vm0, %v1968_v31 }
  0xc9   : > { %3728 = vmatprep.mubr.msk.bf16.mxu0 %vm812_vm0, %v1583_v32  ;;  %3768 = vmatprep.mubr.msk.bf16.mxu1 %vm812_vm0, %v1969_v33 }
  0xd0   : > { %3729 = vmatmul.mubr.msk.bf16.gmra.mrb[48].mxu0 %vm812_vm0, %v1584_v42  ;;  %3769 = vmatmul.mubr.msk.bf16.gmra.mrb[48].mxu1 %vm812_vm0, %v1970_v43 }
  0xd1   : > { %3732 = vmatprep.mubr.msk.bf16.mxu0 %vm812_vm0, %v1585_v44  ;;  %3772 = vmatprep.mubr.msk.bf16.mxu1 %vm812_vm0, %v1971_v45 }
  0xd8   : > { %3733 = vmatmul.mubr.msk.bf16.gmra.mrb[52].mxu0 %vm812_vm0, %v1586_v54  ;;  %3773 = vmatmul.mubr.msk.bf16.gmra.mrb[52].mxu1 %vm812_vm0, %v1972_v55 }
  0xd9   : > { %3736 = vmatprep.mubr.msk.bf16.mxu0 %vm812_vm0, %v1587_v56  ;;  %3776 = vmatprep.mubr.msk.bf16.mxu1 %vm812_vm0, %v1973_v57 }
  0xe0   : > { %3737 = vmatmul.mubr.msk.bf16.gmra.mrb[56].mxu0 %vm812_vm0, %v1588_v0  ;;  %3777 = vmatmul.mubr.msk.bf16.gmra.mrb[56].mxu1 %vm812_vm0, %v1974_v1 }
  0xe1   : > { %3740 = vmatprep.mubr.msk.bf16.mxu0 %vm812_vm0, %v1589_v2  ;;  %3780 = vmatprep.mubr.msk.bf16.mxu1 %vm812_vm0, %v1975_v7 }
  0xe8   : > { %3741 = vmatmul.mubr.msk.bf16.gmra.mrb[60].mxu0 %vm812_vm0, %v1590_v10  ;;  %3781 = vmatmul.mubr.msk.bf16.gmra.mrb[60].mxu1 %vm812_vm0, %v1976_v11 }
 0x143   : > { %v3634_v13 = vpop.f32.mrb[0].mxu0  ;;  %v3674_v14 = vpop.f32.mrb[0].mxu1 }
 0x144   : > { %v904_v15 = vadd.f32 %v3634_v13, %v5111_v12  ;;  %v1296_v16 = vadd.f32 %v3674_v14, %v5111_v12  ;;  %v895_v17 = vpop.f32.mrb[1].mxu0  ;;  %v1287_v18 = vpop.f32.mrb[1].mxu1 }
 0x145   : > { %v896_v19 = vadd.f32 %v5111_v12, %v895_v17  ;;  %v3635_v20 = vpop.f32.mrb[2].mxu0  ;;  %v3675_v21 = vpop.f32.mrb[2].mxu1  ;;  %v1288_v26 = vadd.f32 %v5111_v12, %v1287_v18 }
 0x146   : > { %3808 = vtanh.f32 %v904_v15  ;;  %v907_v22 = vadd.f32 %v3635_v20, %v5111_v12  ;;  %v898_v23 = vpop.f32.mrb[3].mxu0  ;;  %v1290_v24 = vpop.f32.mrb[3].mxu1  ;;  %v1299_v25 = vadd.f32 %v3675_v21, %v5111_v12 }
 0x147   : > { %3810 = vtanh.f32 %v1296_v16  ;;  %v1291_v29 = vadd.f32 %v5111_v12, %v1290_v24  ;;  %v899_v32 = vadd.f32 %v5111_v12, %v898_v23 }
 0x148   : > { %3812 = vtanh.f32 %v896_v19 }
 0x149   : > { %3814 = vtanh.f32 %v907_v22 }
 0x14a   : > { %3816 = vtanh.f32 %v1299_v25 }
 0x14b   : > { %v3638_v27 = vpop.f32.mrb[4].mxu0  ;;  %v3678_v28 = vpop.f32.mrb[4].mxu1  ;;  %3818 = vtanh.f32 %v1288_v26 }
 0x14c   : > { %v911_v30 = vpop.f32.mrb[5].mxu0  ;;  %v1303_v31 = vpop.f32.mrb[5].mxu1  ;;  %3820 = vtanh.f32 %v1291_v29  ;;  %v920_v41 = vadd.f32 %v3638_v27, %v5111_v12  ;;  %v1312_v51 = vadd.f32 %v3678_v28, %v5111_v12 }
 0x14d   : > { %v3639_v33 = vpop.f32.mrb[6].mxu0  ;;  %v3679_v34 = vpop.f32.mrb[6].mxu1  ;;  %3822 = vtanh.f32 %v899_v32  ;;  %v912_v61 = vadd.f32 %v5111_v12, %v911_v30  ;;  %v1304_v7 = vadd.f32 %v5111_v12, %v1303_v31 }
 0x14e   : > { %v914_v35 = vpop.f32.mrb[7].mxu0  ;;  %v1306_v37 = vpop.f32.mrb[7].mxu1  ;;  %v923_v39 = vadd.f32 %v3639_v33, %v5111_v12  ;;  %v1315_v48 = vadd.f32 %v3679_v34, %v5111_v12 }
 0x14f   : > { %v915_v60 = vadd.f32 %v5111_v12, %v914_v35  ;;  %v1307_v4 = vadd.f32 %v5111_v12, %v1306_v37 }
 0x150   : > { %v3809_v38 = vpop.eup %3808  ;;  %3824 = vtanh.f32 %v923_v39 }
 0x151   : > { %v3811_v40 = vpop.eup %3810  ;;  %v1062_v42 = vmul.f32 %v3809_v38, %v5124_v36  ;;  %3826 = vtanh.f32 %v920_v41 }
 0x152   : > { %v1448_v43 = vmul.f32 %v3811_v40, %v5124_v36  ;;  %v3813_v44 = vpop.eup %3812  ;;  %3828 = vtanh.f32 %v1315_v48 }
 0x153   : > { %1096 = vadd.xlane.f32.xlu1 %v1062_v42  ;;  %v3642_v45 = vpop.f32.mrb[8].mxu0  ;;  %v5130_v46 = vpop.f32.mrb[8].mxu1  ;;  %v1060_v56 = vmul.f32 %v3813_v44, %v5124_v36  ;;  %3830 = vtanh.f32 %v1312_v51 }
 0x154   : > { %v3815_v47 = vpop.eup %3814  ;;  %1482 = vadd.xlane.f32.xlu0 %v1448_v43  ;;  %v5133_v49 = vpop.f32.mrb[9].mxu0  ;;  %3832 = vtanh.f32 %v915_v60  ;;  %v936_v18 = vadd.f32 %v3642_v45, %v5111_v12  ;;  %v1328_v28 = vadd.f32 %v5130_v46, %v5111_v12 }
 0x155   : > { %v5135_v50 = vpop.f32.mrb[9].mxu1  ;;  %v1063_v52 = vmul.f32 %v3815_v47, %v5124_v36  ;;  %v3643_v53 = vpop.f32.mrb[10].mxu0  ;;  %3834 = vtanh.f32 %v912_v61  ;;  %v928_v39 = vadd.f32 %v5111_v12, %v5133_v49 }
 0x156   : > { %v3683_v54 = vpop.f32.mrb[10].mxu1  ;;  %v3817_v55 = vpop.eup %3816  ;;  %3836 = vtanh.f32 %v1307_v4  ;;  %v939_v17 = vadd.f32 %v3643_v53, %v5111_v12  ;;  %v1320_v49 = vadd.f32 %v5111_v12, %v5135_v50 }
 0x157   : > { %v930_v57 = vpop.f32.mrb[11].mxu0  ;;  %v5140_v58 = vpop.f32.mrb[11].mxu1  ;;  %1098 = vadd.xlane.f32.xlu1 %v1063_v52  ;;  %v1449_v62 = vmul.f32 %v3817_v55, %v5124_v36  ;;  %3838 = vtanh.f32 %v1304_v7  ;;  %v1331_v25 = vadd.f32 %v3683_v54, %v5111_v12 }
 0x158   : > { %v3819_v59 = vpop.eup %3818  ;;  %1092 = vadd.xlane.f32.xlu0 %v1060_v56  ;;  %3840 = vtanh.f32 %v939_v17  ;;  %v931_v38 = vadd.f32 %v5111_v12, %v930_v57  ;;  %v1323_v46 = vadd.f32 %v5111_v12, %v5140_v58 }
 0x159   : > { %v3821_v63 = vpop.eup %3820  ;;  %v1446_v0 = vmul.f32 %v3819_v59, %v5124_v36  ;;  %3842 = vtanh.f32 %v936_v18 }
 0x15a   : > { %v3823_v1 = vpop.eup %3822  ;;  %v1447_v8 = vmul.f32 %v3821_v63, %v5124_v36  ;;  %3844 = vtanh.f32 %v1331_v25 }
 0x15b   : > { %1484 = vadd.xlane.f32.xlu1 %v1449_v62  ;;  %v5146_v2 = vpop.f32.mrb[12].mxu0  ;;  %v5148_v3 = vpop.f32.mrb[12].mxu1  ;;  %v1061_v13 = vmul.f32 %v3823_v1, %v5124_v36  ;;  %3846 = vtanh.f32 %v1328_v28 }
 0x15c   : > { %1478 = vadd.xlane.f32.xlu0 %v1446_v0  ;;  %v5151_v5 = vpop.f32.mrb[13].mxu0  ;;  %v5153_v6 = vpop.f32.mrb[13].mxu1  ;;  %3848 = vtanh.f32 %v931_v38  ;;  %v952_v59 = vadd.f32 %v5146_v2, %v5111_v12  ;;  %v1344_v2 = vadd.f32 %v5148_v3, %v5111_v12 }
 0x15d   : > { %v5157_v9 = vpop.f32.mrb[14].mxu0  ;;  %v5159_v10 = vpop.f32.mrb[14].mxu1  ;;  %3850 = vtanh.f32 %v928_v39  ;;  %v944_v3 = vadd.f32 %v5111_v12, %v5151_v5 }
 0x15e   : > { %v3825_v11 = vpop.eup %3824  ;;  %v5162_v14 = vpop.f32.mrb[15].mxu0  ;;  %3852 = vtanh.f32 %v1323_v46  ;;  %v955_v50 = vadd.f32 %v5157_v9, %v5111_v12  ;;  %v1347_v4 = vadd.f32 %v5159_v10, %v5111_v12 }
 0x15f   : > { %v5164_v15 = vpop.f32.mrb[15].mxu1  ;;  %v3827_v16 = vpop.eup %3826  ;;  %1480 = vadd.xlane.f32.xlu1 %v1447_v8  ;;  %v1067_v19 = vmul.f32 %v3825_v11, %v5124_v36  ;;  %3854 = vtanh.f32 %v1320_v49 }
 0x160   : > { %1094 = vadd.xlane.f32.xlu0 %v1061_v13  ;;  %v3829_v20 = vpop.eup %3828  ;;  %v1066_v21 = vmul.f32 %v3827_v16, %v5124_v36  ;;  %3856 = vtanh.f32 %v955_v50 }
 0x161   : > { %v3831_v22 = vpop.eup %3830  ;;  %v1453_v29 = vmul.f32 %v3829_v20, %v5124_v36  ;;  %3858 = vtanh.f32 %v952_v59  ;;  %v947_v20 = vadd.f32 %v5111_v12, %v5162_v14  ;;  %v1339_v14 = vadd.f32 %v5111_v12, %v5164_v15 }
 0x162   : > { %v3833_v32 = vpop.eup %3832  ;;  %v1452_v33 = vmul.f32 %v3831_v22, %v5124_v36  ;;  %3860 = vtanh.f32 %v1347_v4 }
 0x163   : > { %1106 = vadd.xlane.f32.xlu1 %v1067_v19  ;;  %v5170_v23 = vpop.f32.mrb[16].mxu0  ;;  %v5172_v24 = vpop.f32.mrb[16].mxu1  ;;  %v1065_v40 = vmul.f32 %v3833_v32, %v5124_v36  ;;  %3862 = vtanh.f32 %v1344_v2 }
 0x164   : > { %1104 = vadd.xlane.f32.xlu0 %v1066_v21  ;;  %v5175_v26 = vpop.f32.mrb[17].mxu0  ;;  %v5177_v27 = vpop.f32.mrb[17].mxu1  ;;  %3864 = vtanh.f32 %v947_v20  ;;  %v968_v49 = vadd.f32 %v5170_v23, %v5111_v12  ;;  %v1360_v23 = vadd.f32 %v5172_v24, %v5111_v12 }
 0x165   : > { %v5182_v30 = vpop.f32.mrb[18].mxu0  ;;  %v5184_v31 = vpop.f32.mrb[18].mxu1  ;;  %v960_v24 = vadd.f32 %v5111_v12, %v5175_v26 }
 0x166   : > { %v5187_v34 = vpop.f32.mrb[19].mxu0  ;;  %v5189_v35 = vpop.f32.mrb[19].mxu1 }
 0x167   : > { %v3835_v37 = vpop.eup %3834  ;;  %1492 = vadd.xlane.f32.xlu1 %v1453_v29  ;;  %3866 = vtanh.f32 %v944_v3 }
 0x168   : > { %1490 = vadd.xlane.f32.xlu0 %v1452_v33  ;;  %v3837_v41 = vpop.eup %3836  ;;  %v1064_v42 = vmul.f32 %v3835_v37, %v5124_v36  ;;  %v1336_v37 = vadd.f32 %v5111_v12, %v5153_v6  ;;  %3868 = vtanh.f32 %v1339_v14  ;;  %v971_v6 = vadd.f32 %v5182_v30, %v5111_v12 }
 0x169   : > { %v3839_v43 = vpop.eup %3838  ;;  %v1451_v51 = vmul.f32 %v3837_v41, %v5124_v36  ;;  %v1363_v30 = vadd.f32 %v5184_v31, %v5111_v12 }
 0x16a   : > { %v3841_v54 = vpop.eup %3840  ;;  %v1450_v55 = vmul.f32 %v3839_v43, %v5124_v36  ;;  %3870 = vtanh.f32 %v1336_v37  ;;  %v1352_v37 = vadd.f32 %v5111_v12, %v5177_v27 }
 0x16b   : > { %1102 = vadd.xlane.f32.xlu1 %v1065_v40  ;;  %v5196_v44 = vpop.f32.mrb[20].mxu0  ;;  %v5198_v45 = vpop.f32.mrb[20].mxu1  ;;  %v1071_v60 = vmul.f32 %v3841_v54, %v5124_v36  ;;  %3872 = vtanh.f32 %v971_v6 }
 0x16c   : > { %1100 = vadd.xlane.f32.xlu0 %v1064_v42  ;;  %v5202_v47 = vpop.f32.mrb[21].mxu0  ;;  %v5204_v48 = vpop.f32.mrb[21].mxu1 }
 0x16d   : > { %v5209_v52 = vpop.f32.mrb[22].mxu0  ;;  %v5211_v53 = vpop.f32.mrb[22].mxu1 }
 0x16e   : > { %v5214_v56 = vpop.f32.mrb[23].mxu0  ;;  %v5216_v57 = vpop.f32.mrb[23].mxu1  ;;  %v987_v27 = vadd.f32 %v5209_v52, %v5111_v12  ;;  %v1379_v52 = vadd.f32 %v5211_v53, %v5111_v12 }
 0x16f   : > { %v3843_v58 = vpop.eup %3842  ;;  %1488 = vadd.xlane.f32.xlu1 %v1451_v51  ;;  %3874 = vtanh.f32 %v968_v49 }
 0x170   : > { %1486 = vadd.xlane.f32.xlu0 %v1450_v55  ;;  %v3845_v61 = vpop.eup %3844  ;;  %v1070_v62 = vmul.f32 %v3843_v58, %v5124_v36  ;;  %3876 = vtanh.f32 %v1363_v30 }
 0x171   : > { %v3847_v63 = vpop.eup %3846  ;;  %v1457_v9 = vmul.f32 %v3845_v61, %v5124_v36  ;;  %3878 = vtanh.f32 %v1360_v23 }
 0x172   : > { %v3849_v16 = vpop.eup %3848  ;;  %v1456_v17 = vmul.f32 %v3847_v63, %v5124_v36 }
 0x173   : > { %1114 = vadd.xlane.f32.xlu1 %v1071_v60  ;;  %v5224_v0 = vpop.f32.mrb[24].mxu0  ;;  %v5226_v1 = vpop.f32.mrb[24].mxu1  ;;  %v1069_v21 = vmul.f32 %v3849_v16, %v5124_v36 }
 0x174   : > { %1112 = vadd.xlane.f32.xlu0 %v1070_v62  ;;  %v5230_v7 = vpop.f32.mrb[25].mxu0  ;;  %v5232_v8 = vpop.f32.mrb[25].mxu1 }
 0x175   : > { %v5237_v11 = vpop.f32.mrb[26].mxu0  ;;  %v5239_v13 = vpop.f32.mrb[26].mxu1 }
 0x176   : > { %v5242_v18 = vpop.f32.mrb[27].mxu0  ;;  %v5244_v10 = vpop.f32.mrb[27].mxu1 }
 0x177   : > { %v3851_v19 = vpop.eup %3850  ;;  %1500 = vadd.xlane.f32.xlu1 %v1457_v9 }
 0x178   : > { %1498 = vadd.xlane.f32.xlu0 %v1456_v17  ;;  %v3853_v22 = vpop.eup %3852  ;;  %v1068_v25 = vmul.f32 %v3851_v19, %v5124_v36  ;;  %v963_v19 = vadd.f32 %v5111_v12, %v5187_v34  ;;  %v1355_v34 = vadd.f32 %v5111_v12, %v5189_v35 }
 0x179   : > { %v3855_v28 = vpop.eup %3854  ;;  %v1455_v38 = vmul.f32 %v3853_v22, %v5124_v36 }
 0x17a   : > { %v3857_v41 = vpop.eup %3856  ;;  %v1454_v42 = vmul.f32 %v3855_v28, %v5124_v36  ;;  %3880 = vtanh.f32 %v963_v19 }
 0x17b   : > { %1110 = vadd.xlane.f32.xlu1 %v1069_v21  ;;  %v5252_v29 = vpop.f32.mrb[28].mxu0  ;;  %v5254_v32 = vpop.f32.mrb[28].mxu1  ;;  %v1075_v51 = vmul.f32 %v3857_v41, %v5124_v36  ;;  %3882 = vtanh.f32 %v960_v24 }
 0x17c   : > { %1108 = vadd.xlane.f32.xlu0 %v1068_v25  ;;  %v5258_v33 = vpop.f32.mrb[29].mxu0  ;;  %v5260_v5 = vpop.f32.mrb[29].mxu1  ;;  %3884 = vtanh.f32 %v1355_v34 }
 0x17d   : > { %v5265_v39 = vpop.f32.mrb[30].mxu0  ;;  %v5267_v40 = vpop.f32.mrb[30].mxu1  ;;  %3886 = vtanh.f32 %v1352_v37  ;;  %v979_v37 = vadd.f32 %v5111_v12, %v5214_v56  ;;  %v1371_v56 = vadd.f32 %v5111_v12, %v5216_v57 }
 0x17e   : > { %v5270_v43 = vpop.f32.mrb[31].mxu0  ;;  %v5272_v15 = vpop.f32.mrb[31].mxu1  ;;  %3888 = vtanh.f32 %v987_v27 }
 0x17f   : > { %v3859_v46 = vpop.eup %3858  ;;  %1496 = vadd.xlane.f32.xlu1 %v1455_v38 }
 0x180   : > { %1494 = vadd.xlane.f32.xlu0 %v1454_v42  ;;  %v3861_v54 = vpop.eup %3860  ;;  %v1074_v55 = vmul.f32 %v3859_v46, %v5124_v36 }
 0x181   : > { %v3863_v58 = vpop.eup %3862  ;;  %v1461_v62 = vmul.f32 %v3861_v54, %v5124_v36  ;;  %v984_v54 = vadd.f32 %v5196_v44, %v5111_v12  ;;  %v1376_v44 = vadd.f32 %v5198_v45, %v5111_v12  ;;  %v976_v45 = vadd.f32 %v5111_v12, %v5202_v47 }
 0x182   : > { %v3865_v2 = vpop.eup %3864  ;;  %v1460_v9 = vmul.f32 %v3863_v58, %v5124_v36 }
 0x183   : > { %1122 = vadd.xlane.f32.xlu1 %v1075_v51  ;;  %v5280_v50 = vpop.f32.mrb[32].mxu0  ;;  %v5282_v59 = vpop.f32.mrb[32].mxu1  ;;  %v1073_v20 = vmul.f32 %v3865_v2, %v5124_v36  ;;  %3890 = vtanh.f32 %v984_v54 }
 0x184   : > { %1120 = vadd.xlane.f32.xlu0 %v1074_v55  ;;  %v5286_v60 = vpop.f32.mrb[33].mxu0  ;;  %v5288_v61 = vpop.f32.mrb[33].mxu1  ;;  %3892 = vtanh.f32 %v1379_v52 }
 0x185   : > { %v5293_v63 = vpop.f32.mrb[34].mxu0  ;;  %v5295_v4 = vpop.f32.mrb[34].mxu1  ;;  %3894 = vtanh.f32 %v1376_v44 }
 0x186   : > { %v5298_v16 = vpop.f32.mrb[35].mxu0  ;;  %v5300_v31 = vpop.f32.mrb[35].mxu1  ;;  %3896 = vtanh.f32 %v979_v37 }
 0x187   : > { %v3867_v17 = vpop.eup %3866  ;;  %1508 = vadd.xlane.f32.xlu1 %v1461_v62  ;;  %3898 = vtanh.f32 %v976_v45 }
 0x188   : > { %1506 = vadd.xlane.f32.xlu0 %v1460_v9  ;;  %v3869_v3 = vpop.eup %3868  ;;  %v1072_v21 = vmul.f32 %v3867_v17, %v5124_v36  ;;  %3900 = vtanh.f32 %v1371_v56 }
 0x189   : > { %v3871_v22 = vpop.eup %3870  ;;  %v1459_v38 = vmul.f32 %v3869_v3, %v5124_v36 }
 0x18a   : > { %v3873_v46 = vpop.eup %3872  ;;  %v1458_v6 = vmul.f32 %v3871_v22, %v5124_v36 }
 0x18b   : > { %1118 = vadd.xlane.f32.xlu1 %v1073_v20  ;;  %v5308_v25 = vpop.f32.mrb[36].mxu0  ;;  %v5310_v28 = vpop.f32.mrb[36].mxu1  ;;  %v1079_v55 = vmul.f32 %v3873_v46, %v5124_v36 }
 0x18c   : > { %1116 = vadd.xlane.f32.xlu0 %v1072_v21  ;;  %v5314_v14 = vpop.f32.mrb[37].mxu0  ;;  %v5316_v26 = vpop.f32.mrb[37].mxu1 }
 0x18d   : > { %v5321_v41 = vpop.f32.mrb[38].mxu0  ;;  %v5323_v42 = vpop.f32.mrb[38].mxu1 }
 0x18e   : > { %v5326_v49 = vpop.f32.mrb[39].mxu0  ;;  %v5328_v35 = vpop.f32.mrb[39].mxu1 }
 0x18f   : > { %v3875_v51 = vpop.eup %3874  ;;  %1504 = vadd.xlane.f32.xlu1 %v1459_v38 }
 0x190   : > { %1502 = vadd.xlane.f32.xlu0 %v1458_v6  ;;  %v3877_v58 = vpop.eup %3876  ;;  %v1078_v30 = vmul.f32 %v3875_v51, %v5124_v36 }
 0x191   : > { %v3879_v23 = vpop.eup %3878  ;;  %v1465_v19 = vmul.f32 %v3877_v58, %v5124_v36  ;;  %v1368_v58 = vadd.f32 %v5111_v12, %v5204_v48  ;;  %v1003_v48 = vadd.f32 %v5237_v11, %v5111_v12  ;;  %v1395_v11 = vadd.f32 %v5239_v13, %v5111_v12 }
 0x192   : > { %v3881_v3 = vpop.eup %3880  ;;  %v1464_v21 = vmul.f32 %v3879_v23, %v5124_v36 }
 0x193   : > { %1130 = vadd.xlane.f32.xlu1 %v1079_v55  ;;  %v5336_v62 = vpop.f32.mrb[40].mxu0  ;;  %v5338_v2 = vpop.f32.mrb[40].mxu1  ;;  %v1077_v38 = vmul.f32 %v3881_v3, %v5124_v36  ;;  %3902 = vtanh.f32 %v1368_v58 }
 0x194   : > { %1128 = vadd.xlane.f32.xlu0 %v1078_v30  ;;  %v5342_v9 = vpop.f32.mrb[41].mxu0  ;;  %v5344_v17 = vpop.f32.mrb[41].mxu1  ;;  %3904 = vtanh.f32 %v1003_v48 }
 0x195   : > { %v5349_v24 = vpop.f32.mrb[42].mxu0  ;;  %v5351_v20 = vpop.f32.mrb[42].mxu1 }
 0x196   : > { %v5354_v22 = vpop.f32.mrb[43].mxu0  ;;  %v5356_v53 = vpop.f32.mrb[43].mxu1 }
 0x197   : > { %v3883_v34 = vpop.eup %3882  ;;  %1516 = vadd.xlane.f32.xlu1 %v1465_v19 }
 0x198   : > { %1514 = vadd.xlane.f32.xlu0 %v1464_v21  ;;  %v3885_v46 = vpop.eup %3884  ;;  %v1076_v6 = vmul.f32 %v3883_v34, %v5124_v36  ;;  %v1000_v34 = vadd.f32 %v5224_v0, %v5111_v12  ;;  %v1392_v0 = vadd.f32 %v5226_v1, %v5111_v12  ;;  %v992_v1 = vadd.f32 %v5111_v12, %v5230_v7 }
 0x199   : > { %v3887_v51 = vpop.eup %3886  ;;  %v1463_v30 = vmul.f32 %v3885_v46, %v5124_v36 }
 0x19a   : > { %v3889_v44 = vpop.eup %3888  ;;  %v1462_v19 = vmul.f32 %v3887_v51, %v5124_v36  ;;  %3906 = vtanh.f32 %v1000_v34  ;;  %v995_v34 = vadd.f32 %v5111_v12, %v5242_v18  ;;  %v1387_v18 = vadd.f32 %v5111_v12, %v5244_v10 }
 0x19b   : > { %1126 = vadd.xlane.f32.xlu1 %v1077_v38  ;;  %v5364_v27 = vpop.f32.mrb[44].mxu0  ;;  %v5366_v54 = vpop.f32.mrb[44].mxu1  ;;  %v1083_v37 = vmul.f32 %v3889_v44, %v5124_v36  ;;  %3908 = vtanh.f32 %v1395_v11 }
 0x19c   : > { %1124 = vadd.xlane.f32.xlu0 %v1076_v6  ;;  %v5370_v55 = vpop.f32.mrb[45].mxu0  ;;  %v5372_v47 = vpop.f32.mrb[45].mxu1  ;;  %3910 = vtanh.f32 %v1392_v0  ;;  %v1384_v0 = vadd.f32 %v5111_v12, %v5232_v8  ;;  %v1019_v8 = vadd.f32 %v5265_v39, %v5111_v12  ;;  %v1411_v39 = vadd.f32 %v5267_v40, %v5111_v12 }
 0x19d   : > { %v5377_v23 = vpop.f32.mrb[46].mxu0  ;;  %v5379_v52 = vpop.f32.mrb[46].mxu1  ;;  %3912 = vtanh.f32 %v995_v34 }
 0x19e   : > { %v5382_v3 = vpop.f32.mrb[47].mxu0  ;;  %v5384_v57 = vpop.f32.mrb[47].mxu1  ;;  %3914 = vtanh.f32 %v992_v1 }
 0x19f   : > { %v3891_v21 = vpop.eup %3890  ;;  %1512 = vadd.xlane.f32.xlu1 %v1463_v30  ;;  %3916 = vtanh.f32 %v1387_v18 }
 0x1a0   : > { %1510 = vadd.xlane.f32.xlu0 %v1462_v19  ;;  %v3893_v45 = vpop.eup %3892  ;;  %v1082_v38 = vmul.f32 %v3891_v21, %v5124_v36  ;;  %3918 = vtanh.f32 %v1384_v0 }
 0x1a1   : > { %v3895_v46 = vpop.eup %3894  ;;  %v1469_v30 = vmul.f32 %v3893_v45, %v5124_v36  ;;  %3920 = vtanh.f32 %v1019_v8 }
 0x1a2   : > { %v3897_v21 = vpop.eup %3896  ;;  %v1468_v48 = vmul.f32 %v3895_v46, %v5124_v36 }
 0x1a3   : > { %1138 = vadd.xlane.f32.xlu1 %v1083_v37  ;;  %v5392_v6 = vpop.f32.mrb[48].mxu0  ;;  %v5394_v51 = vpop.f32.mrb[48].mxu1  ;;  %v1081_v45 = vmul.f32 %v3897_v21, %v5124_v36 }
 0x1a4   : > { %1136 = vadd.xlane.f32.xlu0 %v1082_v38  ;;  %v5398_v56 = vpop.f32.mrb[49].mxu0  ;;  %v5400_v58 = vpop.f32.mrb[49].mxu1 }
 0x1a5   : > { %7080 = vst [vmem:[#allocation3_spill] sm:$0xff] %v5398_v56  ;;  %7081 = vst [vmem:[#allocation4_spill] sm:$0xff] %v5400_v58  ;;  %v5405_v44 = vpop.f32.mrb[50].mxu0  ;;  %v5407_v19 = vpop.f32.mrb[50].mxu1 }
 0x1a6   : > { %v5410_v37 = vpop.f32.mrb[51].mxu0  ;;  %v5412_v13 = vpop.f32.mrb[51].mxu1 }
 0x1a7   : > { %7082 = vst [vmem:[#allocation5_spill] sm:$0xff] %v5410_v37  ;;  %7083 = vst [vmem:[#allocation6_spill] sm:$0xff] %v5412_v13  ;;  %v3899_v38 = vpop.eup %3898  ;;  %1524 = vadd.xlane.f32.xlu1 %v1469_v30 }
 0x1a8   : > { %1522 = vadd.xlane.f32.xlu0 %v1468_v48  ;;  %v3901_v58 = vpop.eup %3900  ;;  %v1080_v46 = vmul.f32 %v3899_v38, %v5124_v36 }
 0x1a9   : > { %v3903_v56 = vpop.eup %3902  ;;  %v1467_v30 = vmul.f32 %v3901_v58, %v5124_v36  ;;  %v1016_v58 = vadd.f32 %v5252_v29, %v5111_v12  ;;  %v1408_v29 = vadd.f32 %v5254_v32, %v5111_v12  ;;  %v1008_v32 = vadd.f32 %v5111_v12, %v5258_v33 }
 0x1aa   : > { %v3905_v38 = vpop.eup %3904  ;;  %v1466_v34 = vmul.f32 %v3903_v56, %v5124_v36 }
 0x1ab   : > { %1134 = vadd.xlane.f32.xlu1 %v1081_v45  ;;  %v5420_v37 = vpop.f32.mrb[52].mxu0  ;;  %v5422_v13 = vpop.f32.mrb[52].mxu1  ;;  %v1087_v1 = vmul.f32 %v3905_v38, %v5124_v36  ;;  %3922 = vtanh.f32 %v1016_v58  ;;  %v1011_v58 = vadd.f32 %v5111_v12, %v5270_v43  ;;  %v1403_v43 = vadd.f32 %v5111_v12, %v5272_v15 }
 0x1ac   : > { %1132 = vadd.xlane.f32.xlu0 %v1080_v46  ;;  %v5426_v11 = vpop.f32.mrb[53].mxu0  ;;  %v5428_v7 = vpop.f32.mrb[53].mxu1  ;;  %3924 = vtanh.f32 %v1411_v39 }
 0x1ad   : > { %7084 = vst [vmem:[#allocation7_spill] sm:$0xff] %v5426_v11  ;;  %7085 = vst [vmem:[#allocation8_spill] sm:$0xff] %v5428_v7  ;;  %v5433_v21 = vpop.f32.mrb[54].mxu0  ;;  %v5435_v48 = vpop.f32.mrb[54].mxu1  ;;  %3926 = vtanh.f32 %v1408_v29  ;;  %v1400_v29 = vadd.f32 %v5111_v12, %v5260_v5  ;;  %v1685_v5 = vadd.f32 %v5293_v63, %v5111_v12  ;;  %v2068_v63 = vadd.f32 %v5282_v59, %v5111_v12 }
 0x1ae   : > { %v5438_v45 = vpop.f32.mrb[55].mxu0  ;;  %v5440_v10 = vpop.f32.mrb[55].mxu1  ;;  %3928 = vtanh.f32 %v1011_v58 }
 0x1af   : > { %7086 = vst [vmem:[#allocation9_spill] sm:$0xff] %v5438_v45  ;;  %7087 = vst [vmem:[#allocation10_spill] sm:$0xff] %v5440_v10  ;;  %v3907_v46 = vpop.eup %3906  ;;  %1520 = vadd.xlane.f32.xlu1 %v1467_v30  ;;  %3930 = vtanh.f32 %v1008_v32 }
 0x1b0   : > { %1518 = vadd.xlane.f32.xlu0 %v1466_v34  ;;  %v3909_v7 = vpop.eup %3908  ;;  %v1086_v56 = vmul.f32 %v3907_v46, %v5124_v36  ;;  %3932 = vtanh.f32 %v1403_v43  ;;  %v2071_v43 = vadd.f32 %v5295_v4, %v5111_v12 }
 0x1b1   : > { %v3911_v11 = vpop.eup %3910  ;;  %v1473_v30 = vmul.f32 %v3909_v7, %v5124_v36  ;;  %3934 = vtanh.f32 %v1400_v29 }
 0x1b2   : > { %v3913_v46 = vpop.eup %3912  ;;  %v1472_v8 = vmul.f32 %v3911_v11, %v5124_v36  ;;  %3936 = vtanh.f32 %v1685_v5 }
 0x1b3   : > { %1146 = vadd.xlane.f32.xlu1 %v1087_v1  ;;  %v5448_v45 = vpop.f32.mrb[56].mxu0  ;;  %v5450_v10 = vpop.f32.mrb[56].mxu1  ;;  %v1085_v7 = vmul.f32 %v3913_v46, %v5124_v36 }
 0x1b4   : > { %1144 = vadd.xlane.f32.xlu0 %v1086_v56  ;;  %v5454_v18 = vpop.f32.mrb[57].mxu0  ;;  %v5456_v0 = vpop.f32.mrb[57].mxu1 }
 0x1b5   : > { %7088 = vst [vmem:[#allocation11_spill] sm:$0xff] %v5454_v18  ;;  %7089 = vst [vmem:[#allocation12_spill] sm:$0xff] %v5456_v0  ;;  %v5461_v38 = vpop.f32.mrb[58].mxu0  ;;  %v5463_v34 = vpop.f32.mrb[58].mxu1 }
 0x1b6   : > { %v5466_v1 = vpop.f32.mrb[59].mxu0  ;;  %v5468_v40 = vpop.f32.mrb[59].mxu1 }
 0x1b7   : > { %7090 = vst [vmem:[#allocation13_spill] sm:$0xff] %v5466_v1  ;;  %7091 = vst [vmem:[#allocation14_spill] sm:$0xff] %v5468_v40  ;;  %v3915_v56 = vpop.eup %3914  ;;  %1532 = vadd.xlane.f32.xlu1 %v1473_v30 }
 0x1b8   : > { %1530 = vadd.xlane.f32.xlu0 %v1472_v8  ;;  %v3917_v0 = vpop.eup %3916  ;;  %v1084_v11 = vmul.f32 %v3915_v56, %v5124_v36 }
 0x1b9   : > { %v3919_v18 = vpop.eup %3918  ;;  %v1471_v30 = vmul.f32 %v3917_v0, %v5124_v36  ;;  %v1682_v0 = vadd.f32 %v5280_v50, %v5111_v12 }
 0x1ba   : > { %v3921_v56 = vpop.eup %3920  ;;  %v1470_v58 = vmul.f32 %v3919_v18, %v5124_v36 }
 0x1bb   : > { %1142 = vadd.xlane.f32.xlu1 %v1085_v7  ;;  %v5476_v1 = vpop.f32.mrb[60].mxu0  ;;  %v5478_v40 = vpop.f32.mrb[60].mxu1  ;;  %v1091_v32 = vmul.f32 %v3921_v56, %v5124_v36  ;;  %3938 = vtanh.f32 %v1682_v0 }
 0x1bc   : > { %7092 = vst [vmem:[#allocation15_spill] sm:$0xff] %v5478_v40  ;;  %1140 = vadd.xlane.f32.xlu0 %v1084_v11  ;;  %v5482_v39 = vpop.f32.mrb[61].mxu0  ;;  %v5484_v33 = vpop.f32.mrb[61].mxu1  ;;  %3940 = vtanh.f32 %v2071_v43  ;;  %v1701_v43 = vadd.f32 %v5321_v41, %v5111_v12  ;;  %v2084_v41 = vadd.f32 %v5310_v28, %v5111_v12 }
 0x1bd   : > { %v5489_v46 = vpop.f32.mrb[62].mxu0  ;;  %v5491_v8 = vpop.f32.mrb[62].mxu1  ;;  %3942 = vtanh.f32 %v2068_v63 }
 0x1be   : > { %7093 = vst [vmem:[#allocation16_spill] sm:$0xff] %v5491_v8  ;;  %v5494_v7 = vpop.f32.mrb[63].mxu0  ;;  %v5496_v15 = vpop.f32.mrb[63].mxu1 }
 0x1bf   : > { %v3923_v11 = vpop.eup %3922  ;;  %1528 = vadd.xlane.f32.xlu1 %v1471_v30 }
 0x1c0   : > { %1526 = vadd.xlane.f32.xlu0 %v1470_v58  ;;  %v3925_v40 = vpop.eup %3924  ;;  %v1090_v18 = vmul.f32 %v3923_v11, %v5124_v36  ;;  %v1677_v58 = vadd.f32 %v5111_v12, %v5298_v16  ;;  %v1674_v11 = vadd.f32 %v5111_v12, %v5286_v60  ;;  %v2060_v16 = vadd.f32 %v5111_v12, %v5288_v61 }
 0x1c1   : > { %v3927_v8 = vpop.eup %3926  ;;  %v1477_v29 = vmul.f32 %v3925_v40, %v5124_v36 }
 0x1c2   : > { %v3929_v30 = vpop.eup %3928  ;;  %v1476_v50 = vmul.f32 %v3927_v8, %v5124_v36  ;;  %3944 = vtanh.f32 %v1677_v58  ;;  %v2063_v8 = vadd.f32 %v5111_v12, %v5300_v31  ;;  %v1698_v31 = vadd.f32 %v5308_v25, %v5111_v12 }
 0x1c3   : > { %1154 = vadd.xlane.f32.xlu1 %v1091_v32  ;;  %v3931_v56 = vpop.eup %3930  ;;  %v1089_v4 = vmul.f32 %v3929_v30, %v5124_v36  ;;  %3946 = vtanh.f32 %v1674_v11 }
 0x1c4   : > { %1152 = vadd.xlane.f32.xlu0 %v1090_v18  ;;  %v3933_v5 = vpop.eup %3932  ;;  %v1088_v59 = vmul.f32 %v3931_v56, %v5124_v36  ;;  %3948 = vtanh.f32 %v2063_v8  ;;  %v2079_v8 = vadd.f32 %v5111_v12, %v5328_v35  ;;  %v1714_v35 = vadd.f32 %v5336_v62, %v5111_v12 }
 0x1c5   : > { %v3935_v40 = vpop.eup %3934  ;;  %v1475_v0 = vmul.f32 %v3933_v5, %v5124_v36  ;;  %3950 = vtanh.f32 %v2060_v16  ;;  %v1690_v5 = vadd.f32 %v5111_v12, %v5314_v14 }
 0x1c6   : > { %v3937_v60 = vpop.eup %3936  ;;  %v1474_v32 = vmul.f32 %v3935_v40, %v5124_v36  ;;  %3952 = vtanh.f32 %v1701_v43 }
 0x1c7   : > { %1540 = vadd.xlane.f32.xlu1 %v1477_v29  ;;  %v3939_v18 = vpop.eup %3938  ;;  %v1835_v63 = vmul.f32 %v3937_v60, %v5124_v36  ;;  %3954 = vtanh.f32 %v1698_v31 }
 0x1c8   : > { %1538 = vadd.xlane.f32.xlu0 %v1476_v50  ;;  %v3941_v29 = vpop.eup %3940  ;;  %v1834_v61 = vmul.f32 %v3939_v18, %v5124_v36  ;;  %v2087_v50 = vadd.f32 %v5323_v42, %v5111_v12  ;;  %v1717_v18 = vadd.f32 %v5349_v24, %v5111_v12 }
 0x1c9   : > { %v3943_v30 = vpop.eup %3942  ;;  %v2221_v56 = vmul.f32 %v3941_v29, %v5124_v36 }
 0x1ca   : > { %v2220_v25 = vmul.f32 %v3943_v30, %v5124_v36  ;;  %3956 = vtanh.f32 %v2087_v50 }
 0x1cb   : > { %1150 = vadd.xlane.f32.xlu1 %v1089_v4  ;;  %v1693_v4 = vadd.f32 %v5111_v12, %v5326_v49  ;;  %3958 = vtanh.f32 %v2084_v41  ;;  %v2076_v49 = vadd.f32 %v5111_v12, %v5316_v26 }
 0x1cc   : > { %1148 = vadd.xlane.f32.xlu0 %v1088_v59  ;;  %v3945_v58 = vpop.eup %3944 }
 0x1cd   : > { %v3947_v11 = vpop.eup %3946  ;;  %v1833_v42 = vmul.f32 %v3945_v58, %v5124_v36  ;;  %3960 = vtanh.f32 %v1693_v4 }
 0x1ce   : > { %v3949_v59 = vpop.eup %3948  ;;  %v1832_v28 = vmul.f32 %v3947_v11, %v5124_v36  ;;  %3962 = vtanh.f32 %v1690_v5 }
 0x1cf   : > { %1536 = vadd.xlane.f32.xlu1 %v1475_v0  ;;  %v3951_v40 = vpop.eup %3950  ;;  %v2219_v16 = vmul.f32 %v3949_v59, %v5124_v36  ;;  %3964 = vtanh.f32 %v2079_v8  ;;  %v5592_v8 = vld [vmem:[%s7026_s3] ss:$0 sm:$0xff] }
 0x1d0   : > { %1534 = vadd.xlane.f32.xlu0 %v1474_v32  ;;  %v3953_v14 = vpop.eup %3952  ;;  %v2218_v0 = vmul.f32 %v3951_v40, %v5124_v36  ;;  %3966 = vtanh.f32 %v2076_v49 }
 0x1d1   : > { %v3955_v60 = vpop.eup %3954  ;;  %v1839_v26 = vmul.f32 %v3953_v14, %v5124_v36  ;;  %3968 = vtanh.f32 %v1717_v18 }
 0x1d2   : > { %3970 = vtanh.f32 %v1714_v35 }
 0x1d3   : > { %1870 = vadd.xlane.f32.xlu1 %v1835_v63  ;;  %v1838_v63 = vmul.f32 %v3955_v60, %v5124_v36 }
 0x1d4   : > { %1868 = vadd.xlane.f32.xlu0 %v1834_v61  ;;  %v3957_v31 = vpop.eup %3956  ;;  %v5559_v61 = vld [vmem:[%s7025_s2] ss:$0 sm:$0xff] }
 0x1d5   : > { %v3959_v29 = vpop.eup %3958  ;;  %v2103_v24 = vadd.f32 %v5559_v61, %v5351_v20  ;;  %v2100_v62 = vadd.f32 %v5559_v61, %v5338_v2  ;;  %v2225_v50 = vmul.f32 %v3957_v31, %v5124_v36  ;;  %v1706_v11 = vadd.f32 %v5559_v61, %v5342_v9 }
 0x1d6   : > { %v2092_v9 = vadd.f32 %v5559_v61, %v5344_v17  ;;  %v1733_v17 = vadd.f32 %v5559_v61, %v5377_v23 }
 0x1d7   : > { %2256 = vadd.xlane.f32.xlu1 %v2221_v56  ;;  %v3961_v41 = vpop.eup %3960  ;;  %v2224_v56 = vmul.f32 %v3959_v29, %v5124_v36  ;;  %3972 = vtanh.f32 %v2103_v24 }
 0x1d8   : > { %2254 = vadd.xlane.f32.xlu0 %v2220_v25  ;;  %v3963_v58 = vpop.eup %3962  ;;  %v1709_v25 = vadd.f32 %v5559_v61, %v5354_v22  ;;  %3974 = vtanh.f32 %v2100_v62  ;;  %v1837_v4 = vmul.f32 %v3961_v41, %v5124_v36  ;;  %v2095_v22 = vadd.f32 %v5559_v61, %v5356_v53 }
 0x1d9   : > { %v3965_v5 = vpop.eup %3964 }
 0x1da   : > { %v3967_v59 = vpop.eup %3966  ;;  %3976 = vtanh.f32 %v1709_v25 }
 0x1db   : > { %1866 = vadd.xlane.f32.xlu1 %v1833_v42  ;;  %v1836_v42 = vmul.f32 %v3963_v58, %v5124_v36  ;;  %3978 = vtanh.f32 %v1706_v11  ;;  %v2223_v36 = vmul.f32 %v5592_v8, %v3965_v5  ;;  %v3969_v49 = vpop.eup %3968  ;;  %v1722_v58 = vadd.f32 %v5559_v61, %v5370_v55 }
 0x1dc   : > { %1864 = vadd.xlane.f32.xlu0 %v1832_v28  ;;  %v3971_v53 = vpop.eup %3970  ;;  %3980 = vtanh.f32 %v2095_v22  ;;  %v1843_v18 = vmul.f32 %v5592_v8, %v3969_v49  ;;  %v2108_v55 = vadd.f32 %v5559_v61, %v5372_v47  ;;  %v1746_v47 = vadd.f32 %v5559_v61, %v5392_v6 }
 0x1dd   : > { %3982 = vtanh.f32 %v2092_v9  ;;  %v2132_v6 = vadd.f32 %v5559_v61, %v5394_v51 }
 0x1de   : > { %3984 = vtanh.f32 %v1733_v17 }
 0x1df   : > { %2252 = vadd.xlane.f32.xlu1 %v2219_v16  ;;  %v2222_v16 = vmul.f32 %v5592_v8, %v3967_v59 }
 0x1e0   : > { %2250 = vadd.xlane.f32.xlu0 %v2218_v0  ;;  %v5546_v32 = vpop.xlane.xlu1 %1096  ;;  %v1730_v0 = vadd.f32 %v5559_v61, %v5364_v27  ;;  %v2116_v27 = vadd.f32 %v5559_v61, %v5366_v54 }
 0x1e1   : > { %v5552_v43 = vpop.xlane.xlu0 %1482  ;;  %v3973_v35 = vpop.eup %3972 }
 0x1e2   : > { %v3975_v31 = vpop.eup %3974  ;;  %3986 = vtanh.f32 %v1730_v0  ;;  %v2229_v24 = vmul.f32 %v5592_v8, %v3973_v35 }
 0x1e3   : > { %1878 = vadd.xlane.f32.xlu1 %v1839_v26  ;;  %v1842_v26 = vmul.f32 %v5592_v8, %v3971_v53 }
 0x1e4   : > { %1876 = vadd.xlane.f32.xlu0 %v1838_v63  ;;  %v5563_v12 = vpop.xlane.xlu1 %1098  ;;  %v2119_v63 = vadd.f32 %v5559_v61, %v5379_v52  ;;  %v3977_v62 = vpop.eup %3976 }
 0x1e5   : > { %v5567_v30 = vpop.xlane.xlu0 %1092  ;;  %v3979_v41 = vpop.eup %3978  ;;  %v1841_v25 = vmul.f32 %v5592_v8, %v3977_v62 }
 0x1e6   : > { %3988 = vtanh.f32 %v2119_v63  ;;  %v3981_v11 = vpop.eup %3980 }
 0x1e7   : > { %2264 = vadd.xlane.f32.xlu1 %v2225_v50  ;;  %v2228_v50 = vmul.f32 %v5592_v8, %v3975_v31  ;;  %3990 = vtanh.f32 %v2116_v27  ;;  %v3983_v5 = vpop.eup %3982  ;;  %v2227_v22 = vmul.f32 %v5592_v8, %v3981_v11 }
 0x1e8   : > { %2262 = vadd.xlane.f32.xlu0 %v2224_v56  ;;  %v5573_v20 = vpop.xlane.xlu1 %1484  ;;  %v1725_v56 = vadd.f32 %v5559_v61, %v5382_v3  ;;  %v2111_v3 = vadd.f32 %v5559_v61, %v5384_v57  ;;  %v3985_v9 = vpop.eup %3984  ;;  %v1749_v57 = vadd.f32 %v5559_v61, %v5405_v44  ;;  %v2135_v44 = vadd.f32 %v5559_v61, %v5407_v19 }
 0x1e9   : > { %v5577_v2 = vpop.xlane.xlu0 %1478  ;;  %v1847_v17 = vmul.f32 %v5592_v8, %v3985_v9  ;;  %v7099_v9 = vld [vmem:[#allocation4_spill] sm:$0xff] }
 0x1ea   : > { %3992 = vtanh.f32 %v1725_v56  ;;  %v7097_v56 = vld [vmem:[#allocation3_spill] sm:$0xff] }
 0x1eb   : > { %1874 = vadd.xlane.f32.xlu1 %v1837_v4  ;;  %v1840_v4 = vmul.f32 %v5592_v8, %v3979_v41  ;;  %3994 = vtanh.f32 %v1722_v58  ;;  %v1738_v58 = vadd.f32 %v5559_v61, %v7097_v56 }
 0x1ec   : > { %1872 = vadd.xlane.f32.xlu0 %v1836_v42  ;;  %v5583_v28 = vpop.xlane.xlu1 %1480  ;;  %v3987_v49 = vpop.eup %3986  ;;  %3996 = vtanh.f32 %v2111_v3  ;;  %v7098_v3 = vld [vmem:[#allocation6_spill] sm:$0xff] }
 0x1ed   : > { %v5587_v40 = vpop.xlane.xlu0 %1094  ;;  %3998 = vtanh.f32 %v2108_v55  ;;  %v2127_v55 = vadd.f32 %v5559_v61, %v7098_v3  ;;  %v7103_v3 = vld [vmem:[#allocation7_spill] sm:$0xff] }
 0x1ee   : > { %4000 = vtanh.f32 %v1749_v57 }
 0x1ef   : > { %2260 = vadd.xlane.f32.xlu1 %v2223_v36  ;;  %v2226_v36 = vmul.f32 %v5592_v8, %v3983_v5  ;;  %4002 = vtanh.f32 %v1746_v47 }
 0x1f0   : > { %2258 = vadd.xlane.f32.xlu0 %v2222_v16  ;;  %v5596_v14 = vpop.xlane.xlu1 %1106  ;;  %v3989_v0 = vpop.eup %3988  ;;  %4004 = vtanh.f32 %v2135_v44  ;;  %v1762_v44 = vadd.f32 %v5559_v61, %v5420_v37  ;;  %v2148_v37 = vadd.f32 %v5559_v61, %v5422_v13 }
 0x1f1   : > { %v5602_v60 = vpop.xlane.xlu0 %1104  ;;  %v3991_v35 = vpop.eup %3990  ;;  %v2233_v63 = vmul.f32 %v5592_v8, %v3989_v0  ;;  %4006 = vtanh.f32 %v2132_v6 }
 0x1f3   : > { %1886 = vadd.xlane.f32.xlu1 %v1843_v18  ;;  %v1846_v18 = vmul.f32 %v5592_v8, %v3987_v49 }
 0x1f4   : > { %1884 = vadd.xlane.f32.xlu0 %v1842_v26  ;;  %v5608_v29 = vpop.xlane.xlu1 %1492  ;;  %v3993_v27 = vpop.eup %3992 }
 0x1f5   : > { %v5612_v23 = vpop.xlane.xlu0 %1490  ;;  %v3995_v62 = vpop.eup %3994 }
 0x1f6   : > { %7094 = vst [vmem:[#allocation17_spill] sm:$0xff] %v5612_v23  ;;  %v3997_v11 = vpop.eup %3996 }
 0x1f7   : > { %2272 = vadd.xlane.f32.xlu1 %v2229_v24  ;;  %v2232_v24 = vmul.f32 %v5592_v8, %v3991_v35  ;;  %v3999_v5 = vpop.eup %3998  ;;  %v2231_v57 = vmul.f32 %v5592_v8, %v3997_v11 }
 0x1f8   : > { %2270 = vadd.xlane.f32.xlu0 %v2228_v50  ;;  %v5618_v52 = vpop.xlane.xlu1 %1102  ;;  %v7096_v50 = vld [vmem:[#allocation5_spill] sm:$0xff]  ;;  %v4001_v47 = vpop.eup %4000 }
 0x1f9   : > { %v5622_v54 = vpop.xlane.xlu0 %1100  ;;  %v1741_v41 = vadd.f32 %v5559_v61, %v7096_v50  ;;  %v4003_v0 = vpop.eup %4002 }
 0x1fb   : > { %1882 = vadd.xlane.f32.xlu1 %v1841_v25  ;;  %v1845_v25 = vmul.f32 %v5592_v8, %v3993_v27  ;;  %4008 = vtanh.f32 %v1741_v41  ;;  %v4005_v27 = vpop.eup %4004 }
 0x1fc   : > { %1880 = vadd.xlane.f32.xlu0 %v1840_v4  ;;  %v5628_v42 = vpop.xlane.xlu1 %1488  ;;  %v1844_v4 = vmul.f32 %v5592_v8, %v3995_v62  ;;  %4010 = vtanh.f32 %v1738_v58  ;;  %v4007_v62 = vpop.eup %4006  ;;  %v2237_v56 = vmul.f32 %v5592_v8, %v4005_v27 }
 0x1fd   : > { %v5632_v59 = vpop.xlane.xlu0 %1486  ;;  %4012 = vtanh.f32 %v2127_v55  ;;  %v1754_v55 = vadd.f32 %v5559_v61, %v7103_v3 }
 0x1ff   : > { %2268 = vadd.xlane.f32.xlu1 %v2227_v22 }
 0x200   : > { %2266 = vadd.xlane.f32.xlu0 %v2226_v36  ;;  %v5638_v16 = vpop.xlane.xlu1 %1114  ;;  %v2124_v36 = vadd.f32 %v5559_v61, %v7099_v9 }
 0x201   : > { %v5642_v53 = vpop.xlane.xlu0 %1112 }
 0x202   : > { %4014 = vtanh.f32 %v2124_v36 }
 0x203   : > { %1894 = vadd.xlane.f32.xlu1 %v1847_v17  ;;  %v2230_v17 = vmul.f32 %v5592_v8, %v3999_v5 }
 0x204   : > { %1892 = vadd.xlane.f32.xlu0 %v1846_v18  ;;  %v5648_v26 = vpop.xlane.xlu1 %1500  ;;  %v1765_v18 = vadd.f32 %v5559_v61, %v5433_v21  ;;  %v2151_v21 = vadd.f32 %v5559_v61, %v5435_v48 }
 0x205   : > { %7095 = vst [vmem:[#allocation18_spill] sm:$0xff] %v5648_v26  ;;  %v5652_v31 = vpop.xlane.xlu0 %1498  ;;  %v4009_v58 = vpop.eup %4008 }
 0x206   : > { %4016 = vtanh.f32 %v1765_v18  ;;  %v4011_v11 = vpop.eup %4010  ;;  %v1849_v9 = vmul.f32 %v5592_v8, %v4009_v58 }
 0x207   : > { %2280 = vadd.xlane.f32.xlu1 %v2233_v63  ;;  %v1851_v63 = vmul.f32 %v5592_v8, %v4001_v47  ;;  %4018 = vtanh.f32 %v1762_v44  ;;  %v4013_v36 = vpop.eup %4012  ;;  %v7105_v44 = vld [vmem:[#allocation8_spill] sm:$0xff] }
 0x208   : > { %2278 = vadd.xlane.f32.xlu0 %v2232_v24  ;;  %v5658_v19 = vpop.xlane.xlu1 %1110  ;;  %v1850_v24 = vmul.f32 %v5592_v8, %v4003_v0  ;;  %4020 = vtanh.f32 %v2151_v21 }
 0x209   : > { %v5662_v51 = vpop.xlane.xlu0 %1108  ;;  %4022 = vtanh.f32 %v2148_v37 }
 0x20b   : > { %1890 = vadd.xlane.f32.xlu1 %v1845_v25  ;;  %v2236_v25 = vmul.f32 %v5592_v8, %v4007_v62 }
 0x20c   : > { %1888 = vadd.xlane.f32.xlu0 %v1844_v4  ;;  %v5668_v22 = vpop.xlane.xlu1 %1496  ;;  %v7102_v4 = vld [vmem:[#allocation9_spill] sm:$0xff]  ;;  %v4015_v47 = vpop.eup %4014 }
 0x20d   : > { %v5672_v49 = vpop.xlane.xlu0 %1494  ;;  %v1757_v5 = vadd.f32 %v5559_v61, %v7102_v4  ;;  %v2234_v21 = vmul.f32 %v5592_v8, %v4015_v47 }
 0x20f   : > { %2276 = vadd.xlane.f32.xlu1 %v2231_v57  ;;  %v1848_v57 = vmul.f32 %v5592_v8, %v4011_v11  ;;  %4024 = vtanh.f32 %v1757_v5 }
 0x210   : > { %2274 = vadd.xlane.f32.xlu0 %v2230_v17  ;;  %v5678_v35 = vpop.xlane.xlu1 %1122  ;;  %v7104_v17 = vld [vmem:[#allocation10_spill] sm:$0xff]  ;;  %4026 = vtanh.f32 %v1754_v55  ;;  %v4017_v62 = vpop.eup %4016 }
 0x211   : > { %v5682_v6 = vpop.xlane.xlu0 %1120  ;;  %v2143_v0 = vadd.f32 %v5559_v61, %v7104_v17  ;;  %v4019_v37 = vpop.eup %4018  ;;  %v1855_v4 = vmul.f32 %v5592_v8, %v4017_v62 }
 0x212   : > { %v4021_v5 = vpop.eup %4020  ;;  %v1854_v3 = vmul.f32 %v5592_v8, %v4019_v37 }
 0x213   : > { %1902 = vadd.xlane.f32.xlu1 %v1851_v63  ;;  %v2140_v63 = vadd.f32 %v5559_v61, %v7105_v44  ;;  %4028 = vtanh.f32 %v2143_v0  ;;  %v4023_v55 = vpop.eup %4022  ;;  %v7109_v44 = vld [vmem:[#allocation13_spill] sm:$0xff] }
 0x214   : > { %1900 = vadd.xlane.f32.xlu0 %v1850_v24  ;;  %v5688_v50 = vpop.xlane.xlu1 %1508  ;;  %v2235_v24 = vmul.f32 %v5592_v8, %v4013_v36  ;;  %v2240_v17 = vmul.f32 %v5592_v8, %v4023_v55  ;;  %v7113_v55 = vld [vmem:[#allocation12_spill] sm:$0xff] }
 0x215   : > { %7100 = vst [vmem:[#allocation5_spill] sm:$0xff] %v5688_v50  ;;  %v5692_v41 = vpop.xlane.xlu0 %1506  ;;  %4030 = vtanh.f32 %v2140_v63  ;;  %v1773_v63 = vadd.f32 %v5559_v61, %v7109_v44  ;;  %v1797_v44 = vadd.f32 %v5559_v61, %v5489_v46 }
 0x216   : > { %7101 = vst [vmem:[#allocation3_spill] sm:$0xff] %v5692_v41 }
 0x217   : > { %2288 = vadd.xlane.f32.xlu1 %v2237_v56  ;;  %v1781_v56 = vadd.f32 %v5559_v61, %v5461_v38  ;;  %v2167_v38 = vadd.f32 %v5559_v61, %v5463_v34 }
 0x218   : > { %2286 = vadd.xlane.f32.xlu0 %v2236_v25  ;;  %v5698_v48 = vpop.xlane.xlu1 %1118  ;;  %v1778_v25 = vadd.f32 %v5559_v61, %v5448_v45  ;;  %v2164_v45 = vadd.f32 %v5559_v61, %v5450_v10 }
 0x219   : > { %v5702_v13 = vpop.xlane.xlu0 %1116  ;;  %4032 = vtanh.f32 %v1781_v56  ;;  %v4025_v47 = vpop.eup %4024 }
 0x21a   : > { %4034 = vtanh.f32 %v1778_v25  ;;  %v4027_v0 = vpop.eup %4026 }
 0x21b   : > { %1898 = vadd.xlane.f32.xlu1 %v1849_v9  ;;  %4036 = vtanh.f32 %v2167_v38  ;;  %v1852_v56 = vmul.f32 %v5592_v8, %v4027_v0  ;;  %v2156_v38 = vadd.f32 %v5559_v61, %v7113_v55 }
 0x21c   : > { %1896 = vadd.xlane.f32.xlu0 %v1848_v57  ;;  %v5708_v18 = vpop.xlane.xlu1 %1504  ;;  %v2241_v57 = vmul.f32 %v5592_v8, %v4021_v5  ;;  %4038 = vtanh.f32 %v2164_v45 }
 0x21d   : > { %v5712_v27 = vpop.xlane.xlu0 %1502  ;;  %v4029_v37 = vpop.eup %4028  ;;  %4040 = vtanh.f32 %v1773_v63 }
 0x21f   : > { %2284 = vadd.xlane.f32.xlu1 %v2235_v24  ;;  %v7110_v24 = vld [vmem:[#allocation11_spill] sm:$0xff]  ;;  %v4031_v25 = vpop.eup %4030 }
 0x220   : > { %2282 = vadd.xlane.f32.xlu0 %v2234_v21  ;;  %v5718_v58 = vpop.xlane.xlu1 %1130  ;;  %v1770_v62 = vadd.f32 %v5559_v61, %v7110_v24  ;;  %v1853_v21 = vmul.f32 %v5592_v8, %v4025_v47  ;;  %v1794_v24 = vadd.f32 %v5559_v61, %v5476_v1  ;;  %v1786_v1 = vadd.f32 %v5559_v61, %v5482_v39 }
 0x221   : > { %7106 = vst [vmem:[#allocation6_spill] sm:$0xff] %v5718_v58  ;;  %v5722_v11 = vpop.xlane.xlu0 %1128  ;;  %v2172_v39 = vadd.f32 %v5559_v61, %v5484_v33 }
 0x222   : > { %4042 = vtanh.f32 %v1770_v62 }
 0x223   : > { %1910 = vadd.xlane.f32.xlu1 %v1855_v4  ;;  %v7112_v4 = vld [vmem:[#allocation14_spill] sm:$0xff]  ;;  %v4033_v47 = vpop.eup %4032 }
 0x224   : > { %1908 = vadd.xlane.f32.xlu0 %v1854_v3  ;;  %v5728_v9 = vpop.xlane.xlu1 %1516  ;;  %v2159_v5 = vadd.f32 %v5559_v61, %v7112_v4  ;;  %v4035_v0 = vpop.eup %4034  ;;  %v1789_v4 = vadd.f32 %v5559_v61, %v5494_v7  ;;  %v2175_v7 = vadd.f32 %v5559_v61, %v5496_v15 }
 0x225   : > { %7107 = vst [vmem:[#allocation4_spill] sm:$0xff] %v5728_v9  ;;  %v5732_v36 = vpop.xlane.xlu0 %1514 }
 0x226   : > { %7108 = vst [vmem:[#allocation9_spill] sm:$0xff] %v5732_v36  ;;  %4044 = vtanh.f32 %v2159_v5 }
 0x227   : > { %2296 = vadd.xlane.f32.xlu1 %v2241_v57  ;;  %v2239_v57 = vmul.f32 %v5592_v8, %v4029_v37  ;;  %4046 = vtanh.f32 %v2156_v38  ;;  %v4037_v37 = vpop.eup %4036 }
 0x228   : > { %2294 = vadd.xlane.f32.xlu0 %v2240_v17  ;;  %v5738_v34 = vpop.xlane.xlu1 %1126  ;;  %v2238_v17 = vmul.f32 %v5592_v8, %v4031_v25  ;;  %v4039_v25 = vpop.eup %4038  ;;  %4048 = vtanh.f32 %v1797_v44  ;;  %v2245_v55 = vmul.f32 %v5592_v8, %v4037_v37 }
 0x229   : > { %v5742_v10 = vpop.xlane.xlu0 %1124  ;;  %4050 = vtanh.f32 %v1794_v24  ;;  %v4041_v38 = vpop.eup %4040 }
 0x22a   : > { %7111 = vst [vmem:[#allocation7_spill] sm:$0xff] %v5742_v10  ;;  %4052 = vtanh.f32 %v1789_v4  ;;  %v1857_v44 = vmul.f32 %v5592_v8, %v4041_v38  ;;  %v7123_v4 = vld [vmem:[#allocation15_spill] sm:$0xff] }
 0x22b   : > { %1906 = vadd.xlane.f32.xlu1 %v1853_v21  ;;  %v1859_v21 = vmul.f32 %v5592_v8, %v4033_v47  ;;  %4054 = vtanh.f32 %v1786_v1  ;;  %v2180_v1 = vadd.f32 %v5559_v61, %v7123_v4 }
 0x22c   : > { %1904 = vadd.xlane.f32.xlu0 %v1852_v56  ;;  %v5748_v3 = vpop.xlane.xlu1 %1512  ;;  %v1858_v56 = vmul.f32 %v5592_v8, %v4035_v0  ;;  %v4043_v47 = vpop.eup %4042  ;;  %4056 = vtanh.f32 %v2175_v7 }
 0x22d   : > { %v5752_v45 = vpop.xlane.xlu0 %1510  ;;  %4058 = vtanh.f32 %v2172_v39 }
 0x22e   : > { %7114 = vst [vmem:[#allocation10_spill] sm:$0xff] %v5752_v45 }
 0x22f   : > { %2292 = vadd.xlane.f32.xlu1 %v2239_v57  ;;  %v2244_v57 = vmul.f32 %v5592_v8, %v4039_v25 }
 0x230   : > { %2290 = vadd.xlane.f32.xlu0 %v2238_v17  ;;  %v5758_v63 = vpop.xlane.xlu1 %1138  ;;  %v4045_v24 = vpop.eup %4044 }
 0x231   : > { %7115 = vst [vmem:[#allocation8_spill] sm:$0xff] %v5758_v63  ;;  %v5762_v62 = vpop.xlane.xlu0 %1136  ;;  %v4047_v37 = vpop.eup %4046  ;;  %v4388_v63 = vld [vmem:[%s4880_s24 + $0x218] sm:$0xff] }
 0x232   : > { %7116 = vst [vmem:[#allocation13_spill] sm:$0xff] %v5762_v62  ;;  %v4049_v38 = vpop.eup %4048  ;;  %v4386_v62 = vld [vmem:[%s4880_s24 + $0x18] sm:$0xff] }
 0x233   : > { %1918 = vadd.xlane.f32.xlu1 %v1859_v21  ;;  %v1856_v21 = vmul.f32 %v5592_v8, %v4043_v47  ;;  %v4051_v47 = vpop.eup %4050 }
 0x234   : > { %1916 = vadd.xlane.f32.xlu0 %v1858_v56  ;;  %v5768_v46 = vpop.xlane.xlu1 %1524  ;;  %v7121_v56 = vld [vmem:[#allocation16_spill] sm:$0xff]  ;;  %v1862_v39 = vmul.f32 %v5592_v8, %v4051_v47 }
 0x235   : > { %7117 = vst [vmem:[#allocation11_spill] sm:$0xff] %v5768_v46  ;;  %v5772_v5 = vpop.xlane.xlu0 %1522  ;;  %v2183_v25 = vadd.f32 %v5559_v61, %v7121_v56  ;;  %v4053_v61 = vpop.eup %4052  ;;  %v4387_v46 = vld [vmem:[%s4880_s24 + $0x118] sm:$0xff] }
 0x236   : > { %7118 = vst [vmem:[#allocation14_spill] sm:$0xff] %v5772_v5  ;;  %v4055_v56 = vpop.eup %4054 }
 0x237   : > { %2304 = vadd.xlane.f32.xlu1 %v2245_v55  ;;  %v2243_v55 = vmul.f32 %v5592_v8, %v4045_v24  ;;  %4060 = vtanh.f32 %v2183_v25  ;;  %v1861_v25 = vmul.f32 %v5592_v8, %v4053_v61  ;;  %v4057_v4 = vpop.eup %4056 }
 0x238   : > { %2302 = vadd.xlane.f32.xlu0 %v2244_v57  ;;  %v5778_v17 = vpop.xlane.xlu1 %1134  ;;  %v2242_v57 = vmul.f32 %v5592_v8, %v4047_v37  ;;  %4062 = vtanh.f32 %v2180_v1  ;;  %v4059_v1 = vpop.eup %4058  ;;  %v2247_v47 = vmul.f32 %v5592_v8, %v4057_v4 }
 0x239   : > { %7119 = vst [vmem:[#allocation12_spill] sm:$0xff] %v5778_v17  ;;  %v5782_v0 = vpop.xlane.xlu0 %1132 }
 0x23a   : > { %7120 = vst [vmem:[#allocation19_spill] sm:$0xff] %v5782_v0 }
 0x23b   : > { %1914 = vadd.xlane.f32.xlu1 %v1857_v44 }
 0x23c   : > { %1912 = vadd.xlane.f32.xlu0 %v1856_v21  ;;  %v5788_v15 = vpop.xlane.xlu1 %1520  ;;  %v1863_v21 = vmul.f32 %v5592_v8, %v4049_v38 }
 0x23d   : > { %7122 = vst [vmem:[#allocation16_spill] sm:$0xff] %v5788_v15  ;;  %v5792_v33 = vpop.xlane.xlu0 %1518 }
 0x23e   : > { %7124 = vst [vmem:[#allocation15_spill] sm:$0xff] %v5792_v33 }
 0x23f   : > { %2300 = vadd.xlane.f32.xlu1 %v2243_v55  ;;  %v1860_v55 = vmul.f32 %v5592_v8, %v4055_v56 }
 0x240   : > { %2298 = vadd.xlane.f32.xlu0 %v2242_v57  ;;  %v5796_v44 = vpop.xlane.xlu1 %1146 }
 0x241   : > { %7125 = vst [vmem:[#allocation20_spill] sm:$0xff] %v5796_v44  ;;  %v5798_v7 = vpop.xlane.xlu0 %1144 }
 0x242   : > { %7126 = vst [vmem:[#allocation21_spill] sm:$0xff] %v5798_v7 }
 0x243   : > { %1926 = vadd.xlane.f32.xlu1 %v1863_v21  ;;  %v4061_v21 = vpop.eup %4060 }
 0x244   : > { %1924 = vadd.xlane.f32.xlu0 %v1862_v39  ;;  %v5802_v24 = vpop.xlane.xlu1 %1532  ;;  %v2246_v39 = vmul.f32 %v5592_v8, %v4059_v1  ;;  %v4063_v7 = vpop.eup %4062  ;;  %v2249_v56 = vmul.f32 %v5592_v8, %v4061_v21 }
 0x245   : > { %7127 = vst [vmem:[#allocation22_spill] sm:$0xff] %v5802_v24  ;;  %v5804_v37 = vpop.xlane.xlu0 %1530 }
 0x246   : > { %7128 = vst [vmem:[#allocation23_spill] sm:$0xff] %v5804_v37 }
 0x247   : > { %1922 = vadd.xlane.f32.xlu1 %v1861_v25  ;;  %v2248_v25 = vmul.f32 %v5592_v8, %v4063_v7  ;;  %v2316_v8 = vmax.f32 %v5546_v32, %v5552_v43  ;;  %v2317_v7 = vmax.f32 %v5563_v12, %v5573_v20 }
 0x248   : > { %1920 = vadd.xlane.f32.xlu0 %v1860_v55  ;;  %v5808_v57 = vpop.xlane.xlu1 %1142 }
 0x249   : > { %7129 = vst [vmem:[#allocation24_spill] sm:$0xff] %v5808_v57  ;;  %v5810_v38 = vpop.xlane.xlu0 %1140 }
 0x24a   : > { %7130 = vst [vmem:[#allocation25_spill] sm:$0xff] %v5810_v38 }
 0x24b   : > { %2308 = vadd.xlane.f32.xlu1 %v2247_v47 }
 0x24c   : > { %2306 = vadd.xlane.f32.xlu0 %v2246_v39  ;;  %v5814_v37 = vpop.xlane.xlu1 %1528 }
 0x24d   : > { %7131 = vst [vmem:[#allocation26_spill] sm:$0xff] %v5814_v37  ;;  %v5816_v61 = vpop.xlane.xlu0 %1526 }
 0x24e   : > { %7132 = vst [vmem:[#allocation27_spill] sm:$0xff] %v5816_v61 }
 0x24f   : > { %2312 = vadd.xlane.f32.xlu1 %v2249_v56 }
 0x250   : > { %2310 = vadd.xlane.f32.xlu0 %v2248_v25  ;;  %v5820_v55 = vpop.xlane.xlu1 %1154  ;;  %v2314_v25 = vmax.f32 %v5567_v30, %v5577_v2 }
 0x251   : > { %7133 = vst [vmem:[#allocation28_spill] sm:$0xff] %v5820_v55  ;;  %v5822_v38 = vpop.xlane.xlu0 %1152 }
 0x252   : > { %7134 = vst [vmem:[#allocation29_spill] sm:$0xff] %v5822_v38 }
 0x254   : > { %v5824_v4 = vpop.xlane.xlu1 %1540 }
 0x255   : > { %7135 = vst [vmem:[#allocation30_spill] sm:$0xff] %v5824_v4  ;;  %v5826_v1 = vpop.xlane.xlu0 %1538 }
 0x256   : > { %7136 = vst [vmem:[#allocation31_spill] sm:$0xff] %v5826_v1 }
 0x258   : > { %v5828_v47 = vpop.xlane.xlu1 %1150 }
 0x259   : > { %7137 = vst [vmem:[#allocation32_spill] sm:$0xff] %v5828_v47  ;;  %v5830_v39 = vpop.xlane.xlu0 %1148  ;;  %v2315_v47 = vmax.f32 %v5587_v40, %v5583_v28 }
 0x25a   : > { %7138 = vst [vmem:[#allocation33_spill] sm:$0xff] %v5830_v39 }
 0x25c   : > { %v5832_v57 = vpop.xlane.xlu1 %1536 }
 0x25d   : > { %7139 = vst [vmem:[#allocation34_spill] sm:$0xff] %v5832_v57  ;;  %v5834_v61 = vpop.xlane.xlu0 %1534 }
 0x25e   : > { %7140 = vst [vmem:[#allocation35_spill] sm:$0xff] %v5834_v61 }
 0x260   : > { %v1871_v21 = vpop.xlane.xlu1 %1870 }
 0x261   : > { %v1869_v56 = vpop.xlane.xlu0 %1868  ;;  %v2349_v55 = vmax.f32 %v2317_v7, %v1871_v21 }
 0x262   : > { %v2348_v61 = vmax.f32 %v2316_v8, %v1869_v56 }
 0x264   : > { %v2257_v23 = vpop.xlane.xlu1 %2256 }
 0x265   : > { %v2381_v1 = vmax.f32 %v2349_v55, %v2257_v23  ;;  %v2255_v26 = vpop.xlane.xlu0 %2254 }
 0x266   : > { %v2380_v39 = vmax.f32 %v2348_v61, %v2255_v26 }
 0x267   : > { %v2413_v57 = vsub.f32 %v5563_v12, %v2381_v1  ;;  %v2509_v50 = vsub.f32 %v5573_v20, %v2381_v1  ;;  %v2605_v38 = vsub.f32 %v1871_v21, %v2381_v1  ;;  %v2701_v41 = vsub.f32 %v2257_v23, %v2381_v1 }
 0x268   : > { %v2412_v4 = vsub.f32 %v5546_v32, %v2380_v39  ;;  %v2508_v37 = vsub.f32 %v5552_v43, %v2380_v39  ;;  %v1867_v9 = vpop.xlane.xlu1 %1866  ;;  %v2604_v36 = vsub.f32 %v1869_v56, %v2380_v39  ;;  %v2700_v21 = vsub.f32 %v2255_v26, %v2380_v39 }
 0x269   : > { %v2448_v58 = vmul.f32 1.442695, %v2413_v57  ;;  %v2544_v8 = vmul.f32 1.442695, %v2509_v50  ;;  %v2640_v61 = vmul.f32 1.442695, %v2605_v38  ;;  %v1865_v12 = vpop.xlane.xlu0 %1864  ;;  %v2347_v43 = vmax.f32 %v2315_v47, %v1867_v9 }
 0x26a   : > { %v2736_v1 = vmul.f32 1.442695, %v2701_v41  ;;  %v2446_v32 = vmul.f32 1.442695, %v2412_v4  ;;  %v2542_v57 = vmul.f32 1.442695, %v2508_v37  ;;  %v2346_v38 = vmax.f32 %v2314_v25, %v1865_v12 }
 0x26b   : > { %4064 = vpow2.f32 %v2448_v58  ;;  %v2638_v23 = vmul.f32 1.442695, %v2604_v36  ;;  %v2734_v58 = vmul.f32 1.442695, %v2700_v21 }
 0x26c   : > { %4066 = vpow2.f32 %v2544_v8  ;;  %v2253_v56 = vpop.xlane.xlu1 %2252 }
 0x26d   : > { %4068 = vpow2.f32 %v2640_v61  ;;  %v2379_v41 = vmax.f32 %v2347_v43, %v2253_v56  ;;  %v2251_v26 = vpop.xlane.xlu0 %2250 }
 0x26e   : > { %4070 = vpow2.f32 %v2736_v1  ;;  %v2378_v4 = vmax.f32 %v2346_v38, %v2251_v26 }
 0x26f   : > { %4072 = vpow2.f32 %v2446_v32  ;;  %v2411_v47 = vsub.f32 %v5587_v40, %v2379_v41  ;;  %v2507_v37 = vsub.f32 %v5583_v28, %v2379_v41  ;;  %v2603_v25 = vsub.f32 %v1867_v9, %v2379_v41 }
 0x270   : > { %4074 = vpow2.f32 %v2542_v57  ;;  %v2699_v8 = vsub.f32 %v2253_v56, %v2379_v41  ;;  %v2410_v20 = vsub.f32 %v5567_v30, %v2378_v4  ;;  %v2506_v36 = vsub.f32 %v5577_v2, %v2378_v4  ;;  %v1879_v61 = vpop.xlane.xlu1 %1878 }
 0x271   : > { %4076 = vpow2.f32 %v2638_v23  ;;  %v2444_v43 = vmul.f32 1.442695, %v2411_v47  ;;  %v2540_v50 = vmul.f32 1.442695, %v2507_v37  ;;  %v2636_v7 = vmul.f32 1.442695, %v2603_v25  ;;  %v5896_v1 = vpop.xlane.xlu0 %1876 }
 0x272   : > { %4078 = vpow2.f32 %v2734_v58  ;;  %v2732_v40 = vmul.f32 1.442695, %v2699_v8  ;;  %v2442_v28 = vmul.f32 1.442695, %v2410_v20  ;;  %v2602_v9 = vsub.f32 %v1865_v12, %v2378_v4  ;;  %v7148_v37 = vld [vmem:[#allocation17_spill] sm:$0xff] }
 0x273   : > { %4080 = vpow2.f32 %v2444_v43  ;;  %v2698_v57 = vsub.f32 %v2251_v26, %v2378_v4  ;;  %v7145_v30 = vmax.f32 %v5596_v14, %v5608_v29  ;;  %v2538_v47 = vmul.f32 1.442695, %v2506_v36 }
 0x274   : > { %4082 = vpow2.f32 %v2540_v50  ;;  %v7149_v25 = vmax.f32 %v5602_v60, %v7148_v37  ;;  %v2265_v58 = vpop.xlane.xlu1 %2264  ;;  %v2634_v4 = vmul.f32 1.442695, %v2602_v9 }
 0x275   : > { %v2353_v2 = vmax.f32 %v7145_v30, %v1879_v61  ;;  %v5909_v8 = vpop.eup %4064  ;;  %4084 = vpow2.f32 %v2636_v7  ;;  %v2263_v30 = vpop.xlane.xlu0 %2262  ;;  %v2730_v56 = vmul.f32 1.442695, %v2698_v57 }
 0x276   : > { %v2352_v38 = vmax.f32 %v7149_v25, %v5896_v1  ;;  %v5913_v21 = vpop.eup %4066  ;;  %4086 = vpow2.f32 %v2732_v40 }
 0x277   : > { %v2385_v43 = vmax.f32 %v2353_v2, %v2265_v58  ;;  %v5917_v32 = vpop.eup %4068  ;;  %v2797_v25 = vadd.f32 %v5913_v21, %v5909_v8  ;;  %4088 = vpow2.f32 %v2442_v28 }
 0x278   : > { %v2384_v23 = vmax.f32 %v2352_v38, %v2263_v30  ;;  %v5923_v9 = vpop.eup %4070  ;;  %4090 = vpow2.f32 %v2538_v47  ;;  %v1875_v40 = vpop.xlane.xlu1 %1874 }
 0x279   : > { %v2417_v26 = vsub.f32 %v5596_v14, %v2385_v43  ;;  %v2513_v7 = vsub.f32 %v5608_v29, %v2385_v43  ;;  %v2609_v2 = vsub.f32 %v1879_v61, %v2385_v43  ;;  %v2705_v20 = vsub.f32 %v2265_v58, %v2385_v43  ;;  %v5926_v57 = vpop.eup %4072  ;;  %v5929_v28 = vpop.xlane.xlu0 %1872 }
 0x27a   : > { %v2416_v36 = vsub.f32 %v5602_v60, %v2384_v23  ;;  %v2829_v38 = vadd.f32 %v5917_v32, %v2797_v25  ;;  %4092 = vpow2.f32 %v2634_v4  ;;  %v5931_v14 = vpop.eup %4074  ;;  %v2512_v4 = vsub.f32 %v7148_v37, %v2384_v23 }
 0x27b   : > { %v2456_v41 = vmul.f32 1.442695, %v2417_v26  ;;  %v2552_v50 = vmul.f32 1.442695, %v2513_v7  ;;  %4094 = vpow2.f32 %v2730_v56  ;;  %v2648_v29 = vmul.f32 1.442695, %v2609_v2  ;;  %v5933_v61 = vpop.eup %4076 }
 0x27c   : > { %v2744_v12 = vmul.f32 1.442695, %v2705_v20  ;;  %v2454_v47 = vmul.f32 1.442695, %v2416_v36  ;;  %v2861_v60 = vadd.f32 %v5923_v9, %v2829_v38  ;;  %v2796_v58 = vadd.f32 %v5931_v14, %v5926_v57  ;;  %v5939_v26 = vpop.eup %4078  ;;  %v2261_v36 = vpop.xlane.xlu1 %2260 }
 0x27d   : > { %4096 = vpow2.f32 %v2456_v41  ;;  %v2608_v43 = vsub.f32 %v5896_v1, %v2384_v23  ;;  %v2704_v25 = vsub.f32 %v2263_v30, %v2384_v23  ;;  %v7154_v56 = vmax.f32 %v5618_v52, %v5628_v42  ;;  %v5945_v7 = vpop.eup %4080 }
 0x27e   : > { %4098 = vpow2.f32 %v2552_v50  ;;  %v2828_v2 = vadd.f32 %v5933_v61, %v2796_v58  ;;  %v2550_v38 = vmul.f32 1.442695, %v2512_v4  ;;  %v7155_v41 = vmax.f32 %v5622_v54, %v5632_v59  ;;  %v2259_v50 = vpop.xlane.xlu0 %2258  ;;  %v5952_v39 = vpop.eup %4082 }
 0x27f   : > { %v2351_v20 = vmax.f32 %v7154_v56, %v1875_v40  ;;  %4100 = vrcp.f32 %v2861_v60  ;;  %v2646_v1 = vmul.f32 1.442695, %v2608_v43  ;;  %v2742_v23 = vmul.f32 1.442695, %v2704_v25  ;;  %v5954_v56 = vpop.eup %4084 }
 0x280   : > { %v2350_v37 = vmax.f32 %v7155_v41, %v5929_v28  ;;  %4102 = vpow2.f32 %v2648_v29  ;;  %v2860_v60 = vadd.f32 %v5939_v26, %v2828_v2  ;;  %v2795_v58 = vadd.f32 %v5952_v39, %v5945_v7  ;;  %v5959_v55 = vpop.eup %4086  ;;  %v5963_v43 = vpop.xlane.xlu1 %1886 }
 0x281   : > { %v2383_v30 = vmax.f32 %v2351_v20, %v2261_v36  ;;  %4104 = vpow2.f32 %v2744_v12  ;;  %v5965_v25 = vpop.eup %4088 }
 0x282   : > { %v2382_v4 = vmax.f32 %v2350_v37, %v2259_v50  ;;  %4106 = vpow2.f32 %v2454_v47  ;;  %v2827_v12 = vadd.f32 %v5954_v56, %v2795_v58  ;;  %v5973_v47 = vpop.xlane.xlu0 %1884 }
 0x283   : > { %v2415_v41 = vsub.f32 %v5618_v52, %v2383_v30  ;;  %v2511_v29 = vsub.f32 %v5628_v42, %v2383_v30  ;;  %v2607_v24 = vsub.f32 %v1875_v40, %v2383_v30  ;;  %4108 = vrcp.f32 %v2860_v60  ;;  %v5975_v52 = vpop.eup %4090 }
 0x284   : > { %v2703_v20 = vsub.f32 %v2261_v36, %v2383_v30  ;;  %v2414_v2 = vsub.f32 %v5622_v54, %v2382_v4  ;;  %4110 = vpow2.f32 %v2550_v38  ;;  %v5977_v44 = vpop.eup %4092  ;;  %v2859_v33 = vadd.f32 %v5959_v55, %v2827_v12 }
 0x285   : > { %v2452_v42 = vmul.f32 1.442695, %v2415_v41  ;;  %v2548_v40 = vmul.f32 1.442695, %v2511_v29  ;;  %v2644_v37 = vmul.f32 1.442695, %v2607_v24  ;;  %v2794_v60 = vadd.f32 %v5975_v52, %v5965_v25  ;;  %v5984_v36 = vpop.eup %4094 }
 0x286   : > { %4112 = vpow2.f32 %v2646_v1  ;;  %v5982_v58 = vmul.f32 1.442695, %v2703_v20  ;;  %v5987_v54 = vmul.f32 1.442695, %v2414_v2  ;;  %v2510_v38 = vsub.f32 %v5632_v59, %v2382_v4  ;;  %v7156_v29 = vld [vmem:[#allocation18_spill] sm:$0xff] }
 0x287   : > { %4114 = vpow2.f32 %v2742_v23  ;;  %v2606_v24 = vsub.f32 %v5929_v28, %v2382_v4  ;;  %v5991_v30 = vpop.eup %4096  ;;  %v2826_v41 = vadd.f32 %v5977_v44, %v2794_v60  ;;  %v2702_v1 = vsub.f32 %v2259_v50, %v2382_v4  ;;  %v6008_v60 = vpop.xlane.xlu1 %2272 }
 0x288   : > { %4116 = vrcp.f32 %v2859_v33  ;;  %v7157_v12 = vmax.f32 %v5638_v16, %v7156_v29  ;;  %v5998_v23 = vpop.eup %4098  ;;  %v6000_v2 = vmul.f32 1.442695, %v2510_v38  ;;  %v7158_v33 = vmax.f32 %v5642_v53, %v5652_v31  ;;  %v6010_v50 = vpop.xlane.xlu0 %2270 }
 0x289   : > { %4118 = vpow2.f32 %v2452_v42  ;;  %v6002_v59 = vmul.f32 1.442695, %v2606_v24  ;;  %v4101_v4 = vpop.eup %4100  ;;  %v2858_v0 = vadd.f32 %v5984_v36, %v2826_v41  ;;  %v2801_v42 = vadd.f32 %v5998_v23, %v5991_v30 }
 0x28a   : > { %v2357_v20 = vmax.f32 %v7157_v12, %v5963_v43  ;;  %v2356_v28 = vmax.f32 %v7158_v33, %v5973_v47  ;;  %4120 = vpow2.f32 %v2548_v40  ;;  %v6015_v38 = vmul.f32 1.442695, %v2702_v1  ;;  %v6017_v24 = vpop.eup %4102 }
 0x28b   : > { %v2925_v12 = vmul.f32 %v4101_v4, %v5909_v8  ;;  %v2989_v33 = vmul.f32 %v4101_v4, %v5913_v21  ;;  %v3085_v41 = vmul.f32 %v4101_v4, %v5917_v32  ;;  %v3181_v15 = vmul.f32 %v4101_v4, %v5923_v9  ;;  %v6028_v17 = vpop.eup %4104  ;;  %v4389_v4 = vld [vmem:[%s4880_s24 + $0x318] sm:$0xff] }
 0x28c   : > { %4122 = vrcp.f32 %v2858_v0  ;;  %v2833_v40 = vadd.f32 %v6017_v24, %v2801_v42  ;;  %v6032_v1 = vmax.f32 %v2357_v20, %v6008_v60  ;;  %v6035_v5 = vmax.f32 %v2356_v28, %v6010_v50  ;;  %v6037_v8 = vpop.eup %4106 }
 0x28d   : > { %v2957_v21 = vmul.f32 %v4386_v62, %v2925_v12  ;;  %v3021_v32 = vmul.f32 %v4387_v46, %v2989_v33  ;;  %v3117_v9 = vmul.f32 %v4388_v63, %v3085_v41  ;;  %v3213_v45 = vmul.f32 %v4389_v4, %v3181_v15  ;;  %v4109_v0 = vpop.eup %4108 }
 0x28e   : > { %v2865_v42 = vadd.f32 %v6028_v17, %v2833_v40  ;;  %4124 = vpow2.f32 %v2644_v37  ;;  %v2421_v20 = vsub.f32 %v5638_v16, %v6032_v1  ;;  %v2517_v28 = vsub.f32 %v7156_v29, %v6032_v1  ;;  %v6048_v10 = vpop.eup %4110  ;;  %v4390_v40 = vld [vmem:[%s4880_s24 + $0x10] sm:$0xff] }
 0x28f   : > { %v3053_v62 = vadd.f32 %v3021_v32, %v2957_v21  ;;  %v2924_v63 = vmul.f32 %v4109_v0, %v5926_v57  ;;  %v2988_v46 = vmul.f32 %v4109_v0, %v5931_v14  ;;  %v3084_v15 = vmul.f32 %v4109_v0, %v5933_v61  ;;  %v4391_v21 = vld [vmem:[%s4880_s24 + $0x110] sm:$0xff] }
 0x290   : > { %v6054_v37 = vpop.eup %4112  ;;  %v3180_v16 = vmul.f32 %v4109_v0, %v5939_v26  ;;  %4126 = vrcp.f32 %v2865_v42  ;;  %v2800_v29 = vadd.f32 %v6048_v10, %v6037_v8  ;;  %v6059_v12 = vmul.f32 1.442695, %v2421_v20  ;;  %v4392_v32 = vld [vmem:[%s4880_s24 + $0x210] sm:$0xff] }
 0x291   : > { %v6061_v33 = vpop.eup %4114  ;;  %v3149_v41 = vadd.f32 %v3117_v9, %v3053_v62  ;;  %v2956_v57 = vmul.f32 %v4390_v40, %v2924_v63  ;;  %v3020_v14 = vmul.f32 %v4391_v21, %v2988_v46  ;;  %v3116_v61 = vmul.f32 %v4392_v32, %v3084_v15  ;;  %v4393_v26 = vld [vmem:[%s4880_s24 + $0x310] sm:$0xff]  ;;  %v6080_v40 = vpop.xlane.xlu1 %1882 }
 0x292   : > { %v4117_v4 = vpop.eup %4116  ;;  %v3212_v0 = vmul.f32 %v4393_v26, %v3180_v16  ;;  %v2832_v42 = vadd.f32 %v6054_v37, %v2800_v29  ;;  %4128 = vpow2.f32 %v5982_v58  ;;  %v6074_v9 = vmul.f32 1.442695, %v2517_v28  ;;  %v6082_v16 = vpop.xlane.xlu0 %1880  ;;  %v4396_v26 = vld [vmem:[%s4880_s24 + $0x208] sm:$0xff] }
 0x293   : > { %v6076_v20 = vpop.eup %4118  ;;  %v3245_v62 = vadd.f32 %v3213_v45, %v3149_v41  ;;  %v3052_v63 = vadd.f32 %v3020_v14, %v2956_v57  ;;  %v2923_v46 = vmul.f32 %v4117_v4, %v5945_v7  ;;  %v2987_v15 = vmul.f32 %v4117_v4, %v5952_v39  ;;  %v4394_v39 = vld [vmem:[%s4880_s24 + $0x8] sm:$0xff] }
 0x294   : > { %v6084_v29 = vpop.eup %4120  ;;  %v3083_v58 = vmul.f32 %v4117_v4, %v5954_v56  ;;  %v3179_v28 = vmul.f32 %v4117_v4, %v5959_v55  ;;  %v2864_v21 = vadd.f32 %v6061_v33, %v2832_v42  ;;  %4130 = vpow2.f32 %v5987_v54  ;;  %v4395_v41 = vld [vmem:[%s4880_s24 + $0x108] sm:$0xff] }
 0x295   : > { %3277 = vst.msk [vmem:[%s6069_s12 + $0x18] sm:$0xff] %vm812_vm0, %v3245_v62  ;;  %v3148_v45 = vadd.f32 %v3116_v61, %v3052_v63  ;;  %v2955_v7 = vmul.f32 %v4394_v39, %v2923_v46  ;;  %v3019_v57 = vmul.f32 %v4395_v41, %v2987_v15  ;;  %v2799_v14 = vadd.f32 %v6084_v29, %v6076_v20  ;;  %v4397_v55 = vld [vmem:[%s4880_s24 + $0x308] sm:$0xff]  ;;  %v6112_v39 = vpop.xlane.xlu1 %2268  ;;  %v4400_v41 = vld [vmem:[%s4880_s24 + $0x200] sm:$0xff] }
 0x296   : > { %v4123_v32 = vpop.eup %4122  ;;  %v3115_v56 = vmul.f32 %v4396_v26, %v3083_v58  ;;  %v3211_v4 = vmul.f32 %v4397_v55, %v3179_v28  ;;  %4132 = vrcp.f32 %v2864_v21  ;;  %v2613_v54 = vsub.f32 %v5963_v43, %v6032_v1 }
 0x297   : > { %v3244_v61 = vadd.f32 %v3212_v0, %v3148_v45  ;;  %v3051_v42 = vadd.f32 %v3019_v57, %v2955_v7  ;;  %v2922_v62 = vmul.f32 %v4123_v32, %v5965_v25  ;;  %v2986_v63 = vmul.f32 %v4123_v32, %v5975_v52  ;;  %v4398_v0 = vld [vmem:[%s4880_s24] sm:$0xff]  ;;  %v6114_v7 = vpop.xlane.xlu0 %2266 }
 0x298   : > { %v6102_v46 = vpop.eup %4124  ;;  %v3082_v15 = vmul.f32 %v4123_v32, %v5977_v44  ;;  %v3178_v58 = vmul.f32 %v4123_v32, %v5984_v36  ;;  %4134 = vpow2.f32 %v6000_v2  ;;  %v2656_v28 = vmul.f32 1.442695, %v2613_v54  ;;  %v4399_v45 = vld [vmem:[%s4880_s24 + $0x100] sm:$0xff] }
 0x299   : > { %3276 = vst.msk [vmem:[%s6069_s12 + $0x10] sm:$0xff] %vm812_vm0, %v3244_v61  ;;  %v3147_v43 = vadd.f32 %v3115_v56, %v3051_v42  ;;  %v2954_v21 = vmul.f32 %v4398_v0, %v2922_v62  ;;  %v3018_v25 = vmul.f32 %v4399_v45, %v2986_v63  ;;  %v2831_v52 = vadd.f32 %v6102_v46, %v2799_v14  ;;  %v4401_v2 = vld [vmem:[%s4880_s24 + $0x300] sm:$0xff]  ;;  %v4403_v62 = vld [vmem:[%s4880_s24 + $0x138] sm:$0xff]  ;;  %v6142_v45 = vpop.xlane.xlu1 %1894 }
 0x29a   : > { %v4127_v44 = vpop.eup %4126  ;;  %v3114_v36 = vmul.f32 %v4400_v41, %v3082_v15  ;;  %v3210_v57 = vmul.f32 %v4401_v2, %v3178_v58  ;;  %4136 = vpow2.f32 %v6002_v59  ;;  %v2709_v32 = vsub.f32 %v6008_v60, %v6032_v1  ;;  %v4402_v1 = vld [vmem:[%s4880_s24 + $0x38] sm:$0xff] }
 0x29b   : > { %v3243_v26 = vadd.f32 %v3211_v4, %v3147_v43  ;;  %v3050_v56 = vadd.f32 %v3018_v25, %v2954_v21  ;;  %v2929_v14 = vmul.f32 %v4127_v44, %v5991_v30  ;;  %v2993_v55 = vmul.f32 %v4127_v44, %v5998_v23  ;;  %v4404_v15 = vld [vmem:[%s4880_s24 + $0x238] sm:$0xff]  ;;  %v6144_v25 = vpop.xlane.xlu0 %1892 }
 0x29c   : > { %v6123_v54 = vpop.eup %4128  ;;  %v3089_v61 = vmul.f32 %v4127_v44, %v6017_v24  ;;  %v3185_v42 = vmul.f32 %v4127_v44, %v6028_v17  ;;  %4138 = vpow2.f32 %v6015_v38  ;;  %v2752_v59 = vmul.f32 1.442695, %v2709_v32  ;;  %v4405_v24 = vld [vmem:[%s4880_s24 + $0x338] sm:$0xff] }
 0x29d   : > { %3275 = vst.msk [vmem:[%s6069_s12 + $0x8] sm:$0xff] %vm812_vm0, %v3243_v26  ;;  %v3146_v60 = vadd.f32 %v3114_v36, %v3050_v56  ;;  %v2961_v4 = vmul.f32 %v4402_v1, %v2929_v14  ;;  %v3025_v63 = vmul.f32 %v4403_v62, %v2993_v55  ;;  %v2863_v30 = vadd.f32 %v6123_v54, %v2831_v52  ;;  %v4407_v56 = vld [vmem:[%s4880_s24 + $0x130] sm:$0xff] }
 0x29e   : > { %v6133_v23 = vpop.eup %4130  ;;  %v3121_v58 = vmul.f32 %v4404_v15, %v3089_v61  ;;  %v3217_v43 = vmul.f32 %v4405_v24, %v3185_v42  ;;  %4140 = vpow2.f32 %v6059_v12  ;;  %v2420_v17 = vsub.f32 %v5642_v53, %v6035_v5  ;;  %v4408_v55 = vld [vmem:[%s4880_s24 + $0x230] sm:$0xff] }
 0x29f   : > { %v3242_v38 = vadd.f32 %v3210_v57, %v3146_v60  ;;  %v3057_v0 = vadd.f32 %v3025_v63, %v2961_v4  ;;  %4142 = vrcp.f32 %v2863_v30  ;;  %v2516_v21 = vsub.f32 %v5652_v31, %v6035_v5  ;;  %v6177_v63 = vpop.xlane.xlu1 %2280  ;;  %v6179_v30 = vpop.xlane.xlu0 %2278 }
 0x2a0   : > { %v4133_v52 = vpop.eup %4132  ;;  %4144 = vpow2.f32 %v6074_v9  ;;  %v2462_v44 = vmul.f32 1.442695, %v2420_v17  ;;  %v2612_v12 = vsub.f32 %v5973_v47, %v6035_v5  ;;  %v2708_v53 = vsub.f32 %v6010_v50, %v6035_v5  ;;  %v4406_v50 = vld [vmem:[%s4880_s24 + $0x30] sm:$0xff]  ;;  %v7163_v17 = vld [vmem:[#allocation3_spill] sm:$0xff] }
 0x2a1   : > { %3274 = vst.msk [vmem:[%s6069_s12] sm:$0xff] %vm812_vm0, %v3242_v38  ;;  %v3153_v31 = vadd.f32 %v3121_v58, %v3057_v0  ;;  %v2928_v41 = vmul.f32 %v4133_v52, %v6037_v8  ;;  %v2992_v36 = vmul.f32 %v4133_v52, %v6048_v10  ;;  %v3088_v2 = vmul.f32 %v4133_v52, %v6054_v37  ;;  %v4409_v10 = vld [vmem:[%s4880_s24 + $0x330] sm:$0xff] }
 0x2a2   : > { %v6156_v9 = vpop.eup %4134  ;;  %v3184_v57 = vmul.f32 %v4133_v52, %v6061_v33  ;;  %4146 = vpow2.f32 %v2656_v28  ;;  %v2558_v47 = vmul.f32 1.442695, %v2516_v21  ;;  %v2654_v32 = vmul.f32 1.442695, %v2612_v12  ;;  %v7161_v58 = vld [vmem:[#allocation5_spill] sm:$0xff] }
 0x2a3   : > { %v3249_v5 = vadd.f32 %v3217_v43, %v3153_v31  ;;  %v2960_v26 = vmul.f32 %v4406_v50, %v2928_v41  ;;  %v3024_v14 = vmul.f32 %v4407_v56, %v2992_v36  ;;  %v3120_v8 = vmul.f32 %v4408_v55, %v3088_v2 }
 0x2a4   : > { %v6162_v61 = vpop.eup %4136  ;;  %v3216_v42 = vmul.f32 %v4409_v10, %v3184_v57  ;;  %v2798_v37 = vadd.f32 %v6156_v9, %v6133_v23  ;;  %4148 = vpow2.f32 %v2752_v59  ;;  %v2750_v33 = vmul.f32 1.442695, %v2708_v53 }
 0x2a5   : > { %3281 = vst.msk [vmem:[%s6069_s12 + $0x38] sm:$0xff] %vm812_vm0, %v3249_v5  ;;  %v3056_v28 = vadd.f32 %v3024_v14, %v2960_v26  ;;  %4150 = vpow2.f32 %v2462_v44  ;;  %v7159_v60 = vmax.f32 %v5658_v19, %v5668_v22  ;;  %v7160_v4 = vmax.f32 %v5662_v51, %v5672_v49 }
 0x2a6   : > { %v6181_v59 = vpop.eup %4138  ;;  %v2830_v15 = vadd.f32 %v6162_v61, %v2798_v37  ;;  %4152 = vpow2.f32 %v2558_v47  ;;  %v7162_v24 = vmax.f32 %v5678_v35, %v7161_v58  ;;  %v7164_v38 = vmax.f32 %v5682_v6, %v7163_v17  ;;  %v4412_v37 = vld [vmem:[%s4880_s24 + $0x228] sm:$0xff] }
 0x2a7   : > { %v2355_v1 = vmax.f32 %v7159_v60, %v6080_v40  ;;  %v2354_v62 = vmax.f32 %v7160_v4, %v6082_v16  ;;  %v3152_v21 = vadd.f32 %v3120_v8, %v3056_v28  ;;  %4154 = vpow2.f32 %v2654_v32  ;;  %v4410_v8 = vld [vmem:[%s4880_s24 + $0x28] sm:$0xff]  ;;  %v6222_v28 = vpop.xlane.xlu1 %1890 }
 0x2a8   : > { %v2361_v43 = vmax.f32 %v7162_v24, %v6142_v45  ;;  %v2360_v0 = vmax.f32 %v7164_v38, %v6144_v25  ;;  %v6194_v12 = vpop.eup %4140  ;;  %v2862_v53 = vadd.f32 %v6181_v59, %v2830_v15  ;;  %4156 = vpow2.f32 %v2750_v33  ;;  %v4413_v33 = vld [vmem:[%s4880_s24 + $0x328] sm:$0xff] }
 0x2a9   : > { %v2387_v52 = vmax.f32 %v2355_v1, %v6112_v39  ;;  %v2386_v44 = vmax.f32 %v2354_v62, %v6114_v7  ;;  %v4143_v36 = vpop.eup %4142  ;;  %v3248_v2 = vadd.f32 %v3216_v42, %v3152_v21 }
 0x2aa   : > { %v6198_v31 = vmax.f32 %v2361_v43, %v6177_v63  ;;  %v6201_v41 = vmax.f32 %v2360_v0, %v6179_v30  ;;  %v6206_v5 = vpop.eup %4144  ;;  %v2927_v50 = vmul.f32 %v4143_v36, %v6076_v20  ;;  %v2991_v26 = vmul.f32 %v4143_v36, %v6084_v29  ;;  %v4411_v20 = vld [vmem:[%s4880_s24 + $0x128] sm:$0xff] }
 0x2ab   : > { %v2419_v57 = vsub.f32 %v5658_v19, %v2387_v52  ;;  %v2515_v47 = vsub.f32 %v5668_v22, %v2387_v52  ;;  %v2611_v32 = vsub.f32 %v6080_v40, %v2387_v52  ;;  %v3087_v56 = vmul.f32 %v4143_v36, %v6102_v46  ;;  %3280 = vst.msk [vmem:[%s6069_s12 + $0x30] sm:$0xff] %vm812_vm0, %v3248_v2 }
 0x2ac   : > { %v3183_v14 = vmul.f32 %v4143_v36, %v6123_v54  ;;  %4158 = vrcp.f32 %v2862_v53  ;;  %v2805_v19 = vadd.f32 %v6206_v5, %v6194_v12  ;;  %v6216_v55 = vpop.eup %4146  ;;  %v2959_v10 = vmul.f32 %v4410_v8, %v2927_v50 }
 0x2ad   : > { %v2460_v22 = vmul.f32 1.442695, %v2419_v57  ;;  %v2556_v40 = vmul.f32 1.442695, %v2515_v47  ;;  %v3023_v42 = vmul.f32 %v4411_v20, %v2991_v26  ;;  %v3119_v29 = vmul.f32 %v4412_v37, %v3087_v56 }
 0x2ae   : > { %v3215_v46 = vmul.f32 %v4413_v33, %v3183_v14  ;;  %v2837_v54 = vadd.f32 %v6216_v55, %v2805_v19  ;;  %v2652_v60 = vmul.f32 1.442695, %v2611_v32  ;;  %v2707_v1 = vsub.f32 %v6112_v39, %v2387_v52  ;;  %v6226_v4 = vpop.eup %4148 }
 0x2af   : > { %4160 = vpow2.f32 %v2460_v22  ;;  %v3055_v62 = vadd.f32 %v3023_v42, %v2959_v10  ;;  %v2418_v15 = vsub.f32 %v5662_v51, %v2386_v44  ;;  %v2514_v24 = vsub.f32 %v5672_v49, %v2386_v44  ;;  %v6230_v43 = vpop.eup %4150 }
 0x2b0   : > { %4162 = vpow2.f32 %v2556_v40  ;;  %v2869_v38 = vadd.f32 %v6226_v4, %v2837_v54  ;;  %v2748_v0 = vmul.f32 1.442695, %v2707_v1  ;;  %v2610_v21 = vsub.f32 %v6082_v16, %v2386_v44  ;;  %v6234_v53 = vpop.eup %4152  ;;  %v4414_v54 = vld [vmem:[%s4880_s24 + $0x20] sm:$0xff] }
 0x2b1   : > { %4164 = vpow2.f32 %v2652_v60  ;;  %v3151_v36 = vadd.f32 %v3119_v29, %v3055_v62  ;;  %v2458_v39 = vmul.f32 1.442695, %v2418_v15  ;;  %v2554_v52 = vmul.f32 1.442695, %v2514_v24  ;;  %v6237_v57 = vpop.eup %4154  ;;  %v4415_v60 = vld [vmem:[%s4880_s24 + $0x120] sm:$0xff] }
 0x2b2   : > { %v2706_v2 = vsub.f32 %v6114_v7, %v2386_v44  ;;  %4166 = vrcp.f32 %v2869_v38  ;;  %v2804_v51 = vadd.f32 %v6234_v53, %v6230_v43  ;;  %v2650_v49 = vmul.f32 1.442695, %v2610_v21  ;;  %v6243_v32 = vpop.eup %4156  ;;  %v6247_v7 = vpop.xlane.xlu1 %2276  ;;  %v4416_v1 = vld [vmem:[%s4880_s24 + $0x220] sm:$0xff] }
 0x2b3   : > { %v2425_v47 = vsub.f32 %v5678_v35, %v6198_v31  ;;  %v3247_v16 = vadd.f32 %v3215_v46, %v3151_v36  ;;  %4168 = vpow2.f32 %v2748_v0  ;;  %v2521_v26 = vsub.f32 %v7161_v58, %v6198_v31  ;;  %v6258_v58 = vpop.xlane.xlu0 %1888 }
 0x2b4   : > { %v2746_v50 = vmul.f32 1.442695, %v2706_v2  ;;  %v2836_v44 = vadd.f32 %v6237_v57, %v2804_v51  ;;  %4170 = vpow2.f32 %v2458_v39  ;;  %v2617_v14 = vsub.f32 %v6142_v45, %v6198_v31 }
 0x2b5   : > { %v2472_v56 = vmul.f32 1.442695, %v2425_v47  ;;  %3279 = vst.msk [vmem:[%s6069_s12 + $0x28] sm:$0xff] %vm812_vm0, %v3247_v16  ;;  %4172 = vpow2.f32 %v2554_v52  ;;  %v2568_v35 = vmul.f32 1.442695, %v2521_v26  ;;  %v2713_v19 = vsub.f32 %v6177_v63, %v6198_v31 }
 0x2b6   : > { %v2424_v22 = vsub.f32 %v5682_v6, %v6201_v41  ;;  %v4159_v40 = vpop.eup %4158  ;;  %v2868_v8 = vadd.f32 %v6243_v32, %v2836_v44  ;;  %4174 = vpow2.f32 %v2650_v49  ;;  %v2664_v10 = vmul.f32 1.442695, %v2617_v14 }
 0x2b7   : > { %v2520_v45 = vsub.f32 %v7163_v17, %v6201_v41  ;;  %v2926_v20 = vmul.f32 %v4159_v40, %v6133_v23  ;;  %v2990_v63 = vmul.f32 %v4159_v40, %v6156_v9  ;;  %v3086_v6 = vmul.f32 %v4159_v40, %v6162_v61  ;;  %v4417_v9 = vld [vmem:[%s4880_s24 + $0x320] sm:$0xff]  ;;  %v6277_v61 = vpop.xlane.xlu1 %1902  ;;  %v6297_v51 = vpop.xlane.xlu0 %2274 }
 0x2b8   : > { %v3182_v31 = vmul.f32 %v4159_v40, %v6181_v59  ;;  %4176 = vrcp.f32 %v2868_v8  ;;  %v2760_v37 = vmul.f32 1.442695, %v2713_v19  ;;  %v2470_v29 = vmul.f32 1.442695, %v2424_v22  ;;  %v4418_v8 = vld [vmem:[%s4880_s24 + $0x58] sm:$0xff] }
 0x2b9   : > { %v6267_v42 = vpop.eup %4160  ;;  %v6269_v33 = vmul.f32 1.442695, %v2520_v45  ;;  %v2958_v17 = vmul.f32 %v4414_v54, %v2926_v20  ;;  %v3022_v23 = vmul.f32 %v4415_v60, %v2990_v63  ;;  %v3118_v62 = vmul.f32 %v4416_v1, %v3086_v6  ;;  %v4419_v45 = vld [vmem:[%s4880_s24 + $0x158] sm:$0xff] }
 0x2ba   : > { %v6271_v46 = vpop.eup %4162  ;;  %v3214_v15 = vmul.f32 %v4417_v9, %v3182_v31  ;;  %4178 = vpow2.f32 %v2746_v50  ;;  %v2616_v38 = vsub.f32 %v6144_v25, %v6201_v41  ;;  %v2712_v0 = vsub.f32 %v6179_v30, %v6201_v41  ;;  %v4420_v20 = vld [vmem:[%s4880_s24 + $0x258] sm:$0xff] }
 0x2bb   : > { %v6279_v59 = vpop.eup %4164  ;;  %v2803_v24 = vadd.f32 %v6271_v46, %v6267_v42  ;;  %v3054_v21 = vadd.f32 %v3022_v23, %v2958_v17  ;;  %4180 = vpow2.f32 %v2472_v56  ;;  %v7165_v36 = vmax.f32 %v5698_v48, %v5708_v18  ;;  %v6317_v63 = vpop.xlane.xlu1 %2288 }
 0x2bc   : > { %v7166_v52 = vmax.f32 %v5702_v13, %v5712_v27  ;;  %v4167_v49 = vpop.eup %4166  ;;  %4182 = vpow2.f32 %v2568_v35  ;;  %v2662_v30 = vmul.f32 1.442695, %v2616_v38  ;;  %v6300_v41 = vmul.f32 1.442695, %v2712_v0  ;;  %v6329_v1 = vpop.xlane.xlu0 %1900 }
 0x2bd   : > { %v2359_v39 = vmax.f32 %v7165_v36, %v6222_v28  ;;  %v2835_v25 = vadd.f32 %v6279_v59, %v2803_v24  ;;  %v6302_v47 = vpop.eup %4168  ;;  %v3150_v16 = vadd.f32 %v3118_v62, %v3054_v21  ;;  %v2933_v50 = vmul.f32 %v4167_v49, %v6194_v12 }
 0x2be   : > { %v6295_v2 = vmax.f32 %v7166_v52, %v6258_v58  ;;  %v2997_v26 = vmul.f32 %v4167_v49, %v6206_v5  ;;  %v3093_v44 = vmul.f32 %v4167_v49, %v6216_v55  ;;  %v6307_v56 = vpop.eup %4170  ;;  %v3189_v14 = vmul.f32 %v4167_v49, %v6226_v4  ;;  %v4421_v4 = vld [vmem:[%s4880_s24 + $0x358] sm:$0xff] }
 0x2bf   : > { %v2867_v35 = vadd.f32 %v6302_v47, %v2835_v25  ;;  %4184 = vpow2.f32 %v2664_v10  ;;  %v2391_v19 = vmax.f32 %v2359_v39, %v6247_v7  ;;  %v6312_v22 = vpop.eup %4172  ;;  %v3246_v40 = vadd.f32 %v3214_v15, %v3150_v16  ;;  %v4422_v39 = vld [vmem:[%s4880_s24 + $0x50] sm:$0xff] }
 0x2c0   : > { %v2965_v12 = vmul.f32 %v4418_v8, %v2933_v50  ;;  %v3029_v5 = vmul.f32 %v4419_v45, %v2997_v26  ;;  %v3125_v55 = vmul.f32 %v4420_v20, %v3093_v44  ;;  %v6319_v6 = vpop.eup %4174  ;;  %v3221_v31 = vmul.f32 %v4421_v4, %v3189_v14  ;;  %v4425_v50 = vld [vmem:[%s4880_s24 + $0x350] sm:$0xff]  ;;  %v7167_v8 = vld [vmem:[#allocation6_spill] sm:$0xff] }
 0x2c1   : > { %4186 = vrcp.f32 %v2867_v35  ;;  %v2802_v10 = vadd.f32 %v6312_v22, %v6307_v56  ;;  %v2423_v54 = vsub.f32 %v5698_v48, %v2391_v19  ;;  %3278 = vst.msk [vmem:[%s6069_s12 + $0x20] sm:$0xff] %vm812_vm0, %v3246_v40  ;;  %v2519_v60 = vsub.f32 %v5708_v18, %v2391_v19 }
 0x2c2   : > { %v3061_v17 = vadd.f32 %v3029_v5, %v2965_v12  ;;  %4188 = vpow2.f32 %v2760_v37  ;;  %v2615_v23 = vsub.f32 %v6222_v28, %v2391_v19  ;;  %v4177_v62 = vpop.eup %4176  ;;  %v2711_v24 = vsub.f32 %v6247_v7, %v2391_v19  ;;  %v6358_v19 = vpop.xlane.xlu0 %2286  ;;  %v7170_v5 = vld [vmem:[#allocation9_spill] sm:$0xff] }
 0x2c3   : > { %v2834_v9 = vadd.f32 %v6319_v6, %v2802_v10  ;;  %4190 = vpow2.f32 %v2470_v29  ;;  %v2468_v15 = vmul.f32 1.442695, %v2423_v54  ;;  %v2932_v38 = vmul.f32 %v4177_v62, %v6230_v43  ;;  %v4423_v43 = vld [vmem:[%s4880_s24 + $0x150] sm:$0xff] }
 0x2c4   : > { %v3157_v48 = vadd.f32 %v3125_v55, %v3061_v17  ;;  %v2996_v37 = vmul.f32 %v4177_v62, %v6234_v53  ;;  %v3092_v18 = vmul.f32 %v4177_v62, %v6237_v57  ;;  %v6336_v28 = vpop.eup %4178  ;;  %v3188_v0 = vmul.f32 %v4177_v62, %v6243_v32  ;;  %v4424_v53 = vld [vmem:[%s4880_s24 + $0x250] sm:$0xff]  ;;  %v6345_v57 = vpop.xlane.xlu1 %1898 }
 0x2c5   : > { %4192 = vpow2.f32 %v6269_v33  ;;  %v2564_v29 = vmul.f32 1.442695, %v2519_v60  ;;  %v2660_v21 = vmul.f32 1.442695, %v2615_v23  ;;  %v6340_v36 = vpop.eup %4180  ;;  %v2964_v52 = vmul.f32 %v4422_v39, %v2932_v38 }
 0x2c6   : > { %v3253_v7 = vadd.f32 %v3221_v31, %v3157_v48  ;;  %v3028_v49 = vmul.f32 %v4423_v43, %v2996_v37  ;;  %v3124_v25 = vmul.f32 %v4424_v53, %v3092_v18  ;;  %v6347_v16 = vpop.eup %4182  ;;  %v3220_v32 = vmul.f32 %v4425_v50, %v3188_v0  ;;  %v4427_v18 = vld [vmem:[%s4880_s24 + $0x148] sm:$0xff] }
 0x2c7   : > { %v2866_v33 = vadd.f32 %v6336_v28, %v2834_v9  ;;  %4194 = vpow2.f32 %v2662_v30  ;;  %v2756_v26 = vmul.f32 1.442695, %v2711_v24  ;;  %v2809_v14 = vadd.f32 %v6347_v16, %v6340_v36  ;;  %v7168_v30 = vld [vmem:[#allocation4_spill] sm:$0xff] }
 0x2c8   : > { %3285 = vst.msk [vmem:[%s6069_s12 + $0x58] sm:$0xff] %vm812_vm0, %v3253_v7  ;;  %v3060_v44 = vadd.f32 %v3028_v49, %v2964_v52  ;;  %4196 = vpow2.f32 %v6300_v41  ;;  %v2390_v35 = vmax.f32 %v6295_v2, %v6297_v51  ;;  %v7169_v12 = vmax.f32 %v7167_v8, %v7168_v30  ;;  %v4429_v7 = vld [vmem:[%s4880_s24 + $0x348] sm:$0xff] }
 0x2c9   : > { %v6360_v40 = vpop.eup %4184  ;;  %4198 = vrcp.f32 %v2866_v33  ;;  %v7171_v20 = vmax.f32 %v5722_v11, %v7170_v5  ;;  %v7172_v41 = vmax.f32 %v5738_v34, %v5748_v3  ;;  %v7173_v33 = vld [vmem:[#allocation7_spill] sm:$0xff] }
 0x2ca   : > { %v2365_v45 = vmax.f32 %v7169_v12, %v6277_v61  ;;  %v3156_v4 = vadd.f32 %v3124_v25, %v3060_v44  ;;  %v2841_v31 = vadd.f32 %v6360_v40, %v2809_v14  ;;  %4200 = vpow2.f32 %v2468_v15 }
 0x2cb   : > { %v2364_v55 = vmax.f32 %v7171_v20, %v6329_v1  ;;  %v2363_v2 = vmax.f32 %v7172_v41, %v6345_v57  ;;  %v2422_v10 = vsub.f32 %v5702_v13, %v2390_v35  ;;  %v4187_v54 = vpop.eup %4186  ;;  %4202 = vpow2.f32 %v2564_v29 }
 0x2cc   : > { %v2518_v17 = vsub.f32 %v5712_v27, %v2390_v35  ;;  %v2614_v60 = vsub.f32 %v6258_v58, %v2390_v35  ;;  %v2710_v23 = vsub.f32 %v6297_v51, %v2390_v35  ;;  %v6379_v62 = vpop.eup %4188  ;;  %v3252_v9 = vadd.f32 %v3220_v32, %v3156_v4  ;;  %v4426_v51 = vld [vmem:[%s4880_s24 + $0x48] sm:$0xff] }
 0x2cd   : > { %v2931_v24 = vmul.f32 %v4187_v54, %v6267_v42  ;;  %v2995_v15 = vmul.f32 %v4187_v54, %v6271_v46  ;;  %v3091_v13 = vmul.f32 %v4187_v54, %v6279_v59  ;;  %v6384_v48 = vpop.eup %4190  ;;  %v3187_v27 = vmul.f32 %v4187_v54, %v6302_v47  ;;  %v4428_v42 = vld [vmem:[%s4880_s24 + $0x248] sm:$0xff]  ;;  %v6393_v46 = vpop.xlane.xlu0 %1896 }
 0x2ce   : > { %v2873_v38 = vadd.f32 %v6379_v62, %v2841_v31  ;;  %4204 = vpow2.f32 %v2660_v21  ;;  %v2466_v58 = vmul.f32 1.442695, %v2422_v10  ;;  %3284 = vst.msk [vmem:[%s6069_s12 + $0x50] sm:$0xff] %vm812_vm0, %v3252_v9  ;;  %v2562_v47 = vmul.f32 1.442695, %v2518_v17  ;;  %v6398_v21 = vpop.xlane.xlu1 %2284 }
 0x2cf   : > { %v2963_v37 = vmul.f32 %v4426_v51, %v2931_v24  ;;  %v3027_v0 = vmul.f32 %v4427_v18, %v2995_v15  ;;  %v3123_v29 = vmul.f32 %v4428_v42, %v3091_v13  ;;  %4206 = vpow2.f32 %v2756_v26  ;;  %v6395_v59 = vpop.eup %4192  ;;  %v7174_v26 = vld [vmem:[#allocation10_spill] sm:$0xff]  ;;  %v4431_v13 = vld [vmem:[%s4880_s24 + $0x140] sm:$0xff] }
 0x2d0   : > { %v3219_v39 = vmul.f32 %v4429_v7, %v3187_v27  ;;  %4208 = vrcp.f32 %v2873_v38  ;;  %v2658_v52 = vmul.f32 1.442695, %v2614_v60  ;;  %v2808_v49 = vadd.f32 %v6395_v59, %v6384_v48 }
 0x2d1   : > { %v3059_v43 = vadd.f32 %v3027_v0, %v2963_v37  ;;  %4210 = vpow2.f32 %v2466_v58  ;;  %v2754_v53 = vmul.f32 1.442695, %v2710_v23  ;;  %v6402_v25 = vpop.eup %4194  ;;  %v2397_v50 = vmax.f32 %v2365_v45, %v6317_v63  ;;  %v4433_v58 = vld [vmem:[%s4880_s24 + $0x340] sm:$0xff] }
 0x2d2   : > { %4212 = vpow2.f32 %v2562_v47  ;;  %v6406_v32 = vmax.f32 %v2364_v55, %v6358_v19  ;;  %v7175_v44 = vmax.f32 %v7173_v33, %v7174_v26  ;;  %v6414_v35 = vpop.eup %4196  ;;  %v2840_v20 = vadd.f32 %v6402_v25, %v2808_v49 }
 0x2d3   : > { %v3155_v12 = vadd.f32 %v3123_v29, %v3059_v43  ;;  %4214 = vpow2.f32 %v2658_v52  ;;  %v6418_v41 = vmax.f32 %v2363_v2, %v6398_v21  ;;  %v4199_v45 = vpop.eup %4198  ;;  %v2429_v55 = vsub.f32 %v7167_v8, %v2397_v50 }
 0x2d4   : > { %v6412_v14 = vmax.f32 %v7175_v44, %v6393_v46  ;;  %4216 = vpow2.f32 %v2754_v53  ;;  %v2525_v4 = vsub.f32 %v7168_v30, %v2397_v50  ;;  %v2621_v31 = vsub.f32 %v6277_v61, %v2397_v50  ;;  %v6423_v10 = vpop.eup %4200  ;;  %v4430_v61 = vld [vmem:[%s4880_s24 + $0x40] sm:$0xff] }
 0x2d5   : > { %v3251_v54 = vadd.f32 %v3219_v39, %v3155_v12  ;;  %v2930_v17 = vmul.f32 %v4199_v45, %v6307_v56  ;;  %v2994_v2 = vmul.f32 %v4199_v45, %v6312_v22  ;;  %v3090_v60 = vmul.f32 %v4199_v45, %v6319_v6  ;;  %v6428_v23 = vpop.eup %4202  ;;  %v4432_v56 = vld [vmem:[%s4880_s24 + $0x240] sm:$0xff] }
 0x2d6   : > { %v3186_v8 = vmul.f32 %v4199_v45, %v6336_v28  ;;  %v2872_v9 = vadd.f32 %v6414_v35, %v2840_v20  ;;  %v2480_v30 = vmul.f32 1.442695, %v2429_v55  ;;  %v2576_v24 = vmul.f32 1.442695, %v2525_v4  ;;  %v4434_v45 = vld [vmem:[%s4880_s24 + $0x78] sm:$0xff] }
 0x2d7   : > { %3283 = vst.msk [vmem:[%s6069_s12 + $0x48] sm:$0xff] %vm812_vm0, %v3251_v54  ;;  %v2962_v15 = vmul.f32 %v4430_v61, %v2930_v17  ;;  %v3026_v27 = vmul.f32 %v4431_v13, %v2994_v2  ;;  %v3122_v38 = vmul.f32 %v4432_v56, %v3090_v60  ;;  %v2807_v22 = vadd.f32 %v6428_v23, %v6423_v10 }
 0x2d8   : > { %v6439_v6 = vpop.eup %4204  ;;  %v3218_v51 = vmul.f32 %v4433_v58, %v3186_v8  ;;  %4218 = vrcp.f32 %v2872_v9  ;;  %v2672_v28 = vmul.f32 1.442695, %v2621_v31  ;;  %v2717_v37 = vsub.f32 %v6317_v63, %v2397_v50 }
 0x2d9   : > { %v6443_v18 = vpop.eup %4206  ;;  %v3058_v0 = vadd.f32 %v3026_v27, %v2962_v15  ;;  %v2839_v42 = vadd.f32 %v6439_v6, %v2807_v22  ;;  %4220 = vpow2.f32 %v2480_v30  ;;  %v2428_v29 = vsub.f32 %v5722_v11, %v6406_v32 }
 0x2da   : > { %v4209_v7 = vpop.eup %4208  ;;  %4222 = vpow2.f32 %v2576_v24  ;;  %v2768_v39 = vmul.f32 1.442695, %v2717_v37  ;;  %v2524_v47 = vsub.f32 %v7170_v5, %v6406_v32  ;;  %v2620_v63 = vsub.f32 %v6329_v1, %v6406_v32 }
 0x2db   : > { %v6452_v52 = vpop.eup %4210  ;;  %v3154_v43 = vadd.f32 %v3122_v38, %v3058_v0  ;;  %v2937_v49 = vmul.f32 %v4209_v7, %v6340_v36  ;;  %v3001_v53 = vmul.f32 %v4209_v7, %v6347_v16  ;;  %v3097_v11 = vmul.f32 %v4209_v7, %v6360_v40  ;;  %v4435_v36 = vld [vmem:[%s4880_s24 + $0x178] sm:$0xff] }
 0x2dc   : > { %v6457_v50 = vpop.eup %4212  ;;  %v3193_v44 = vmul.f32 %v4209_v7, %v6379_v62  ;;  %v2871_v5 = vadd.f32 %v6443_v18, %v2839_v42  ;;  %4224 = vpow2.f32 %v2672_v28  ;;  %v2478_v1 = vmul.f32 1.442695, %v2428_v29  ;;  %v4436_v16 = vld [vmem:[%s4880_s24 + $0x278] sm:$0xff]  ;;  %v6495_v29 = vpop.xlane.xlu1 %1910  ;;  %v4439_v7 = vld [vmem:[%s4880_s24 + $0x170] sm:$0xff] }
 0x2dd   : > { %v6461_v12 = vpop.eup %4214  ;;  %v3250_v20 = vadd.f32 %v3218_v51, %v3154_v43  ;;  %v2969_v55 = vmul.f32 %v4434_v45, %v2937_v49  ;;  %v3033_v4 = vmul.f32 %v4435_v36, %v3001_v53  ;;  %v3129_v31 = vmul.f32 %v4436_v16, %v3097_v11  ;;  %v4437_v40 = vld [vmem:[%s4880_s24 + $0x378] sm:$0xff] }
 0x2de   : > { %v6466_v54 = vpop.eup %4216  ;;  %v3225_v17 = vmul.f32 %v4437_v40, %v3193_v44  ;;  %4226 = vrcp.f32 %v2871_v5  ;;  %v2806_v62 = vadd.f32 %v6457_v50, %v6452_v52  ;;  %v2574_v2 = vmul.f32 1.442695, %v2524_v47  ;;  %v7176_v44 = vld [vmem:[#allocation8_spill] sm:$0xff]  ;;  %v7177_v5 = vld [vmem:[#allocation11_spill] sm:$0xff] }
 0x2df   : > { %3282 = vst.msk [vmem:[%s6069_s12 + $0x40] sm:$0xff] %vm812_vm0, %v3250_v20  ;;  %v3065_v60 = vadd.f32 %v3033_v4, %v2969_v55  ;;  %4228 = vpow2.f32 %v2768_v39  ;;  %v2670_v8 = vmul.f32 1.442695, %v2620_v63  ;;  %v2716_v9 = vsub.f32 %v6358_v19, %v6406_v32  ;;  %v4440_v39 = vld [vmem:[%s4880_s24 + $0x270] sm:$0xff] }
 0x2e0   : > { %v2838_v30 = vadd.f32 %v6461_v12, %v2806_v62  ;;  %4230 = vpow2.f32 %v2478_v1  ;;  %v2427_v24 = vsub.f32 %v5738_v34, %v6418_v41  ;;  %v2523_v61 = vsub.f32 %v5748_v3, %v6418_v41 }
 0x2e1   : > { %v3161_v15 = vadd.f32 %v3129_v31, %v3065_v60  ;;  %4232 = vpow2.f32 %v2574_v2  ;;  %v2766_v13 = vmul.f32 1.442695, %v2716_v9  ;;  %v2619_v27 = vsub.f32 %v6345_v57, %v6418_v41  ;;  %v6488_v57 = vpop.xlane.xlu0 %2282 }
 0x2e2   : > { %v4219_v56 = vpop.eup %4218  ;;  %v2870_v38 = vadd.f32 %v6466_v54, %v2838_v30  ;;  %4234 = vpow2.f32 %v2670_v8  ;;  %v2476_v19 = vmul.f32 1.442695, %v2427_v24  ;;  %v2572_v32 = vmul.f32 1.442695, %v2523_v61  ;;  %v2297_v61 = vpop.xlane.xlu1 %2296 }
 0x2e3   : > { %v6483_v22 = vpop.eup %4220  ;;  %v3257_v34 = vadd.f32 %v3225_v17, %v3161_v15  ;;  %v2936_v3 = vmul.f32 %v4219_v56, %v6384_v48  ;;  %v3000_v58 = vmul.f32 %v4219_v56, %v6395_v59  ;;  %v3096_v51 = vmul.f32 %v4219_v56, %v6402_v25  ;;  %v4438_v48 = vld [vmem:[%s4880_s24 + $0x70] sm:$0xff] }
 0x2e4   : > { %v6490_v28 = vpop.eup %4222  ;;  %v3192_v37 = vmul.f32 %v4219_v56, %v6414_v35  ;;  %4236 = vrcp.f32 %v2870_v38  ;;  %v2668_v0 = vmul.f32 1.442695, %v2619_v27  ;;  %v2715_v42 = vsub.f32 %v6398_v21, %v6418_v41  ;;  %v4441_v35 = vld [vmem:[%s4880_s24 + $0x370] sm:$0xff] }
 0x2e5   : > { %3289 = vst.msk [vmem:[%s6069_s12 + $0x78] sm:$0xff] %vm812_vm0, %v3257_v34  ;;  %v2968_v59 = vmul.f32 %v4438_v48, %v2936_v3  ;;  %v3032_v25 = vmul.f32 %v4439_v7, %v3000_v58  ;;  %v3128_v47 = vmul.f32 %v4440_v39, %v3096_v51  ;;  %v2813_v63 = vadd.f32 %v6490_v28, %v6483_v22  ;;  %v6522_v62 = vpop.xlane.xlu0 %1908  ;;  %v7179_v58 = vld [vmem:[#allocation13_spill] sm:$0xff]  ;;  %v7180_v51 = vld [vmem:[#allocation14_spill] sm:$0xff] }
 0x2e6   : > { %v6504_v43 = vpop.eup %4224  ;;  %v3224_v49 = vmul.f32 %v4441_v35, %v3192_v37  ;;  %4238 = vpow2.f32 %v2766_v13  ;;  %v2764_v53 = vmul.f32 1.442695, %v2715_v42  ;;  %v2394_v21 = vmax.f32 %v6412_v14, %v6488_v57  ;;  %v4445_v13 = vld [vmem:[%s4880_s24 + $0x368] sm:$0xff] }
 0x2e7   : > { %v3064_v41 = vadd.f32 %v3032_v25, %v2968_v59  ;;  %v2845_v11 = vadd.f32 %v6504_v43, %v2813_v63  ;;  %4240 = vpow2.f32 %v2476_v19  ;;  %v7178_v1 = vmax.f32 %v7176_v44, %v7177_v5 }
 0x2e8   : > { %v4227_v45 = vpop.eup %4226  ;;  %4242 = vpow2.f32 %v2572_v32  ;;  %v2426_v55 = vsub.f32 %v7173_v33, %v2394_v21  ;;  %v2522_v36 = vsub.f32 %v7174_v26, %v2394_v21  ;;  %v2618_v4 = vsub.f32 %v6393_v46, %v2394_v21 }
 0x2e9   : > { %v2369_v20 = vmax.f32 %v7178_v1, %v6495_v29  ;;  %v6517_v14 = vpop.eup %4228  ;;  %v3160_v16 = vadd.f32 %v3128_v47, %v3064_v41  ;;  %v2935_v31 = vmul.f32 %v4227_v45, %v6423_v10  ;;  %v2999_v40 = vmul.f32 %v4227_v45, %v6428_v23  ;;  %v4442_v10 = vld [vmem:[%s4880_s24 + $0x68] sm:$0xff]  ;;  %v6549_v25 = vpop.xlane.xlu0 %2294 }
 0x2ea   : > { %v3095_v17 = vmul.f32 %v4227_v45, %v6439_v6  ;;  %v6524_v33 = vpop.eup %4230  ;;  %v3191_v26 = vmul.f32 %v4227_v45, %v6443_v18  ;;  %v2877_v46 = vadd.f32 %v6517_v14, %v2845_v11  ;;  %4244 = vpow2.f32 %v2668_v0  ;;  %v4443_v23 = vld [vmem:[%s4880_s24 + $0x168] sm:$0xff]  ;;  %v6560_v1 = vpop.xlane.xlu1 %1906  ;;  %v4449_v45 = vld [vmem:[%s4880_s24 + $0x360] sm:$0xff] }
 0x2eb   : > { %v2474_v2 = vmul.f32 1.442695, %v2426_v55  ;;  %v6528_v60 = vpop.eup %4232  ;;  %v3256_v8 = vadd.f32 %v3224_v49, %v3160_v16  ;;  %v2967_v9 = vmul.f32 %v4442_v10, %v2935_v31  ;;  %v3031_v30 = vmul.f32 %v4443_v23, %v2999_v40  ;;  %v4444_v6 = vld [vmem:[%s4880_s24 + $0x268] sm:$0xff] }
 0x2ec   : > { %v3127_v24 = vmul.f32 %v4444_v6, %v3095_v17  ;;  %v6533_v15 = vpop.eup %4234  ;;  %v3223_v27 = vmul.f32 %v4445_v13, %v3191_v26  ;;  %4246 = vrcp.f32 %v2877_v46  ;;  %v2812_v18 = vadd.f32 %v6528_v60, %v6524_v33 }
 0x2ed   : > { %v2570_v56 = vmul.f32 1.442695, %v2522_v36  ;;  %3288 = vst.msk [vmem:[%s6069_s12 + $0x70] sm:$0xff] %vm812_vm0, %v3256_v8  ;;  %v3063_v38 = vadd.f32 %v3031_v30, %v2967_v9  ;;  %4248 = vpow2.f32 %v2764_v53  ;;  %v2666_v19 = vmul.f32 1.442695, %v2618_v4  ;;  %v6576_v10 = vpop.xlane.xlu0 %1904 }
 0x2ee   : > { %v2714_v32 = vsub.f32 %v6488_v57, %v2394_v21  ;;  %v4237_v34 = vpop.eup %4236  ;;  %v2844_v3 = vadd.f32 %v6533_v15, %v2812_v18  ;;  %4250 = vpow2.f32 %v2474_v2  ;;  %v7181_v37 = vmax.f32 %v7179_v58, %v7180_v51  ;;  %v6585_v18 = vpop.xlane.xlu1 %2292 }
 0x2ef   : > { %v2401_v42 = vmax.f32 %v2369_v20, %v2297_v61  ;;  %v3159_v48 = vadd.f32 %v3127_v24, %v3063_v38  ;;  %v2934_v59 = vmul.f32 %v4237_v34, %v6452_v52  ;;  %v2998_v7 = vmul.f32 %v4237_v34, %v6457_v50  ;;  %v4446_v52 = vld [vmem:[%s4880_s24 + $0x60] sm:$0xff] }
 0x2f0   : > { %v2368_v0 = vmax.f32 %v7181_v37, %v6522_v62  ;;  %v3094_v57 = vmul.f32 %v4237_v34, %v6461_v12  ;;  %v6551_v39 = vpop.eup %4238  ;;  %v3190_v47 = vmul.f32 %v4237_v34, %v6466_v54  ;;  %4252 = vpow2.f32 %v2570_v56  ;;  %v4447_v50 = vld [vmem:[%s4880_s24 + $0x160] sm:$0xff]  ;;  %v4450_v34 = vld [vmem:[%s4880_s24 + $0x98] sm:$0xff] }
 0x2f1   : > { %v2762_v63 = vmul.f32 1.442695, %v2714_v32  ;;  %v2433_v35 = vsub.f32 %v7176_v44, %v2401_v42  ;;  %v6555_v49 = vpop.eup %4240  ;;  %v3255_v53 = vadd.f32 %v3223_v27, %v3159_v48  ;;  %v2966_v21 = vmul.f32 %v4446_v52, %v2934_v59  ;;  %v4448_v12 = vld [vmem:[%s4880_s24 + $0x260] sm:$0xff]  ;;  %v4453_v37 = vld [vmem:[%s4880_s24 + $0x398] sm:$0xff] }
 0x2f2   : > { %v3030_v41 = vmul.f32 %v4447_v50, %v2998_v7  ;;  %v3126_v11 = vmul.f32 %v4448_v12, %v3094_v57  ;;  %v6562_v20 = vpop.eup %4242  ;;  %v3222_v54 = vmul.f32 %v4449_v45, %v3190_v47  ;;  %v2876_v55 = vadd.f32 %v6551_v39, %v2844_v3  ;;  %v6603_v57 = vpop.xlane.xlu0 %2290  ;;  %v7186_v50 = vld [vmem:[#allocation15_spill] sm:$0xff] }
 0x2f3   : > { %4254 = vpow2.f32 %v2666_v19  ;;  %v2488_v44 = vmul.f32 1.442695, %v2433_v35  ;;  %3287 = vst.msk [vmem:[%s6069_s12 + $0x68] sm:$0xff] %vm812_vm0, %v3255_v53  ;;  %v2811_v4 = vadd.f32 %v6562_v20, %v6555_v49  ;;  %v2529_v16 = vsub.f32 %v7177_v5, %v2401_v42  ;;  %v7182_v35 = vld [vmem:[#allocation12_spill] sm:$0xff] }
 0x2f4   : > { %v3062_v36 = vadd.f32 %v3030_v41, %v2966_v21  ;;  %4256 = vpow2.f32 %v2762_v63  ;;  %v6571_v31 = vpop.eup %4244  ;;  %v2625_v40 = vsub.f32 %v6495_v29, %v2401_v42  ;;  %v2721_v17 = vsub.f32 %v2297_v61, %v2401_v42  ;;  %v7183_v53 = vld [vmem:[#allocation16_spill] sm:$0xff] }
 0x2f5   : > { %4258 = vrcp.f32 %v2876_v55  ;;  %v2400_v26 = vmax.f32 %v2368_v0, %v6549_v25  ;;  %v2843_v2 = vadd.f32 %v6571_v31, %v2811_v4  ;;  %v2584_v8 = vmul.f32 1.442695, %v2529_v16  ;;  %v6618_v55 = vpop.xlane.xlu1 %1918  ;;  %v7189_v4 = vld [vmem:[#allocation32_spill] sm:$0xff] }
 0x2f6   : > { %v3158_v46 = vadd.f32 %v3126_v11, %v3062_v36  ;;  %4260 = vpow2.f32 %v2488_v44  ;;  %v4247_v9 = vpop.eup %4246  ;;  %v2680_v23 = vmul.f32 1.442695, %v2625_v40  ;;  %v2776_v5 = vmul.f32 1.442695, %v2721_v17  ;;  %v7188_v36 = vld [vmem:[#allocation34_spill] sm:$0xff] }
 0x2f7   : > { %v2432_v30 = vsub.f32 %v7179_v58, %v2400_v26  ;;  %v2528_v29 = vsub.f32 %v7180_v51, %v2400_v26  ;;  %v6580_v6 = vpop.eup %4248  ;;  %v2941_v61 = vmul.f32 %v4247_v9, %v6483_v22  ;;  %v3005_v13 = vmul.f32 %v4247_v9, %v6490_v28  ;;  %v4451_v22 = vld [vmem:[%s4880_s24 + $0x198] sm:$0xff] }
 0x2f8   : > { %v3254_v24 = vadd.f32 %v3222_v54, %v3158_v46  ;;  %v3101_v27 = vmul.f32 %v4247_v9, %v6504_v43  ;;  %v6587_v56 = vpop.eup %4250  ;;  %v3197_v38 = vmul.f32 %v4247_v9, %v6517_v14  ;;  %v2875_v19 = vadd.f32 %v6580_v6, %v2843_v2  ;;  %v4452_v28 = vld [vmem:[%s4880_s24 + $0x298] sm:$0xff] }
 0x2f9   : > { %4262 = vpow2.f32 %v2584_v8  ;;  %v2486_v32 = vmul.f32 1.442695, %v2432_v30  ;;  %v2973_v3 = vmul.f32 %v4450_v34, %v2941_v61  ;;  %v3037_v58 = vmul.f32 %v4451_v22, %v3005_v13  ;;  %v4455_v61 = vld [vmem:[%s4880_s24 + $0x190] sm:$0xff] }
 0x2fa   : > { %3286 = vst.msk [vmem:[%s6069_s12 + $0x60] sm:$0xff] %vm812_vm0, %v3254_v24  ;;  %v3133_v51 = vmul.f32 %v4452_v28, %v3101_v27  ;;  %4264 = vpow2.f32 %v2680_v23  ;;  %v6596_v43 = vpop.eup %4252  ;;  %v3229_v0 = vmul.f32 %v4453_v37, %v3197_v38  ;;  %v2582_v42 = vmul.f32 1.442695, %v2528_v29  ;;  %v4454_v29 = vld [vmem:[%s4880_s24 + $0x90] sm:$0xff] }
 0x2fb   : > { %4266 = vrcp.f32 %v2875_v19  ;;  %v2624_v14 = vsub.f32 %v6522_v62, %v2400_v26  ;;  %v3069_v48 = vadd.f32 %v3037_v58, %v2973_v3  ;;  %v2810_v59 = vadd.f32 %v6596_v43, %v6587_v56  ;;  %v7185_v62 = vld [vmem:[#allocation19_spill] sm:$0xff]  ;;  %v4456_v27 = vld [vmem:[%s4880_s24 + $0x290] sm:$0xff] }
 0x2fc   : > { %4268 = vpow2.f32 %v2776_v5  ;;  %v2720_v7 = vsub.f32 %v6549_v25, %v2400_v26  ;;  %v7184_v52 = vmax.f32 %v7182_v35, %v7183_v53  ;;  %v7187_v41 = vmax.f32 %v7185_v62, %v7186_v50 }
 0x2fd   : > { %v6605_v47 = vpop.eup %4254  ;;  %4270 = vpow2.f32 %v2486_v32  ;;  %v2678_v63 = vmul.f32 1.442695, %v2624_v14  ;;  %v3165_v45 = vadd.f32 %v3133_v51, %v3069_v48  ;;  %v2343_v16 = vmax.f32 %v7189_v4, %v7188_v36  ;;  %v6649_v51 = vpop.xlane.xlu1 %2304 }
 0x2fe   : > { %v2367_v21 = vmax.f32 %v7184_v52, %v6560_v1  ;;  %v2366_v12 = vmax.f32 %v7187_v41, %v6576_v10  ;;  %v6615_v11 = vpop.eup %4256  ;;  %v2842_v25 = vadd.f32 %v6605_v47, %v2810_v59  ;;  %4272 = vpow2.f32 %v2582_v42 }
 0x2ff   : > { %v2774_v54 = vmul.f32 1.442695, %v2720_v7  ;;  %v4259_v44 = vpop.eup %4258  ;;  %4274 = vpow2.f32 %v2678_v63  ;;  %v3261_v46 = vadd.f32 %v3229_v0, %v3165_v45  ;;  %v6660_v63 = vpop.xlane.xlu0 %1916 }
 0x300   : > { %v2399_v40 = vmax.f32 %v2367_v21, %v6585_v18  ;;  %v6624_v17 = vmax.f32 %v2366_v12, %v6603_v57  ;;  %v6626_v26 = vpop.eup %4260  ;;  %v2940_v2 = vmul.f32 %v4259_v44, %v6524_v33  ;;  %v3004_v8 = vmul.f32 %v4259_v44, %v6528_v60  ;;  %v7190_v21 = vld [vmem:[#allocation20_spill] sm:$0xff] }
 0x301   : > { %v3100_v9 = vmul.f32 %v4259_v44, %v6533_v15  ;;  %v3196_v23 = vmul.f32 %v4259_v44, %v6551_v39  ;;  %v2874_v5 = vadd.f32 %v6615_v11, %v2842_v25  ;;  %4276 = vpow2.f32 %v2774_v54  ;;  %3293 = vst.msk [vmem:[%s6069_s12 + $0x98] sm:$0xff] %vm812_vm0, %v3261_v46  ;;  %v4457_v15 = vld [vmem:[%s4880_s24 + $0x390] sm:$0xff]  ;;  %v4458_v12 = vld [vmem:[%s4880_s24 + $0x88] sm:$0xff] }
 0x302   : > { %v2431_v30 = vsub.f32 %v7182_v35, %v2399_v40  ;;  %v2972_v24 = vmul.f32 %v4454_v29, %v2940_v2  ;;  %v3036_v13 = vmul.f32 %v4455_v61, %v3004_v8  ;;  %v2527_v38 = vsub.f32 %v7183_v53, %v2399_v40 }
 0x303   : > { %v3132_v33 = vmul.f32 %v4456_v27, %v3100_v9  ;;  %v6640_v60 = vpop.eup %4262  ;;  %v3228_v19 = vmul.f32 %v4457_v15, %v3196_v23  ;;  %4278 = vrcp.f32 %v2874_v5  ;;  %v2623_v32 = vsub.f32 %v6560_v1, %v2399_v40  ;;  %v4461_v27 = vld [vmem:[%s4880_s24 + $0x388] sm:$0xff]  ;;  %v6693_v15 = vpop.xlane.xlu0 %2302 }
 0x304   : > { %v2484_v39 = vmul.f32 1.442695, %v2431_v30  ;;  %v6644_v34 = vpop.eup %4264  ;;  %v3068_v3 = vadd.f32 %v3036_v13, %v2972_v24  ;;  %v2817_v22 = vadd.f32 %v6640_v60, %v6626_v26  ;;  %v2580_v58 = vmul.f32 1.442695, %v2527_v38  ;;  %v6682_v30 = vpop.xlane.xlu1 %1914 }
 0x305   : > { %v2719_v28 = vsub.f32 %v6585_v18, %v2399_v40  ;;  %v4267_v37 = vpop.eup %4266  ;;  %v2676_v0 = vmul.f32 1.442695, %v2623_v32  ;;  %v2430_v42 = vsub.f32 %v7185_v62, %v6624_v17  ;;  %v2526_v1 = vsub.f32 %v7186_v50, %v6624_v17  ;;  %v7191_v62 = vld [vmem:[#allocation22_spill] sm:$0xff]  ;;  %v4460_v40 = vld [vmem:[%s4880_s24 + $0x288] sm:$0xff] }
 0x306   : > { %4280 = vpow2.f32 %v2484_v39  ;;  %v6655_v14 = vpop.eup %4268  ;;  %v3164_v48 = vadd.f32 %v3132_v33, %v3068_v3  ;;  %v2939_v59 = vmul.f32 %v4267_v37, %v6555_v49  ;;  %v3003_v18 = vmul.f32 %v4267_v37, %v6562_v20 }
 0x307   : > { %v3099_v7 = vmul.f32 %v4267_v37, %v6571_v31  ;;  %v6662_v35 = vpop.eup %4270  ;;  %v2849_v53 = vadd.f32 %v6644_v34, %v2817_v22  ;;  %4282 = vpow2.f32 %v2580_v58  ;;  %v2772_v52 = vmul.f32 1.442695, %v2719_v28  ;;  %v4459_v31 = vld [vmem:[%s4880_s24 + $0x188] sm:$0xff] }
 0x308   : > { %v7192_v50 = vmax.f32 %v7190_v21, %v7191_v62  ;;  %v6669_v49 = vpop.eup %4272  ;;  %v3260_v20 = vadd.f32 %v3228_v19, %v3164_v48  ;;  %v2971_v45 = vmul.f32 %v4458_v12, %v2939_v59  ;;  %v3035_v25 = vmul.f32 %v4459_v31, %v3003_v18  ;;  %v4463_v48 = vld [vmem:[%s4880_s24 + $0x180] sm:$0xff] }
 0x309   : > { %v3195_v54 = vmul.f32 %v4267_v37, %v6580_v6  ;;  %v6674_v44 = vpop.eup %4274  ;;  %v3131_v46 = vmul.f32 %v4460_v40, %v3099_v7  ;;  %v2881_v2 = vadd.f32 %v6655_v14, %v2849_v53  ;;  %v2816_v8 = vadd.f32 %v6669_v49, %v6662_v35  ;;  %v6712_v7 = vpop.xlane.xlu1 %2300  ;;  %v4464_v53 = vld [vmem:[%s4880_s24 + $0x280] sm:$0xff] }
 0x30a   : > { %v2373_v41 = vmax.f32 %v7192_v50, %v6618_v55  ;;  %4284 = vpow2.f32 %v2676_v0  ;;  %3292 = vst.msk [vmem:[%s6069_s12 + $0x90] sm:$0xff] %vm812_vm0, %v3260_v20  ;;  %v3067_v9 = vadd.f32 %v3035_v25, %v2971_v45  ;;  %v2482_v23 = vmul.f32 1.442695, %v2430_v42  ;;  %v4462_v42 = vld [vmem:[%s4880_s24 + $0x80] sm:$0xff]  ;;  %v6721_v45 = vpop.xlane.xlu0 %1912 }
 0x30b   : > { %4286 = vpow2.f32 %v2772_v52  ;;  %v2578_v5 = vmul.f32 1.442695, %v2526_v1  ;;  %v6684_v6 = vpop.eup %4276  ;;  %v2848_v29 = vadd.f32 %v6674_v44, %v2816_v8  ;;  %v2622_v24 = vsub.f32 %v6576_v10, %v6624_v17  ;;  %v4465_v25 = vld [vmem:[%s4880_s24 + $0x380] sm:$0xff] }
 0x30c   : > { %4288 = vrcp.f32 %v2881_v2  ;;  %v2718_v61 = vsub.f32 %v6603_v57, %v6624_v17  ;;  %v3163_v13 = vadd.f32 %v3131_v46, %v3067_v9  ;;  %v3227_v33 = vmul.f32 %v4461_v27, %v3195_v54  ;;  %v7196_v46 = vld [vmem:[#allocation24_spill] sm:$0xff]  ;;  %v7197_v2 = vld [vmem:[#allocation26_spill] sm:$0xff]  ;;  %v7199_v27 = vld [vmem:[#allocation25_spill] sm:$0xff] }
 0x30d   : > { %4290 = vpow2.f32 %v2482_v23  ;;  %v2405_v38 = vmax.f32 %v2373_v41, %v6649_v51  ;;  %v4279_v19 = vpop.eup %4278  ;;  %v2880_v39 = vadd.f32 %v6684_v6, %v2848_v29  ;;  %v2674_v32 = vmul.f32 1.442695, %v2622_v24 }
 0x30e   : > { %4292 = vpow2.f32 %v2578_v5  ;;  %v2770_v10 = vmul.f32 1.442695, %v2718_v61  ;;  %v3259_v3 = vadd.f32 %v3227_v33, %v3163_v13  ;;  %v2938_v57 = vmul.f32 %v4279_v19, %v6587_v56  ;;  %v7200_v33 = vld [vmem:[#allocation27_spill] sm:$0xff] }
 0x30f   : > { %v3002_v17 = vmul.f32 %v4279_v19, %v6596_v43  ;;  %v3098_v22 = vmul.f32 %v4279_v19, %v6605_v47  ;;  %v3194_v28 = vmul.f32 %v4279_v19, %v6615_v11  ;;  %4294 = vrcp.f32 %v2880_v39  ;;  %v7193_v43 = vld [vmem:[#allocation21_spill] sm:$0xff]  ;;  %v7194_v47 = vld [vmem:[#allocation23_spill] sm:$0xff] }
 0x310   : > { %v6699_v58 = vpop.eup %4280  ;;  %v2437_v37 = vsub.f32 %v7190_v21, %v2405_v38  ;;  %v2533_v0 = vsub.f32 %v7191_v62, %v2405_v38  ;;  %3291 = vst.msk [vmem:[%s6069_s12 + $0x88] sm:$0xff] %vm812_vm0, %v3259_v3  ;;  %v2970_v1 = vmul.f32 %v4462_v42, %v2938_v57  ;;  %4296 = vpow2.f32 %v2674_v32 }
 0x311   : > { %v3034_v56 = vmul.f32 %v4463_v48, %v3002_v17  ;;  %v7195_v59 = vmax.f32 %v7193_v43, %v7194_v47  ;;  %v6714_v11 = vpop.eup %4282  ;;  %v3130_v52 = vmul.f32 %v4464_v53, %v3098_v22  ;;  %4298 = vpow2.f32 %v2770_v10  ;;  %v6747_v17 = vpop.xlane.xlu1 %1926 }
 0x312   : > { %v2496_v21 = vmul.f32 1.442695, %v2437_v37  ;;  %v2592_v62 = vmul.f32 1.442695, %v2533_v0  ;;  %v2815_v41 = vadd.f32 %v6714_v11, %v6699_v58  ;;  %v2629_v20 = vsub.f32 %v6618_v55, %v2405_v38 }
 0x313   : > { %v2372_v18 = vmax.f32 %v7195_v59, %v6660_v63  ;;  %v3066_v50 = vadd.f32 %v3034_v56, %v2970_v1  ;;  %v2725_v12 = vsub.f32 %v6649_v51, %v2405_v38  ;;  %v3226_v54 = vmul.f32 %v4465_v25, %v3194_v28  ;;  %v4469_v59 = vld [vmem:[%s4880_s24 + $0x3b8] sm:$0xff] }
 0x314   : > { %v6723_v31 = vpop.eup %4284  ;;  %4300 = vpow2.f32 %v2496_v21  ;;  %v7198_v8 = vmax.f32 %v7196_v46, %v7197_v2  ;;  %v2688_v5 = vmul.f32 1.442695, %v2629_v20  ;;  %v7201_v38 = vmax.f32 %v7199_v27, %v7200_v33 }
 0x315   : > { %v2404_v40 = vmax.f32 %v2372_v18, %v6693_v15  ;;  %v6733_v23 = vpop.eup %4286  ;;  %v3162_v55 = vadd.f32 %v3130_v52, %v3066_v50  ;;  %v2847_v51 = vadd.f32 %v6723_v31, %v2815_v41  ;;  %4302 = vpow2.f32 %v2592_v62  ;;  %v6767_v50 = vpop.xlane.xlu0 %2298 }
 0x316   : > { %v6731_v9 = vmax.f32 %v7198_v8, %v6682_v30  ;;  %v4289_v29 = vpop.eup %4288  ;;  %v2784_v24 = vmul.f32 1.442695, %v2725_v12  ;;  %v2370_v19 = vmax.f32 %v7201_v38, %v6721_v45  ;;  %4304 = vpow2.f32 %v2688_v5  ;;  %v6776_v5 = vpop.xlane.xlu1 %1922 }
 0x317   : > { %v2436_v61 = vsub.f32 %v7193_v43, %v2404_v40  ;;  %v2532_v13 = vsub.f32 %v7194_v47, %v2404_v40  ;;  %v6742_v39 = vpop.eup %4290  ;;  %v3258_v32 = vadd.f32 %v3226_v54, %v3162_v55  ;;  %v2945_v10 = vmul.f32 %v4289_v29, %v6626_v26  ;;  %v4466_v26 = vld [vmem:[%s4880_s24 + $0xb8] sm:$0xff]  ;;  %v4470_v55 = vld [vmem:[%s4880_s24 + $0xb0] sm:$0xff] }
 0x318   : > { %v3009_v3 = vmul.f32 %v4289_v29, %v6640_v60  ;;  %v3105_v57 = vmul.f32 %v4289_v29, %v6644_v34  ;;  %v6749_v22 = vpop.eup %4292  ;;  %v3201_v28 = vmul.f32 %v4289_v29, %v6655_v14  ;;  %v2879_v37 = vadd.f32 %v6733_v23, %v2847_v51  ;;  %v4467_v60 = vld [vmem:[%s4880_s24 + $0x1b8] sm:$0xff]  ;;  %v4472_v29 = vld [vmem:[%s4880_s24 + $0x2b0] sm:$0xff] }
 0x319   : > { %v2628_v0 = vsub.f32 %v6660_v63, %v2404_v40  ;;  %3290 = vst.msk [vmem:[%s6069_s12 + $0x80] sm:$0xff] %vm812_vm0, %v3258_v32  ;;  %v2977_v42 = vmul.f32 %v4466_v26, %v2945_v10  ;;  %v2814_v34 = vadd.f32 %v6749_v22, %v6742_v39  ;;  %v2494_v48 = vmul.f32 1.442695, %v2436_v61  ;;  %v4295_v56 = vpop.eup %4294  ;;  %v4468_v43 = vld [vmem:[%s4880_s24 + $0x2b8] sm:$0xff]  ;;  %v6794_v26 = vpop.xlane.xlu0 %1924 }
 0x31a   : > { %v3041_v1 = vmul.f32 %v4467_v60, %v3009_v3  ;;  %v3137_v47 = vmul.f32 %v4468_v43, %v3105_v57  ;;  %v3233_v14 = vmul.f32 %v4469_v59, %v3201_v28  ;;  %4306 = vrcp.f32 %v2879_v37  ;;  %v6762_v63 = vpop.eup %4296  ;;  %v7203_v60 = vld [vmem:[#allocation33_spill] sm:$0xff] }
 0x31b   : > { %v2590_v18 = vmul.f32 1.442695, %v2532_v13  ;;  %v2944_v52 = vmul.f32 %v4295_v56, %v6662_v35  ;;  %v3008_v21 = vmul.f32 %v4295_v56, %v6669_v49  ;;  %v3104_v62 = vmul.f32 %v4295_v56, %v6674_v44  ;;  %v6769_v41 = vpop.eup %4298  ;;  %v4471_v35 = vld [vmem:[%s4880_s24 + $0x1b0] sm:$0xff] }
 0x31c   : > { %v3073_v53 = vadd.f32 %v3041_v1, %v2977_v42  ;;  %v3200_v20 = vmul.f32 %v4295_v56, %v6684_v6  ;;  %v2846_v12 = vadd.f32 %v6762_v63, %v2814_v34  ;;  %v2686_v25 = vmul.f32 1.442695, %v2628_v0  ;;  %v7202_v42 = vld [vmem:[#allocation35_spill] sm:$0xff]  ;;  %v7205_v56 = vld [vmem:[#allocation30_spill] sm:$0xff] }
 0x31d   : > { %v2724_v54 = vsub.f32 %v6693_v15, %v2404_v40  ;;  %v2976_v51 = vmul.f32 %v4470_v55, %v2944_v52  ;;  %v3040_v49 = vmul.f32 %v4471_v35, %v3008_v21  ;;  %4308 = vpow2.f32 %v2784_v24  ;;  %v4473_v24 = vld [vmem:[%s4880_s24 + $0x3b0] sm:$0xff] }
 0x31e   : > { %v3169_v8 = vadd.f32 %v3137_v47, %v3073_v53  ;;  %v6778_v44 = vpop.eup %4300  ;;  %v3136_v61 = vmul.f32 %v4472_v29, %v3104_v62  ;;  %v2878_v6 = vadd.f32 %v6769_v41, %v2846_v12  ;;  %4310 = vpow2.f32 %v2494_v48  ;;  %v7204_v48 = vld [vmem:[#allocation28_spill] sm:$0xff] }
 0x31f   : > { %v2782_v13 = vmul.f32 1.442695, %v2724_v54  ;;  %v6782_v38 = vpop.eup %4302  ;;  %v3072_v40 = vadd.f32 %v3040_v49, %v2976_v51  ;;  %4312 = vpow2.f32 %v2590_v18  ;;  %v2403_v32 = vmax.f32 %v6731_v9, %v6712_v7  ;;  %v4475_v51 = vld [vmem:[%s4880_s24 + $0x1a8] sm:$0xff]  ;;  %v6823_v49 = vpop.xlane.xlu0 %1920 }
 0x320   : > { %v3265_v15 = vadd.f32 %v3233_v14, %v3169_v8  ;;  %v3232_v10 = vmul.f32 %v4473_v24, %v3200_v20  ;;  %4314 = vrcp.f32 %v2878_v6  ;;  %v2821_v3 = vadd.f32 %v6782_v38, %v6778_v44  ;;  %v6796_v9 = vpop.eup %4304  ;;  %v6807_v14 = vpop.xlane.xlu1 %2308 }
 0x321   : > { %v2402_v57 = vmax.f32 %v2370_v19, %v6767_v50  ;;  %v3168_v28 = vadd.f32 %v3136_v61, %v3072_v40  ;;  %4316 = vpow2.f32 %v2686_v25  ;;  %v2435_v37 = vsub.f32 %v7196_v46, %v2403_v32  ;;  %v4477_v61 = vld [vmem:[%s4880_s24 + $0x3a8] sm:$0xff] }
 0x322   : > { %3297 = vst.msk [vmem:[%s6069_s12 + $0xb8] sm:$0xff] %vm812_vm0, %v3265_v15  ;;  %v2531_v0 = vsub.f32 %v7197_v2, %v2403_v32  ;;  %v2342_v1 = vmax.f32 %v7203_v60, %v7202_v42  ;;  %v2627_v34 = vsub.f32 %v6682_v30, %v2403_v32  ;;  %v2723_v19 = vsub.f32 %v6712_v7, %v2403_v32 }
 0x323   : > { %v7206_v43 = vmax.f32 %v7204_v48, %v7205_v56  ;;  %v3264_v46 = vadd.f32 %v3232_v10, %v3168_v28  ;;  %4318 = vpow2.f32 %v2782_v13  ;;  %v2492_v2 = vmul.f32 1.442695, %v2435_v37 }
 0x324   : > { %v2434_v59 = vsub.f32 %v7199_v27, %v2402_v57  ;;  %v4307_v18 = vpop.eup %4306  ;;  %v2853_v53 = vadd.f32 %v6796_v9, %v2821_v3  ;;  %v2588_v30 = vmul.f32 1.442695, %v2531_v0  ;;  %v2684_v52 = vmul.f32 1.442695, %v2627_v34  ;;  %v6832_v32 = vpop.xlane.xlu1 %2312 }
 0x325   : > { %v2377_v47 = vmax.f32 %v7206_v43, %v6747_v17  ;;  %v2530_v7 = vsub.f32 %v7200_v33, %v2402_v57  ;;  %3296 = vst.msk [vmem:[%s6069_s12 + $0xb0] sm:$0xff] %vm812_vm0, %v3264_v46  ;;  %v2943_v21 = vmul.f32 %v4307_v18, %v6699_v58  ;;  %v3007_v62 = vmul.f32 %v4307_v18, %v6714_v11  ;;  %v4474_v33 = vld [vmem:[%s4880_s24 + $0xa8] sm:$0xff] }
 0x326   : > { %v3103_v27 = vmul.f32 %v4307_v18, %v6723_v31  ;;  %v3199_v20 = vmul.f32 %v4307_v18, %v6733_v23  ;;  %4320 = vpow2.f32 %v2492_v2  ;;  %v2780_v12 = vmul.f32 1.442695, %v2723_v19  ;;  %v4476_v23 = vld [vmem:[%s4880_s24 + $0x2a8] sm:$0xff]  ;;  %v4478_v18 = vld [vmem:[%s4880_s24 + $0xa0] sm:$0xff] }
 0x327   : > { %v2626_v25 = vsub.f32 %v6721_v45, %v2402_v57  ;;  %v2722_v54 = vsub.f32 %v6767_v50, %v2402_v57  ;;  %v6819_v8 = vpop.eup %4308  ;;  %v2975_v55 = vmul.f32 %v4474_v33, %v2943_v21  ;;  %v3039_v58 = vmul.f32 %v4475_v51, %v3007_v62  ;;  %v4481_v33 = vld [vmem:[%s4880_s24 + $0x3a0] sm:$0xff] }
 0x328   : > { %v2490_v35 = vmul.f32 1.442695, %v2434_v59  ;;  %v2586_v11 = vmul.f32 1.442695, %v2530_v7  ;;  %v6825_v31 = vpop.eup %4310  ;;  %v3135_v29 = vmul.f32 %v4476_v23, %v3103_v27  ;;  %v3231_v6 = vmul.f32 %v4477_v61, %v3199_v20 }
 0x329   : > { %v2885_v45 = vadd.f32 %v6819_v8, %v2853_v53  ;;  %4322 = vpow2.f32 %v2588_v30  ;;  %v6830_v50 = vpop.eup %4312  ;;  %v3071_v13 = vadd.f32 %v3039_v58, %v2975_v55  ;;  %v2682_v15 = vmul.f32 1.442695, %v2626_v25 }
 0x32a   : > { %4324 = vpow2.f32 %v2684_v52  ;;  %v2778_v40 = vmul.f32 1.442695, %v2722_v54  ;;  %v4315_v24 = vpop.eup %4314  ;;  %v2820_v10 = vadd.f32 %v6830_v50, %v6825_v31  ;;  %v2375_v3 = vmax.f32 %v2343_v16, %v6776_v5 }
 0x32b   : > { %4326 = vrcp.f32 %v2885_v45  ;;  %v2374_v57 = vmax.f32 %v2342_v1, %v6823_v49  ;;  %v6841_v28 = vpop.eup %4316  ;;  %v3167_v37 = vadd.f32 %v3135_v29, %v3071_v13  ;;  %v2942_v0 = vmul.f32 %v4315_v24, %v6742_v39  ;;  %v4479_v39 = vld [vmem:[%s4880_s24 + $0x1a0] sm:$0xff] }
 0x32c   : > { %v3006_v34 = vmul.f32 %v4315_v24, %v6749_v22  ;;  %v3102_v19 = vmul.f32 %v4315_v24, %v6762_v63  ;;  %v3198_v43 = vmul.f32 %v4315_v24, %v6769_v41  ;;  %v2852_v46 = vadd.f32 %v6841_v28, %v2820_v10  ;;  %v2307_v22 = vpop.xlane.xlu0 %2306  ;;  %v4480_v63 = vld [vmem:[%s4880_s24 + $0x2a0] sm:$0xff] }
 0x32d   : > { %v2407_v2 = vmax.f32 %v2375_v3, %v6807_v14  ;;  %v6850_v16 = vmax.f32 %v2377_v47, %v6832_v32  ;;  %v6852_v1 = vpop.eup %4318  ;;  %v3263_v59 = vadd.f32 %v3231_v6, %v3167_v37  ;;  %v2974_v53 = vmul.f32 %v4478_v18, %v2942_v0  ;;  %v7208_v24 = vld [vmem:[#allocation31_spill] sm:$0xff]  ;;  %v4482_v37 = vld [vmem:[%s4880_s24 + $0xd8] sm:$0xff] }
 0x32e   : > { %v3038_v30 = vmul.f32 %v4479_v39, %v3006_v34  ;;  %4328 = vpow2.f32 %v2780_v12  ;;  %v3134_v41 = vmul.f32 %v4480_v63, %v3102_v19  ;;  %v2884_v52 = vadd.f32 %v6852_v1, %v2852_v46 }
 0x32f   : > { %4330 = vpow2.f32 %v2490_v35  ;;  %v2439_v7 = vsub.f32 %v7189_v4, %v2407_v2  ;;  %3295 = vst.msk [vmem:[%s6069_s12 + $0xa8] sm:$0xff] %vm812_vm0, %v3263_v59  ;;  %v2535_v21 = vsub.f32 %v7188_v36, %v2407_v2  ;;  %v2631_v62 = vsub.f32 %v6776_v5, %v2407_v2 }
 0x330   : > { %v3070_v47 = vadd.f32 %v3038_v30, %v2974_v53  ;;  %4332 = vpow2.f32 %v2586_v11  ;;  %v6863_v27 = vpop.eup %4320  ;;  %v2727_v12 = vsub.f32 %v6807_v14, %v2407_v2  ;;  %v2406_v25 = vmax.f32 %v2374_v57, %v2307_v22  ;;  %v4485_v53 = vld [vmem:[%s4880_s24 + $0x3d8] sm:$0xff] }
 0x331   : > { %4334 = vrcp.f32 %v2884_v52  ;;  %v2500_v20 = vmul.f32 1.442695, %v2439_v7  ;;  %v3230_v55 = vmul.f32 %v4481_v33, %v3198_v43  ;;  %v2596_v4 = vmul.f32 1.442695, %v2535_v21  ;;  %v4486_v33 = vld [vmem:[%s4880_s24 + $0xd0] sm:$0xff] }
 0x332   : > { %v3166_v54 = vadd.f32 %v3134_v41, %v3070_v47  ;;  %4336 = vpow2.f32 %v2682_v15  ;;  %v2692_v58 = vmul.f32 1.442695, %v2631_v62  ;;  %v2438_v36 = vsub.f32 %v7203_v60, %v2406_v25 }
 0x333   : > { %v6867_v51 = vpop.eup %4322  ;;  %4338 = vpow2.f32 %v2778_v40  ;;  %v2534_v5 = vsub.f32 %v7202_v42, %v2406_v25  ;;  %v2630_v23 = vsub.f32 %v6823_v49, %v2406_v25  ;;  %v2788_v61 = vmul.f32 1.442695, %v2727_v12  ;;  %v7207_v49 = vld [vmem:[#allocation29_spill] sm:$0xff] }
 0x334   : > { %v6871_v35 = vpop.eup %4324  ;;  %v3262_v11 = vadd.f32 %v3230_v55, %v3166_v54  ;;  %v2819_v14 = vadd.f32 %v6867_v51, %v6863_v27  ;;  %4340 = vpow2.f32 %v2500_v20  ;;  %v2498_v6 = vmul.f32 1.442695, %v2438_v36  ;;  %v4487_v55 = vld [vmem:[%s4880_s24 + $0x1d0] sm:$0xff] }
 0x335   : > { %v4327_v29 = vpop.eup %4326  ;;  %4342 = vpow2.f32 %v2596_v4  ;;  %v2726_v45 = vsub.f32 %v2307_v22, %v2406_v25  ;;  %v7209_v10 = vmax.f32 %v7207_v49, %v7208_v24  ;;  %v2690_v19 = vmul.f32 1.442695, %v2630_v23  ;;  %v2311_v25 = vpop.xlane.xlu0 %2310 }
 0x336   : > { %3294 = vst.msk [vmem:[%s6069_s12 + $0xa0] sm:$0xff] %vm812_vm0, %v3262_v11  ;;  %v2949_v42 = vmul.f32 %v4327_v29, %v6778_v44  ;;  %v3013_v60 = vmul.f32 %v4327_v29, %v6782_v38  ;;  %v3109_v13 = vmul.f32 %v4327_v29, %v6796_v9  ;;  %v3205_v15 = vmul.f32 %v4327_v29, %v6819_v8  ;;  %v4483_v44 = vld [vmem:[%s4880_s24 + $0x1d8] sm:$0xff]  ;;  %v4489_v29 = vld [vmem:[%s4880_s24 + $0x3d0] sm:$0xff] }
 0x337   : > { %v2851_v40 = vadd.f32 %v6871_v35, %v2819_v14  ;;  %v2376_v3 = vmax.f32 %v7209_v10, %v6794_v26  ;;  %4344 = vpow2.f32 %v2692_v58  ;;  %v2594_v38 = vmul.f32 1.442695, %v2534_v5  ;;  %v4484_v8 = vld [vmem:[%s4880_s24 + $0x2d8] sm:$0xff] }
 0x338   : > { %v6887_v57 = vpop.eup %4328  ;;  %v2981_v0 = vmul.f32 %v4482_v37, %v2949_v42  ;;  %v3045_v34 = vmul.f32 %v4483_v44, %v3013_v60  ;;  %v3141_v43 = vmul.f32 %v4484_v8, %v3109_v13  ;;  %4346 = vpow2.f32 %v2788_v61 }
 0x339   : > { %v6891_v9 = vpop.eup %4330  ;;  %v2883_v46 = vadd.f32 %v6887_v57, %v2851_v40  ;;  %v2786_v2 = vmul.f32 1.442695, %v2726_v45  ;;  %v3237_v39 = vmul.f32 %v4485_v53, %v3205_v15  ;;  %4348 = vpow2.f32 %v2498_v6  ;;  %v4491_v53 = vld [vmem:[%s4880_s24 + $0x1c8] sm:$0xff] }
 0x33a   : > { %v6895_v59 = vpop.eup %4332  ;;  %v3077_v18 = vadd.f32 %v3045_v34, %v2981_v0  ;;  %v2441_v30 = vsub.f32 %v7204_v48, %v6850_v16  ;;  %v2537_v41 = vsub.f32 %v7205_v56, %v6850_v16  ;;  %v2633_v52 = vsub.f32 %v6747_v17, %v6850_v16 }
 0x33b   : > { %v4335_v22 = vpop.eup %4334  ;;  %4350 = vrcp.f32 %v2883_v46  ;;  %v2818_v63 = vadd.f32 %v6895_v59, %v6891_v9  ;;  %v2729_v17 = vsub.f32 %v6832_v32, %v6850_v16  ;;  %v2408_v14 = vmax.f32 %v2376_v3, %v2311_v25 }
 0x33c   : > { %v6906_v7 = vpop.eup %4336  ;;  %v3173_v47 = vadd.f32 %v3141_v43, %v3077_v18  ;;  %v2948_v21 = vmul.f32 %v4335_v22, %v6825_v31  ;;  %v3012_v48 = vmul.f32 %v4335_v22, %v6830_v50  ;;  %v3108_v62 = vmul.f32 %v4335_v22, %v6841_v28 }
 0x33d   : > { %v6911_v20 = vpop.eup %4338  ;;  %v3204_v12 = vmul.f32 %v4335_v22, %v6852_v1  ;;  %v2850_v56 = vadd.f32 %v6906_v7, %v2818_v63  ;;  %4352 = vpow2.f32 %v2594_v38  ;;  %v2504_v4 = vmul.f32 1.442695, %v2441_v30  ;;  %v4488_v1 = vld [vmem:[%s4880_s24 + $0x2d0] sm:$0xff]  ;;  %v4492_v22 = vld [vmem:[%s4880_s24 + $0x2c8] sm:$0xff] }
 0x33e   : > { %v6917_v54 = vpop.eup %4340  ;;  %v3269_v31 = vadd.f32 %v3237_v39, %v3173_v47  ;;  %v2980_v50 = vmul.f32 %v4486_v33, %v2948_v21  ;;  %v3044_v28 = vmul.f32 %v4487_v55, %v3012_v48  ;;  %v3140_v36 = vmul.f32 %v4488_v1, %v3108_v62  ;;  %v4494_v55 = vld [vmem:[%s4880_s24 + $0xc0] sm:$0xff] }
 0x33f   : > { %v6921_v58 = vpop.eup %4342  ;;  %v2882_v5 = vadd.f32 %v6911_v20, %v2850_v56  ;;  %4354 = vpow2.f32 %v2690_v19  ;;  %v2600_v11 = vmul.f32 1.442695, %v2537_v41  ;;  %v3236_v61 = vmul.f32 %v4489_v29, %v3204_v12 }
 0x340   : > { %3301 = vst.msk [vmem:[%s6069_s12 + $0xd8] sm:$0xff] %vm812_vm0, %v3269_v31  ;;  %v3076_v32 = vadd.f32 %v3044_v28, %v2980_v50  ;;  %v2823_v16 = vadd.f32 %v6921_v58, %v6917_v54  ;;  %4356 = vpow2.f32 %v2786_v2  ;;  %v2696_v6 = vmul.f32 1.442695, %v2633_v52  ;;  %v4490_v2 = vld [vmem:[%s4880_s24 + $0xc8] sm:$0xff] }
 0x341   : > { %v6929_v23 = vpop.eup %4344  ;;  %4358 = vrcp.f32 %v2882_v5  ;;  %v2440_v60 = vsub.f32 %v7207_v49, %v2408_v14  ;;  %v2536_v15 = vsub.f32 %v7208_v24, %v2408_v14  ;;  %v2632_v40 = vsub.f32 %v6794_v26, %v2408_v14  ;;  %v4493_v52 = vld [vmem:[%s4880_s24 + $0x3c8] sm:$0xff] }
 0x342   : > { %v3172_v45 = vadd.f32 %v3140_v36, %v3076_v32  ;;  %v2855_v42 = vadd.f32 %v6929_v23, %v2823_v16  ;;  %4360 = vpow2.f32 %v2504_v4  ;;  %v6934_v13 = vpop.eup %4346  ;;  %v2792_v0 = vmul.f32 1.442695, %v2729_v17  ;;  %v4495_v4 = vld [vmem:[%s4880_s24 + $0x1c0] sm:$0xff] }
 0x343   : > { %4362 = vpow2.f32 %v2600_v11  ;;  %v6938_v10 = vpop.eup %4348  ;;  %v2502_v34 = vmul.f32 1.442695, %v2440_v60  ;;  %v2728_v38 = vsub.f32 %v2311_v25, %v2408_v14  ;;  %v2598_v19 = vmul.f32 1.442695, %v2536_v15  ;;  %v4497_v11 = vld [vmem:[%s4880_s24 + $0x3c0] sm:$0xff] }
 0x344   : > { %v3268_v3 = vadd.f32 %v3236_v61, %v3172_v45  ;;  %v2887_v37 = vadd.f32 %v6934_v13, %v2855_v42  ;;  %4364 = vpow2.f32 %v2696_v6  ;;  %v2694_v46 = vmul.f32 1.442695, %v2632_v40 }
 0x345   : > { %v4351_v44 = vpop.eup %4350 }
 0x346   : > { %3300 = vst.msk [vmem:[%s6069_s12 + $0xd0] sm:$0xff] %vm812_vm0, %v3268_v3  ;;  %v2947_v49 = vmul.f32 %v4351_v44, %v6863_v27  ;;  %v3011_v24 = vmul.f32 %v4351_v44, %v6867_v51  ;;  %v3107_v26 = vmul.f32 %v4351_v44, %v6871_v35  ;;  %v3203_v43 = vmul.f32 %v4351_v44, %v6887_v57  ;;  %v4498_v3 = vld [vmem:[%s4880_s24 + $0xe8] sm:$0xff] }
 0x347   : > { %v6946_v8 = vpop.eup %4352  ;;  %4366 = vrcp.f32 %v2887_v37  ;;  %v2790_v57 = vmul.f32 1.442695, %v2728_v38 }
 0x348   : > { %v2979_v18 = vmul.f32 %v4490_v2, %v2947_v49  ;;  %v3043_v39 = vmul.f32 %v4491_v53, %v3011_v24  ;;  %4368 = vpow2.f32 %v2792_v0  ;;  %v2822_v27 = vadd.f32 %v6946_v8, %v6938_v10  ;;  %v4499_v0 = vld [vmem:[%s4880_s24 + $0x1e8] sm:$0xff] }
 0x349   : > { %v6951_v30 = vpop.eup %4354  ;;  %4370 = vpow2.f32 %v2502_v34  ;;  %v3139_v63 = vmul.f32 %v4492_v22, %v3107_v26  ;;  %v3235_v47 = vmul.f32 %v4493_v52, %v3203_v43  ;;  %v4501_v43 = vld [vmem:[%s4880_s24 + $0x3e8] sm:$0xff]  ;;  %v4502_v22 = vld [vmem:[%s4880_s24 + $0xe0] sm:$0xff] }
 0x34a   : > { %v6955_v51 = vpop.eup %4356  ;;  %v3075_v35 = vadd.f32 %v3043_v39, %v2979_v18  ;;  %4372 = vpow2.f32 %v2598_v19  ;;  %v2854_v21 = vadd.f32 %v6951_v30, %v2822_v27 }
 0x34b   : > { %v4359_v41 = vpop.eup %4358  ;;  %4374 = vpow2.f32 %v2694_v46 }
 0x34c   : > { %v6960_v48 = vpop.eup %4360  ;;  %v3171_v62 = vadd.f32 %v3139_v63, %v3075_v35  ;;  %v2946_v12 = vmul.f32 %v4359_v41, %v6891_v9  ;;  %v3010_v56 = vmul.f32 %v4359_v41, %v6895_v59  ;;  %v3106_v17 = vmul.f32 %v4359_v41, %v6906_v7  ;;  %v4496_v7 = vld [vmem:[%s4880_s24 + $0x2c0] sm:$0xff] }
 0x34d   : > { %v6965_v25 = vpop.eup %4362  ;;  %v3202_v31 = vmul.f32 %v4359_v41, %v6911_v20  ;;  %v2886_v33 = vadd.f32 %v6955_v51, %v2854_v21  ;;  %4376 = vpow2.f32 %v2790_v57  ;;  %v4503_v57 = vld [vmem:[%s4880_s24 + $0x1e0] sm:$0xff] }
 0x34e   : > { %v3267_v50 = vadd.f32 %v3235_v47, %v3171_v62  ;;  %v2978_v28 = vmul.f32 %v4494_v55, %v2946_v12  ;;  %v3042_v1 = vmul.f32 %v4495_v4, %v3010_v56  ;;  %v4365_v36 = vpop.eup %4364  ;;  %v2825_v9 = vadd.f32 %v6965_v25, %v6960_v48  ;;  %v4504_v47 = vld [vmem:[%s4880_s24 + $0x2e0] sm:$0xff]  ;;  %v4507_v55 = vld [vmem:[%s4880_s24 + $0x1f8] sm:$0xff] }
 0x34f   : > { %4378 = vrcp.f32 %v2886_v33  ;;  %v3138_v20 = vmul.f32 %v4496_v7, %v3106_v17  ;;  %v3234_v32 = vmul.f32 %v4497_v11, %v3202_v31  ;;  %v4506_v33 = vld [vmem:[%s4880_s24 + $0xf8] sm:$0xff] }
 0x350   : > { %3299 = vst.msk [vmem:[%s6069_s12 + $0xc8] sm:$0xff] %vm812_vm0, %v3267_v50  ;;  %v3074_v59 = vadd.f32 %v3042_v1, %v2978_v28  ;;  %v2857_v16 = vadd.f32 %v4365_v36, %v2825_v9  ;;  %v4508_v1 = vld [vmem:[%s4880_s24 + $0x2f8] sm:$0xff] }
 0x351   : > { %v4367_v5 = vpop.eup %4366 }
 0x352   : > { %v4369_v14 = vpop.eup %4368  ;;  %v3170_v29 = vadd.f32 %v3138_v20, %v3074_v59  ;;  %v2951_v61 = vmul.f32 %v4367_v5, %v6917_v54  ;;  %v3015_v6 = vmul.f32 %v4367_v5, %v6921_v58  ;;  %v3111_v45 = vmul.f32 %v4367_v5, %v6929_v23  ;;  %v4500_v58 = vld [vmem:[%s4880_s24 + $0x2e8] sm:$0xff] }
 0x353   : > { %v4371_v42 = vpop.eup %4370  ;;  %v2889_v60 = vadd.f32 %v4369_v14, %v2857_v16  ;;  %v3207_v34 = vmul.f32 %v4367_v5, %v6934_v13 }
 0x354   : > { %v4373_v15 = vpop.eup %4372  ;;  %v3266_v40 = vadd.f32 %v3234_v32, %v3170_v29  ;;  %v2983_v37 = vmul.f32 %v4498_v3, %v2951_v61  ;;  %v3047_v44 = vmul.f32 %v4499_v0, %v3015_v6  ;;  %v3143_v23 = vmul.f32 %v4500_v58, %v3111_v45  ;;  %v4510_v32 = vld [vmem:[%s4880_s24 + $0xf0] sm:$0xff] }
 0x355   : > { %v4375_v38 = vpop.eup %4374  ;;  %4380 = vrcp.f32 %v2889_v60  ;;  %v2824_v49 = vadd.f32 %v4373_v15, %v4371_v42  ;;  %v3239_v46 = vmul.f32 %v4501_v43, %v3207_v34  ;;  %v4512_v45 = vld [vmem:[%s4880_s24 + $0x2f0] sm:$0xff] }
 0x356   : > { %3298 = vst.msk [vmem:[%s6069_s12 + $0xc0] sm:$0xff] %vm812_vm0, %v3266_v40  ;;  %v3079_v54 = vadd.f32 %v3047_v44, %v2983_v37  ;;  %v4513_v3 = vld [vmem:[%s4880_s24 + $0x3f0] sm:$0xff] }
 0x357   : > { %v2856_v24 = vadd.f32 %v4375_v38, %v2824_v49  ;;  %v4377_v26 = vpop.eup %4376 }
 0x358   : > { %v3175_v19 = vadd.f32 %v3143_v23, %v3079_v54 }
 0x359   : > { %v4379_v2 = vpop.eup %4378  ;;  %v2888_v18 = vadd.f32 %v4377_v26, %v2856_v24 }
 0x35a   : > { %v3271_v13 = vadd.f32 %v3239_v46, %v3175_v19  ;;  %v2950_v53 = vmul.f32 %v4379_v2, %v6938_v10  ;;  %v3014_v39 = vmul.f32 %v4379_v2, %v6946_v8  ;;  %v3110_v27 = vmul.f32 %v4379_v2, %v6951_v30  ;;  %v4505_v8 = vld [vmem:[%s4880_s24 + $0x3e0] sm:$0xff] }
 0x35b   : > { %v3206_v35 = vmul.f32 %v4379_v2, %v6955_v51  ;;  %4382 = vrcp.f32 %v2888_v18 }
 0x35c   : > { %3303 = vst.msk [vmem:[%s6069_s12 + $0xe8] sm:$0xff] %vm812_vm0, %v3271_v13  ;;  %v2982_v63 = vmul.f32 %v4502_v22, %v2950_v53  ;;  %v3046_v41 = vmul.f32 %v4503_v57, %v3014_v39  ;;  %v3142_v21 = vmul.f32 %v4504_v47, %v3110_v27 }
 0x35d   : > { %v3238_v62 = vmul.f32 %v4505_v8, %v3206_v35 }
 0x35e   : > { %v3078_v52 = vadd.f32 %v3046_v41, %v2982_v63 }
 0x35f   : > { %v4381_v10 = vpop.eup %4380 }
 0x360   : > { %v3174_v30 = vadd.f32 %v3142_v21, %v3078_v52  ;;  %v2953_v51 = vmul.f32 %v4381_v10, %v6960_v48  ;;  %v3017_v12 = vmul.f32 %v4381_v10, %v6965_v25  ;;  %v3113_v56 = vmul.f32 %v4381_v10, %v4365_v36  ;;  %v4509_v48 = vld [vmem:[%s4880_s24 + $0x3f8] sm:$0xff] }
 0x361   : > { %v3209_v17 = vmul.f32 %v4381_v10, %v4369_v14  ;;  %v4511_v14 = vld [vmem:[%s4880_s24 + $0x1f0] sm:$0xff] }
 0x362   : > { %v3270_v31 = vadd.f32 %v3238_v62, %v3174_v30  ;;  %v2985_v50 = vmul.f32 %v4506_v33, %v2953_v51  ;;  %v3049_v28 = vmul.f32 %v4507_v55, %v3017_v12  ;;  %v3145_v9 = vmul.f32 %v4508_v1, %v3113_v56 }
 0x363   : > { %v3241_v7 = vmul.f32 %v4509_v48, %v3209_v17 }
 0x364   : > { %3302 = vst.msk [vmem:[%s6069_s12 + $0xe0] sm:$0xff] %vm812_vm0, %v3270_v31  ;;  %v3081_v4 = vadd.f32 %v3049_v28, %v2985_v50 }
 0x365   : > { %v4383_v59 = vpop.eup %4382 }
 0x366   : > { %v3177_v25 = vadd.f32 %v3145_v9, %v3081_v4  ;;  %v2952_v36 = vmul.f32 %v4383_v59, %v4371_v42  ;;  %v3016_v20 = vmul.f32 %v4383_v59, %v4373_v15  ;;  %v3112_v5 = vmul.f32 %v4383_v59, %v4375_v38 }
 0x367   : > { %v3208_v61 = vmul.f32 %v4383_v59, %v4377_v26 }
 0x368   : > { %v3273_v11 = vadd.f32 %v3241_v7, %v3177_v25  ;;  %v2984_v16 = vmul.f32 %v4510_v32, %v2952_v36  ;;  %v3048_v29 = vmul.f32 %v4511_v14, %v3016_v20  ;;  %v3144_v60 = vmul.f32 %v4512_v45, %v3112_v5 }
 0x369   : > { %v3240_v37 = vmul.f32 %v4513_v3, %v3208_v61 }
 0x36a   : > { %3305 = vst.msk [vmem:[%s6069_s12 + $0xf8] sm:$0xff] %vm812_vm0, %v3273_v11  ;;  %v3080_v6 = vadd.f32 %v3048_v29, %v2984_v16 }
 0x36c   : > { %v3176_v40 = vadd.f32 %v3144_v60, %v3080_v6 }
 0x36e   : > { %v3272_v0 = vadd.f32 %v3240_v37, %v3176_v40 }
 0x370   : > { %3304 = vst.msk [vmem:[%s6069_s12 + $0xf0] sm:$0xff] %vm812_vm0, %v3272_v0 }
 0x371 PF: > { %p11_p9 = scmp.ge.s32.totalorder %s4580_s19, 6   ;;  %s7210_s15 = smov %s4532_s16 }
 0x372   : > { %s7211_s16 = smov %s4589_s22  ;;  %s7212_s17 = smov %s4580_s19 }
 0x373   :  { %13 = sbr.rel (!%p11_p9) target bundleno = 2 (0x2), region = 112 }

</bundles_post_ra>
